<compile_context>
chip_gen: v7x
topology: tpu7x:2x2x1
jax: 0.10.0
libtpu: 0.0.40
codegen_flags: <defaults>
</compile_context>

<pallas_src>
import functools

import numpy as np

import jax
import jax.numpy as jnp
from jax import lax
from jax.experimental import pallas as pl
from jax.experimental.pallas import tpu as pltpu


# ----------------------------- fused Pallas kernel ---------------------------


def _fused_ae_kernel(x_ref, w_ref, fv_ref, y_ref, *, layout, num_layers, T, B, H):
    """Whole LSTM-autoencoder forward in one kernel (single program, no grid).

    x_ref : (T*B, Din) f32   time-major, row-flattened input
    w_ref : (Rw, 128)  bf16  packed LSTM W_ih^T / W_hh^T (0.5-prescaled i/f/o cols)
    fv_ref: (Rf, 128)  f32   packed biases + fc_enc/fc_dec/output weights
    y_ref : (T*B, Din) f32   output
    """
    L = num_layers
    f32, bf16 = jnp.float32, jnp.bfloat16
    G = 4 * H

    def wld(name):                       # bf16 MXU operand, loaded at point of use
        off, r, c = layout["w"][name]
        return w_ref[off:off + r, 0:c]

    def fld(name):                       # f32 bias / small weight
        off, r, c = layout["fv"][name]
        return fv_ref[off:off + r, 0:c]

    def bdot(x, w):                      # bf16 x bf16 -> f32 accumulate on the MXU
        return jnp.dot(x.astype(bf16), w, preferred_element_type=f32)

    # sigmoid(z) = 0.5*tanh(0.5*z) + 0.5.  The 0.5 pre-scale is folded into the
    # i/f/o weight columns + biases at prepare time; only the post-tanh affine
    # remains here, with its scale/shift vectors hoisted out of the time loop.
    lane = lax.broadcasted_iota(jnp.int32, (B, G), 1)
    is_g = (lane >= 2 * H) & (lane < 3 * H)
    post_scale = jnp.where(is_g, 1.0, 0.5).astype(f32)
    post_shift = jnp.where(is_g, 0.0, 0.5).astype(f32)
    zeros_bh = jnp.zeros((B, H), f32)

    def cell(gates, c):
        act = jnp.tanh(gates) * post_scale + post_shift     # one EUP pass, (B, 4H)
        i = act[:, 0:H]
        f = act[:, H:2 * H]
        g = act[:, 2 * H:3 * H]
        o = act[:, 3 * H:G]
        c = f * c + i * g
        return o * jnp.tanh(c), c

    # ------------------------------ encoder ---------------------------------
    # Layer 0 input-side gate matmul for ALL T steps in ONE matmul (bias folded),
    # pre-split per step so the slices sit off the recurrent chain.
    xw0 = bdot(x_ref[...], wld("enc_wih_0")) + fld("enc_b_0")
    xw0_t = [xw0[t * B:(t + 1) * B, :] for t in range(T)]

    enc_whh = [wld(f"enc_whh_{l}") for l in range(L)]
    enc_wih = [wld(f"enc_wih_{l}") for l in range(1, L)]
    enc_b = [jnp.broadcast_to(fld(f"enc_b_{l}"), (B, G)) for l in range(1, L)]

    h = [zeros_bh] * L
    c = [zeros_bh] * L
    for t in range(T):                   # static -> fully unrolled wavefront
        for l in range(L):
            gates = bdot(h[l], enc_whh[l])
            if l == 0:
                gates = gates + xw0_t[t]
            else:
                gates = gates + bdot(h[l - 1], enc_wih[l - 1]) + enc_b[l - 1]
            h[l], c[l] = cell(gates, c[l])
    h_last = h[L - 1]                    # only h[-1] of the last layer is consumed

    # ----------------------------- bottleneck -------------------------------
    latent = (jnp.dot(h_last, fld("fc_enc_w"), preferred_element_type=f32)
              + fld("fc_enc_b"))
    dec_h0 = (jnp.dot(latent, fld("fc_dec_w"), preferred_element_type=f32)
              + fld("fc_dec_b"))

    # ------------------------------ decoder ---------------------------------
    # Layer 0 inputs are all zeros (as in the PyTorch module) -> no x@W_ih at all.
    # dec_h0 is replicated to every layer; c0 = 0.
    dec_whh = [wld(f"dec_whh_{l}") for l in range(L)]
    dec_wih = [wld(f"dec_wih_{l}") for l in range(1, L)]
    dec_b = [jnp.broadcast_to(fld(f"dec_b_{l}"), (B, G)) for l in range(L)]

    h = [dec_h0] * L
    c = [zeros_bh] * L
    ys = []
    for t in range(T):
        for l in range(L):
            gates = bdot(h[l], dec_whh[l]) + dec_b[l]
            if l > 0:
                gates = gates + bdot(h[l - 1], dec_wih[l - 1])
            h[l], c[l] = cell(gates, c[l])
        ys.append(h[L - 1])

    # ------- output projection over all timesteps: ONE matmul, ONE store ----
    hs = jnp.concatenate(ys, axis=0)                         # (T*B, H) time-major
    y = jnp.dot(hs, fld("out_w"), preferred_element_type=f32) + fld("out_b")
    y_ref[...] = y.astype(y_ref.dtype)


# ------------------------------ wrapper --------------------------------------


def lstm_autoencoder_forward(x, w_slab, fv_slab, *, layout, num_layers,
                             hidden_dim, latent_dim):
    """x: (B, T, input_dim) -> (B, T, input_dim)."""
    B, T, Din = x.shape
    H = hidden_dim
    # Time-major, row-flattened input: row t*B + b  <->  (t, b).
    x2d = jnp.transpose(x, (1, 0, 2)).reshape(T * B, Din).astype(jnp.float32)

    kernel = functools.partial(_fused_ae_kernel, layout=layout,
                               num_layers=num_layers, T=T, B=B, H=H)
    y2d = pl.pallas_call(
        kernel,
        out_shape=jax.ShapeDtypeStruct((T * B, Din), jnp.float32),
        in_specs=[pl.BlockSpec(memory_space=pltpu.MemorySpace.VMEM)] * 3,
        out_specs=pl.BlockSpec(memory_space=pltpu.MemorySpace.VMEM),
    )(x2d, w_slab, fv_slab)
    return jnp.transpose(y2d.reshape(T, B, Din), (1, 0, 2))


# ------------------------ one-time host-side param prep ----------------------


def _pack_slab(entries, lane, row_align):
    """Pack [(name, 2D array)] into one (rows, lane) slab; offsets are row_align-aligned."""
    layout, blocks, off = {}, [], 0
    for name, a in entries:
        a = np.asarray(a, np.float32)
        r, c = a.shape
        rp = -(-r // row_align) * row_align
        blk = np.zeros((rp, lane), np.float32)
        blk[:r, :c] = a
        blocks.append(blk)
        layout[name] = (off, r, c)
        off += rp
    return np.concatenate(blocks, axis=0), layout


def prepare_params(params, num_layers, *, hidden_dim, latent_dim):
    """Transpose to (in, 4H), fold b_ih+b_hh, fold the 0.5 sigmoid pre-scale into the
    i/f/o columns, and pack everything into one bf16 weight slab + one f32 aux slab."""
    H, L = hidden_dim, num_layers
    lane = max(4 * H, 128)

    gate_scale = np.ones((4 * H,), np.float32)
    gate_scale[:2 * H] = 0.5           # i, f gates
    gate_scale[3 * H:] = 0.5           # o gate    (g gate columns stay 1.0)

    def wt(key):                        # (4H, in) -> (in, 4H), sigmoid cols pre-scaled
        return np.asarray(params[key], np.float32).T * gate_scale[None, :]

    def bias(name, l):                  # folded + pre-scaled, shape (1, 4H)
        b = (np.asarray(params[f"{name}_b_ih_{l}"], np.float32)
             + np.asarray(params[f"{name}_b_hh_{l}"], np.float32))
        return (b * gate_scale)[None, :]

    w_entries = []
    for l in range(L):
        w_entries.append((f"enc_wih_{l}", wt(f"enc_w_ih_{l}")))
        w_entries.append((f"enc_whh_{l}", wt(f"enc_w_hh_{l}")))
    for l in range(L):
        if l > 0:                       # decoder layer 0 has zero inputs: W_ih unused
            w_entries.append((f"dec_wih_{l}", wt(f"dec_w_ih_{l}")))
        w_entries.append((f"dec_whh_{l}", wt(f"dec_w_hh_{l}")))

    fv_entries = [(f"enc_b_{l}", bias("enc", l)) for l in range(L)]
    fv_entries += [(f"dec_b_{l}", bias("dec", l)) for l in range(L)]
    fv_entries += [
        ("fc_enc_w", np.asarray(params["fc_enc_w"], np.float32).T),
        ("fc_enc_b", np.asarray(params["fc_enc_b"], np.float32)[None, :]),
        ("fc_dec_w", np.asarray(params["fc_dec_w"], np.float32).T),
        ("fc_dec_b", np.asarray(params["fc_dec_b"], np.float32)[None, :]),
        ("out_w", np.asarray(params["out_w"], np.float32).T),
        ("out_b", np.asarray(params["out_b"], np.float32)[None, :]),
    ]

    w_np, w_layout = _pack_slab(w_entries, lane, row_align=16)   # bf16 tile = (16,128)
    fv_np, fv_layout = _pack_slab(fv_entries, lane, row_align=8)  # f32 tile = (8,128)
    w_slab = jnp.asarray(w_np, jnp.bfloat16)
    fv_slab = jnp.asarray(fv_np, jnp.float32)
    return w_slab, fv_slab, {"w": w_layout, "fv": fv_layout}


# -------------------- float64 numpy reference (for checking) -----------------


def _np_sigmoid(z):
    return 1.0 / (1.0 + np.exp(-z))


def _np_lstm_layer(x_tm, w_ih, w_hh, b_ih, b_hh, h0, c0):
    T = x_tm.shape[0]
    H = w_hh.shape[1]
    h, c = h0, c0
    hs = []
    for t in range(T):
        z = x_tm[t] @ w_ih.T + h @ w_hh.T + b_ih + b_hh
        i = _np_sigmoid(z[:, :H])
        f = _np_sigmoid(z[:, H:2 * H])
        g = np.tanh(z[:, 2 * H:3 * H])
        o = _np_sigmoid(z[:, 3 * H:])
        c = f * c + i * g
        h = o * np.tanh(c)
        hs.append(h)
    return np.stack(hs, axis=0)


def _ref_forward(params, x, *, seq_len, hidden_dim, num_layers):
    p = {k: np.asarray(v, np.float64) for k, v in params.items()}
    xb = np.asarray(x, np.float64)
    B = xb.shape[0]
    inp = np.transpose(xb, (1, 0, 2))
    z0 = np.zeros((B, hidden_dim))
    for l in range(num_layers):
        inp = _np_lstm_layer(inp, p[f"enc_w_ih_{l}"], p[f"enc_w_hh_{l}"],
                             p[f"enc_b_ih_{l}"], p[f"enc_b_hh_{l}"], z0, z0)
    h_last = inp[-1]
    latent = h_last @ p["fc_enc_w"].T + p["fc_enc_b"]
    dec_h0 = latent @ p["fc_dec_w"].T + p["fc_dec_b"]
    dec_c0 = np.zeros_like(dec_h0)
    seq = np.zeros((seq_len, B, hidden_dim))
    for l in range(num_layers):
        seq = _np_lstm_layer(seq, p[f"dec_w_ih_{l}"], p[f"dec_w_hh_{l}"],
                             p[f"dec_b_ih_{l}"], p[f"dec_b_hh_{l}"], dec_h0, dec_c0)
    y = seq @ p["out_w"].T + p["out_b"]
    return np.transpose(y, (1, 0, 2))


# ------------------------------ params init ----------------------------------


def init_params(key, input_dim, hidden_dim, latent_dim, num_layers):
    params = {}
    keys = iter(jax.random.split(key, 64))

    def u(shape, fan_in):
        bound = 1.0 / (fan_in ** 0.5)
        return jax.random.uniform(next(keys), shape, jnp.float32, -bound, bound)

    for name, in0 in (("enc", input_dim), ("dec", hidden_dim)):
        for l in range(num_layers):
            din = in0 if l == 0 else hidden_dim
            params[f"{name}_w_ih_{l}"] = u((4 * hidden_dim, din), hidden_dim)
            params[f"{name}_w_hh_{l}"] = u((4 * hidden_dim, hidden_dim), hidden_dim)
            params[f"{name}_b_ih_{l}"] = u((4 * hidden_dim,), hidden_dim)
            params[f"{name}_b_hh_{l}"] = u((4 * hidden_dim,), hidden_dim)
    params["fc_enc_w"] = u((latent_dim, hidden_dim), hidden_dim)
    params["fc_enc_b"] = u((latent_dim,), hidden_dim)
    params["fc_dec_w"] = u((hidden_dim, latent_dim), latent_dim)
    params["fc_dec_b"] = u((hidden_dim,), latent_dim)
    params["out_w"] = u((input_dim, hidden_dim), hidden_dim)
    params["out_b"] = u((input_dim,), hidden_dim)
    return params


# ---------------------------------- main --------------------------------------

if __name__ == "__main__":
    seq_len, input_dim, hidden_dim, latent_dim, num_layers = 8, 4, 32, 16, 2
    batch = 2

    key = jax.random.PRNGKey(0)
    k_x, k_p = jax.random.split(key)
    params = init_params(k_p, input_dim, hidden_dim, latent_dim, num_layers)
    x = jax.random.normal(k_x, (batch, seq_len, input_dim), jnp.float32)

    w_slab, fv_slab, layout = prepare_params(params, num_layers,
                                             hidden_dim=hidden_dim,
                                             latent_dim=latent_dim)
    fwd = jax.jit(functools.partial(lstm_autoencoder_forward, layout=layout,
                                    num_layers=num_layers, hidden_dim=hidden_dim,
                                    latent_dim=latent_dim))
    y = jax.block_until_ready(fwd(x, w_slab, fv_slab))
    assert y.shape == (batch, seq_len, input_dim), y.shape

    y_ref = _ref_forward(params, x, seq_len=seq_len, hidden_dim=hidden_dim,
                         num_layers=num_layers)
    # Tolerance covers the bf16 rounding of the LSTM MXU operands (weights + per-step
    # h casts, f32 accumulation) compounded through the 2x2-layer, T=8 recurrence; the
    # float64 numpy reference keeps the comparison independent of XLA matmul precision.
    err = float(np.max(np.abs(np.asarray(y, np.float64) - y_ref)))
    assert np.allclose(np.asarray(y, np.float64), y_ref, atol=2.5e-2, rtol=2.5e-2), err

    print("KERNEL_OK")
</pallas_src>

<mosaic_0001>
module attributes {stable_mosaic.version = 11 : i64} {
  func.func @_fused_ae_kernel(%arg0: memref<16x4xf32, #tpu.memory_space<vmem>>, %arg1: memref<208x128xbf16, #tpu.memory_space<vmem>>, %arg2: memref<136x128xf32, #tpu.memory_space<vmem>>, %arg3: memref<16x4xf32, #tpu.memory_space<vmem>>) attributes {dimension_semantics = [], scalar_prefetch = 0 : i64, scratch_operands = 0 : i64, tpu.core_type = #tpu.core_type<tc>} {
    %0 = tpu.iota {dimensions = array<i32: 1>} : vector<2x128xi32>
    %c64_i32 = arith.constant 64 : i32
    %1 = vector.broadcast %c64_i32 : i32 to vector<2x128xi32>
    %2 = arith.cmpi sge, %0, %1 : vector<2x128xi32>
    %c96_i32 = arith.constant 96 : i32
    %3 = vector.broadcast %c96_i32 : i32 to vector<2x128xi32>
    %4 = arith.cmpi slt, %0, %3 : vector<2x128xi32>
    %5 = arith.andi %2, %4 : vector<2x128xi1>
    %cst = arith.constant 1.000000e+00 : f32
    %cst_0 = arith.constant 5.000000e-01 : f32
    %6 = vector.broadcast %cst : f32 to vector<2x128xf32>
    %7 = vector.broadcast %cst_0 : f32 to vector<2x128xf32>
    %8 = arith.select %5, %6, %7 : vector<2x128xi1>, vector<2x128xf32>
    %cst_1 = arith.constant 0.000000e+00 : f32
    %cst_2 = arith.constant 5.000000e-01 : f32
    %9 = vector.broadcast %cst_1 : f32 to vector<2x128xf32>
    %10 = vector.broadcast %cst_2 : f32 to vector<2x128xf32>
    %11 = arith.select %5, %9, %10 : vector<2x128xi1>, vector<2x128xf32>
    %cst_3 = arith.constant 0.000000e+00 : f32
    %12 = vector.broadcast %cst_3 : f32 to vector<2x32xf32>
    %c0 = arith.constant 0 : index
    %c0_4 = arith.constant 0 : index
    %13 = vector.load %arg0[%c0, %c0_4] : memref<16x4xf32, #tpu.memory_space<vmem>>, vector<16x4xf32>
    %c0_5 = arith.constant 0 : index
    %c0_6 = arith.constant 0 : index
    %14 = vector.load %arg1[%c0_5, %c0_6] : memref<208x128xbf16, #tpu.memory_space<vmem>>, vector<4x128xbf16>
    %15 = arith.truncf %13 : vector<16x4xf32> to vector<16x4xbf16>
    %cst_7 = arith.constant dense<0.000000e+00> : vector<16x128xf32>
    %16 = tpu.matmul %15, %14, %cst_7 {dimension_numbers = #tpu.dot_dimension_numbers<[1], [0], [0], [1], [0, 0, 1, 1], [], []>} : vector<16x4xbf16>, vector<4x128xbf16>, vector<16x128xf32> -> vector<16x128xf32>
    %c0_8 = arith.constant 0 : index
    %c0_9 = arith.constant 0 : index
    %17 = vector.load %arg2[%c0_8, %c0_9] : memref<136x128xf32, #tpu.memory_space<vmem>>, vector<1x128xf32>
    %18 = vector.broadcast %17 : vector<1x128xf32> to vector<16x128xf32>
    %19 = arith.addf %16, %18 : vector<16x128xf32>
    %20 = vector.extract_strided_slice %19 {offsets = [0, 0], sizes = [2, 128], strides = [1, 1]} : vector<16x128xf32> to vector<2x128xf32>
    %21 = vector.extract_strided_slice %19 {offsets = [2, 0], sizes = [2, 128], strides = [1, 1]} : vector<16x128xf32> to vector<2x128xf32>
    %22 = vector.extract_strided_slice %19 {offsets = [4, 0], sizes = [2, 128], strides = [1, 1]} : vector<16x128xf32> to vector<2x128xf32>
    %23 = vector.extract_strided_slice %19 {offsets = [6, 0], sizes = [2, 128], strides = [1, 1]} : vector<16x128xf32> to vector<2x128xf32>
    %24 = vector.extract_strided_slice %19 {offsets = [8, 0], sizes = [2, 128], strides = [1, 1]} : vector<16x128xf32> to vector<2x128xf32>
    %25 = vector.extract_strided_slice %19 {offsets = [10, 0], sizes = [2, 128], strides = [1, 1]} : vector<16x128xf32> to vector<2x128xf32>
    %26 = vector.extract_strided_slice %19 {offsets = [12, 0], sizes = [2, 128], strides = [1, 1]} : vector<16x128xf32> to vector<2x128xf32>
    %27 = vector.extract_strided_slice %19 {offsets = [14, 0], sizes = [2, 128], strides = [1, 1]} : vector<16x128xf32> to vector<2x128xf32>
    %c16 = arith.constant 16 : index
    %c0_10 = arith.constant 0 : index
    %28 = vector.load %arg1[%c16, %c0_10] : memref<208x128xbf16, #tpu.memory_space<vmem>>, vector<32x128xbf16>
    %c80 = arith.constant 80 : index
    %c0_11 = arith.constant 0 : index
    %29 = vector.load %arg1[%c80, %c0_11] : memref<208x128xbf16, #tpu.memory_space<vmem>>, vector<32x128xbf16>
    %c48 = arith.constant 48 : index
    %c0_12 = arith.constant 0 : index
    %30 = vector.load %arg1[%c48, %c0_12] : memref<208x128xbf16, #tpu.memory_space<vmem>>, vector<32x128xbf16>
    %c8 = arith.constant 8 : index
    %c0_13 = arith.constant 0 : index
    %31 = vector.load %arg2[%c8, %c0_13] : memref<136x128xf32, #tpu.memory_space<vmem>>, vector<1x128xf32>
    %32 = vector.shape_cast %31 : vector<1x128xf32> to vector<1x128xf32>
    %33 = vector.broadcast %32 : vector<1x128xf32> to vector<2x128xf32>
    %34 = arith.truncf %12 : vector<2x32xf32> to vector<2x32xbf16>
    %cst_14 = arith.constant dense<0.000000e+00> : vector<2x128xf32>
    %35 = tpu.matmul %34, %28, %cst_14 {dimension_numbers = #tpu.dot_dimension_numbers<[1], [0], [0], [1], [0, 0, 1, 1], [], []>} : vector<2x32xbf16>, vector<32x128xbf16>, vector<2x128xf32> -> vector<2x128xf32>
    %36 = arith.addf %35, %20 : vector<2x128xf32>
    %37 = math.tanh %36 : vector<2x128xf32>
    %38 = arith.mulf %37, %8 : vector<2x128xf32>
    %39 = arith.addf %38, %11 : vector<2x128xf32>
    %40 = vector.extract_strided_slice %39 {offsets = [0, 0], sizes = [2, 32], strides = [1, 1]} : vector<2x128xf32> to vector<2x32xf32>
    %41 = vector.extract_strided_slice %39 {offsets = [0, 32], sizes = [2, 32], strides = [1, 1]} : vector<2x128xf32> to vector<2x32xf32>
    %42 = vector.extract_strided_slice %39 {offsets = [0, 64], sizes = [2, 32], strides = [1, 1]} : vector<2x128xf32> to vector<2x32xf32>
    %43 = vector.extract_strided_slice %39 {offsets = [0, 96], sizes = [2, 32], strides = [1, 1]} : vector<2x128xf32> to vector<2x32xf32>
    %44 = arith.mulf %41, %12 : vector<2x32xf32>
    %45 = arith.mulf %40, %42 : vector<2x32xf32>
    %46 = arith.addf %44, %45 : vector<2x32xf32>
    %47 = math.tanh %46 : vector<2x32xf32>
    %48 = arith.mulf %43, %47 : vector<2x32xf32>
    %49 = arith.truncf %12 : vector<2x32xf32> to vector<2x32xbf16>
    %cst_15 = arith.constant dense<0.000000e+00> : vector<2x128xf32>
    %50 = tpu.matmul %49, %29, %cst_15 {dimension_numbers = #tpu.dot_dimension_numbers<[1], [0], [0], [1], [0, 0, 1, 1], [], []>} : vector<2x32xbf16>, vector<32x128xbf16>, vector<2x128xf32> -> vector<2x128xf32>
    %51 = arith.truncf %48 : vector<2x32xf32> to vector<2x32xbf16>
    %cst_16 = arith.constant dense<0.000000e+00> : vector<2x128xf32>
    %52 = tpu.matmul %51, %30, %cst_16 {dimension_numbers = #tpu.dot_dimension_numbers<[1], [0], [0], [1], [0, 0, 1, 1], [], []>} : vector<2x32xbf16>, vector<32x128xbf16>, vector<2x128xf32> -> vector<2x128xf32>
    %53 = arith.addf %50, %52 : vector<2x128xf32>
    %54 = arith.addf %53, %33 : vector<2x128xf32>
    %55 = math.tanh %54 : vector<2x128xf32>
    %56 = arith.mulf %55, %8 : vector<2x128xf32>
    %57 = arith.addf %56, %11 : vector<2x128xf32>
    %58 = vector.extract_strided_slice %57 {offsets = [0, 0], sizes = [2, 32], strides = [1, 1]} : vector<2x128xf32> to vector<2x32xf32>
    %59 = vector.extract_strided_slice %57 {offsets = [0, 32], sizes = [2, 32], strides = [1, 1]} : vector<2x128xf32> to vector<2x32xf32>
    %60 = vector.extract_strided_slice %57 {offsets = [0, 64], sizes = [2, 32], strides = [1, 1]} : vector<2x128xf32> to vector<2x32xf32>
    %61 = vector.extract_strided_slice %57 {offsets = [0, 96], sizes = [2, 32], strides = [1, 1]} : vector<2x128xf32> to vector<2x32xf32>
    %62 = arith.mulf %59, %12 : vector<2x32xf32>
    %63 = arith.mulf %58, %60 : vector<2x32xf32>
    %64 = arith.addf %62, %63 : vector<2x32xf32>
    %65 = math.tanh %64 : vector<2x32xf32>
    %66 = arith.mulf %61, %65 : vector<2x32xf32>
    %67 = arith.truncf %48 : vector<2x32xf32> to vector<2x32xbf16>
    %cst_17 = arith.constant dense<0.000000e+00> : vector<2x128xf32>
    %68 = tpu.matmul %67, %28, %cst_17 {dimension_numbers = #tpu.dot_dimension_numbers<[1], [0], [0], [1], [0, 0, 1, 1], [], []>} : vector<2x32xbf16>, vector<32x128xbf16>, vector<2x128xf32> -> vector<2x128xf32>
    %69 = arith.addf %68, %21 : vector<2x128xf32>
    %70 = math.tanh %69 : vector<2x128xf32>
    %71 = arith.mulf %70, %8 : vector<2x128xf32>
    %72 = arith.addf %71, %11 : vector<2x128xf32>
    %73 = vector.extract_strided_slice %72 {offsets = [0, 0], sizes = [2, 32], strides = [1, 1]} : vector<2x128xf32> to vector<2x32xf32>
    %74 = vector.extract_strided_slice %72 {offsets = [0, 32], sizes = [2, 32], strides = [1, 1]} : vector<2x128xf32> to vector<2x32xf32>
    %75 = vector.extract_strided_slice %72 {offsets = [0, 64], sizes = [2, 32], strides = [1, 1]} : vector<2x128xf32> to vector<2x32xf32>
    %76 = vector.extract_strided_slice %72 {offsets = [0, 96], sizes = [2, 32], strides = [1, 1]} : vector<2x128xf32> to vector<2x32xf32>
    %77 = arith.mulf %74, %46 : vector<2x32xf32>
    %78 = arith.mulf %73, %75 : vector<2x32xf32>
    %79 = arith.addf %77, %78 : vector<2x32xf32>
    %80 = math.tanh %79 : vector<2x32xf32>
    %81 = arith.mulf %76, %80 : vector<2x32xf32>
    %82 = arith.truncf %66 : vector<2x32xf32> to vector<2x32xbf16>
    %cst_18 = arith.constant dense<0.000000e+00> : vector<2x128xf32>
    %83 = tpu.matmul %82, %29, %cst_18 {dimension_numbers = #tpu.dot_dimension_numbers<[1], [0], [0], [1], [0, 0, 1, 1], [], []>} : vector<2x32xbf16>, vector<32x128xbf16>, vector<2x128xf32> -> vector<2x128xf32>
    %84 = arith.truncf %81 : vector<2x32xf32> to vector<2x32xbf16>
    %cst_19 = arith.constant dense<0.000000e+00> : vector<2x128xf32>
    %85 = tpu.matmul %84, %30, %cst_19 {dimension_numbers = #tpu.dot_dimension_numbers<[1], [0], [0], [1], [0, 0, 1, 1], [], []>} : vector<2x32xbf16>, vector<32x128xbf16>, vector<2x128xf32> -> vector<2x128xf32>
    %86 = arith.addf %83, %85 : vector<2x128xf32>
    %87 = arith.addf %86, %33 : vector<2x128xf32>
    %88 = math.tanh %87 : vector<2x128xf32>
    %89 = arith.mulf %88, %8 : vector<2x128xf32>
    %90 = arith.addf %89, %11 : vector<2x128xf32>
    %91 = vector.extract_strided_slice %90 {offsets = [0, 0], sizes = [2, 32], strides = [1, 1]} : vector<2x128xf32> to vector<2x32xf32>
    %92 = vector.extract_strided_slice %90 {offsets = [0, 32], sizes = [2, 32], strides = [1, 1]} : vector<2x128xf32> to vector<2x32xf32>
    %93 = vector.extract_strided_slice %90 {offsets = [0, 64], sizes = [2, 32], strides = [1, 1]} : vector<2x128xf32> to vector<2x32xf32>
    %94 = vector.extract_strided_slice %90 {offsets = [0, 96], sizes = [2, 32], strides = [1, 1]} : vector<2x128xf32> to vector<2x32xf32>
    %95 = arith.mulf %92, %64 : vector<2x32xf32>
    %96 = arith.mulf %91, %93 : vector<2x32xf32>
    %97 = arith.addf %95, %96 : vector<2x32xf32>
    %98 = math.tanh %97 : vector<2x32xf32>
    %99 = arith.mulf %94, %98 : vector<2x32xf32>
    %100 = arith.truncf %81 : vector<2x32xf32> to vector<2x32xbf16>
    %cst_20 = arith.constant dense<0.000000e+00> : vector<2x128xf32>
    %101 = tpu.matmul %100, %28, %cst_20 {dimension_numbers = #tpu.dot_dimension_numbers<[1], [0], [0], [1], [0, 0, 1, 1], [], []>} : vector<2x32xbf16>, vector<32x128xbf16>, vector<2x128xf32> -> vector<2x128xf32>
    %102 = arith.addf %101, %22 : vector<2x128xf32>
    %103 = math.tanh %102 : vector<2x128xf32>
    %104 = arith.mulf %103, %8 : vector<2x128xf32>
    %105 = arith.addf %104, %11 : vector<2x128xf32>
    %106 = vector.extract_strided_slice %105 {offsets = [0, 0], sizes = [2, 32], strides = [1, 1]} : vector<2x128xf32> to vector<2x32xf32>
    %107 = vector.extract_strided_slice %105 {offsets = [0, 32], sizes = [2, 32], strides = [1, 1]} : vector<2x128xf32> to vector<2x32xf32>
    %108 = vector.extract_strided_slice %105 {offsets = [0, 64], sizes = [2, 32], strides = [1, 1]} : vector<2x128xf32> to vector<2x32xf32>
    %109 = vector.extract_strided_slice %105 {offsets = [0, 96], sizes = [2, 32], strides = [1, 1]} : vector<2x128xf32> to vector<2x32xf32>
    %110 = arith.mulf %107, %79 : vector<2x32xf32>
    %111 = arith.mulf %106, %108 : vector<2x32xf32>
    %112 = arith.addf %110, %111 : vector<2x32xf32>
    %113 = math.tanh %112 : vector<2x32xf32>
    %114 = arith.mulf %109, %113 : vector<2x32xf32>
    %115 = arith.truncf %99 : vector<2x32xf32> to vector<2x32xbf16>
    %cst_21 = arith.constant dense<0.000000e+00> : vector<2x128xf32>
    %116 = tpu.matmul %115, %29, %cst_21 {dimension_numbers = #tpu.dot_dimension_numbers<[1], [0], [0], [1], [0, 0, 1, 1], [], []>} : vector<2x32xbf16>, vector<32x128xbf16>, vector<2x128xf32> -> vector<2x128xf32>
    %117 = arith.truncf %114 : vector<2x32xf32> to vector<2x32xbf16>
    %cst_22 = arith.constant dense<0.000000e+00> : vector<2x128xf32>
    %118 = tpu.matmul %117, %30, %cst_22 {dimension_numbers = #tpu.dot_dimension_numbers<[1], [0], [0], [1], [0, 0, 1, 1], [], []>} : vector<2x32xbf16>, vector<32x128xbf16>, vector<2x128xf32> -> vector<2x128xf32>
    %119 = arith.addf %116, %118 : vector<2x128xf32>
    %120 = arith.addf %119, %33 : vector<2x128xf32>
    %121 = math.tanh %120 : vector<2x128xf32>
    %122 = arith.mulf %121, %8 : vector<2x128xf32>
    %123 = arith.addf %122, %11 : vector<2x128xf32>
    %124 = vector.extract_strided_slice %123 {offsets = [0, 0], sizes = [2, 32], strides = [1, 1]} : vector<2x128xf32> to vector<2x32xf32>
    %125 = vector.extract_strided_slice %123 {offsets = [0, 32], sizes = [2, 32], strides = [1, 1]} : vector<2x128xf32> to vector<2x32xf32>
    %126 = vector.extract_strided_slice %123 {offsets = [0, 64], sizes = [2, 32], strides = [1, 1]} : vector<2x128xf32> to vector<2x32xf32>
    %127 = vector.extract_strided_slice %123 {offsets = [0, 96], sizes = [2, 32], strides = [1, 1]} : vector<2x128xf32> to vector<2x32xf32>
    %128 = arith.mulf %125, %97 : vector<2x32xf32>
    %129 = arith.mulf %124, %126 : vector<2x32xf32>
    %130 = arith.addf %128, %129 : vector<2x32xf32>
    %131 = math.tanh %130 : vector<2x32xf32>
    %132 = arith.mulf %127, %131 : vector<2x32xf32>
    %133 = arith.truncf %114 : vector<2x32xf32> to vector<2x32xbf16>
    %cst_23 = arith.constant dense<0.000000e+00> : vector<2x128xf32>
    %134 = tpu.matmul %133, %28, %cst_23 {dimension_numbers = #tpu.dot_dimension_numbers<[1], [0], [0], [1], [0, 0, 1, 1], [], []>} : vector<2x32xbf16>, vector<32x128xbf16>, vector<2x128xf32> -> vector<2x128xf32>
    %135 = arith.addf %134, %23 : vector<2x128xf32>
    %136 = math.tanh %135 : vector<2x128xf32>
    %137 = arith.mulf %136, %8 : vector<2x128xf32>
    %138 = arith.addf %137, %11 : vector<2x128xf32>
    %139 = vector.extract_strided_slice %138 {offsets = [0, 0], sizes = [2, 32], strides = [1, 1]} : vector<2x128xf32> to vector<2x32xf32>
    %140 = vector.extract_strided_slice %138 {offsets = [0, 32], sizes = [2, 32], strides = [1, 1]} : vector<2x128xf32> to vector<2x32xf32>
    %141 = vector.extract_strided_slice %138 {offsets = [0, 64], sizes = [2, 32], strides = [1, 1]} : vector<2x128xf32> to vector<2x32xf32>
    %142 = vector.extract_strided_slice %138 {offsets = [0, 96], sizes = [2, 32], strides = [1, 1]} : vector<2x128xf32> to vector<2x32xf32>
    %143 = arith.mulf %140, %112 : vector<2x32xf32>
    %144 = arith.mulf %139, %141 : vector<2x32xf32>
    %145 = arith.addf %143, %144 : vector<2x32xf32>
    %146 = math.tanh %145 : vector<2x32xf32>
    %147 = arith.mulf %142, %146 : vector<2x32xf32>
    %148 = arith.truncf %132 : vector<2x32xf32> to vector<2x32xbf16>
    %cst_24 = arith.constant dense<0.000000e+00> : vector<2x128xf32>
    %149 = tpu.matmul %148, %29, %cst_24 {dimension_numbers = #tpu.dot_dimension_numbers<[1], [0], [0], [1], [0, 0, 1, 1], [], []>} : vector<2x32xbf16>, vector<32x128xbf16>, vector<2x128xf32> -> vector<2x128xf32>
    %150 = arith.truncf %147 : vector<2x32xf32> to vector<2x32xbf16>
    %cst_25 = arith.constant dense<0.000000e+00> : vector<2x128xf32>
    %151 = tpu.matmul %150, %30, %cst_25 {dimension_numbers = #tpu.dot_dimension_numbers<[1], [0], [0], [1], [0, 0, 1, 1], [], []>} : vector<2x32xbf16>, vector<32x128xbf16>, vector<2x128xf32> -> vector<2x128xf32>
    %152 = arith.addf %149, %151 : vector<2x128xf32>
    %153 = arith.addf %152, %33 : vector<2x128xf32>
    %154 = math.tanh %153 : vector<2x128xf32>
    %155 = arith.mulf %154, %8 : vector<2x128xf32>
    %156 = arith.addf %155, %11 : vector<2x128xf32>
    %157 = vector.extract_strided_slice %156 {offsets = [0, 0], sizes = [2, 32], strides = [1, 1]} : vector<2x128xf32> to vector<2x32xf32>
    %158 = vector.extract_strided_slice %156 {offsets = [0, 32], sizes = [2, 32], strides = [1, 1]} : vector<2x128xf32> to vector<2x32xf32>
    %159 = vector.extract_strided_slice %156 {offsets = [0, 64], sizes = [2, 32], strides = [1, 1]} : vector<2x128xf32> to vector<2x32xf32>
    %160 = vector.extract_strided_slice %156 {offsets = [0, 96], sizes = [2, 32], strides = [1, 1]} : vector<2x128xf32> to vector<2x32xf32>
    %161 = arith.mulf %158, %130 : vector<2x32xf32>
    %162 = arith.mulf %157, %159 : vector<2x32xf32>
    %163 = arith.addf %161, %162 : vector<2x32xf32>
    %164 = math.tanh %163 : vector<2x32xf32>
    %165 = arith.mulf %160, %164 : vector<2x32xf32>
    %166 = arith.truncf %147 : vector<2x32xf32> to vector<2x32xbf16>
    %cst_26 = arith.constant dense<0.000000e+00> : vector<2x128xf32>
    %167 = tpu.matmul %166, %28, %cst_26 {dimension_numbers = #tpu.dot_dimension_numbers<[1], [0], [0], [1], [0, 0, 1, 1], [], []>} : vector<2x32xbf16>, vector<32x128xbf16>, vector<2x128xf32> -> vector<2x128xf32>
    %168 = arith.addf %167, %24 : vector<2x128xf32>
    %169 = math.tanh %168 : vector<2x128xf32>
    %170 = arith.mulf %169, %8 : vector<2x128xf32>
    %171 = arith.addf %170, %11 : vector<2x128xf32>
    %172 = vector.extract_strided_slice %171 {offsets = [0, 0], sizes = [2, 32], strides = [1, 1]} : vector<2x128xf32> to vector<2x32xf32>
    %173 = vector.extract_strided_slice %171 {offsets = [0, 32], sizes = [2, 32], strides = [1, 1]} : vector<2x128xf32> to vector<2x32xf32>
    %174 = vector.extract_strided_slice %171 {offsets = [0, 64], sizes = [2, 32], strides = [1, 1]} : vector<2x128xf32> to vector<2x32xf32>
    %175 = vector.extract_strided_slice %171 {offsets = [0, 96], sizes = [2, 32], strides = [1, 1]} : vector<2x128xf32> to vector<2x32xf32>
    %176 = arith.mulf %173, %145 : vector<2x32xf32>
    %177 = arith.mulf %172, %174 : vector<2x32xf32>
    %178 = arith.addf %176, %177 : vector<2x32xf32>
    %179 = math.tanh %178 : vector<2x32xf32>
    %180 = arith.mulf %175, %179 : vector<2x32xf32>
    %181 = arith.truncf %165 : vector<2x32xf32> to vector<2x32xbf16>
    %cst_27 = arith.constant dense<0.000000e+00> : vector<2x128xf32>
    %182 = tpu.matmul %181, %29, %cst_27 {dimension_numbers = #tpu.dot_dimension_numbers<[1], [0], [0], [1], [0, 0, 1, 1], [], []>} : vector<2x32xbf16>, vector<32x128xbf16>, vector<2x128xf32> -> vector<2x128xf32>
    %183 = arith.truncf %180 : vector<2x32xf32> to vector<2x32xbf16>
    %cst_28 = arith.constant dense<0.000000e+00> : vector<2x128xf32>
    %184 = tpu.matmul %183, %30, %cst_28 {dimension_numbers = #tpu.dot_dimension_numbers<[1], [0], [0], [1], [0, 0, 1, 1], [], []>} : vector<2x32xbf16>, vector<32x128xbf16>, vector<2x128xf32> -> vector<2x128xf32>
    %185 = arith.addf %182, %184 : vector<2x128xf32>
    %186 = arith.addf %185, %33 : vector<2x128xf32>
    %187 = math.tanh %186 : vector<2x128xf32>
    %188 = arith.mulf %187, %8 : vector<2x128xf32>
    %189 = arith.addf %188, %11 : vector<2x128xf32>
    %190 = vector.extract_strided_slice %189 {offsets = [0, 0], sizes = [2, 32], strides = [1, 1]} : vector<2x128xf32> to vector<2x32xf32>
    %191 = vector.extract_strided_slice %189 {offsets = [0, 32], sizes = [2, 32], strides = [1, 1]} : vector<2x128xf32> to vector<2x32xf32>
    %192 = vector.extract_strided_slice %189 {offsets = [0, 64], sizes = [2, 32], strides = [1, 1]} : vector<2x128xf32> to vector<2x32xf32>
    %193 = vector.extract_strided_slice %189 {offsets = [0, 96], sizes = [2, 32], strides = [1, 1]} : vector<2x128xf32> to vector<2x32xf32>
    %194 = arith.mulf %191, %163 : vector<2x32xf32>
    %195 = arith.mulf %190, %192 : vector<2x32xf32>
    %196 = arith.addf %194, %195 : vector<2x32xf32>
    %197 = math.tanh %196 : vector<2x32xf32>
    %198 = arith.mulf %193, %197 : vector<2x32xf32>
    %199 = arith.truncf %180 : vector<2x32xf32> to vector<2x32xbf16>
    %cst_29 = arith.constant dense<0.000000e+00> : vector<2x128xf32>
    %200 = tpu.matmul %199, %28, %cst_29 {dimension_numbers = #tpu.dot_dimension_numbers<[1], [0], [0], [1], [0, 0, 1, 1], [], []>} : vector<2x32xbf16>, vector<32x128xbf16>, vector<2x128xf32> -> vector<2x128xf32>
    %201 = arith.addf %200, %25 : vector<2x128xf32>
    %202 = math.tanh %201 : vector<2x128xf32>
    %203 = arith.mulf %202, %8 : vector<2x128xf32>
    %204 = arith.addf %203, %11 : vector<2x128xf32>
    %205 = vector.extract_strided_slice %204 {offsets = [0, 0], sizes = [2, 32], strides = [1, 1]} : vector<2x128xf32> to vector<2x32xf32>
    %206 = vector.extract_strided_slice %204 {offsets = [0, 32], sizes = [2, 32], strides = [1, 1]} : vector<2x128xf32> to vector<2x32xf32>
    %207 = vector.extract_strided_slice %204 {offsets = [0, 64], sizes = [2, 32], strides = [1, 1]} : vector<2x128xf32> to vector<2x32xf32>
    %208 = vector.extract_strided_slice %204 {offsets = [0, 96], sizes = [2, 32], strides = [1, 1]} : vector<2x128xf32> to vector<2x32xf32>
    %209 = arith.mulf %206, %178 : vector<2x32xf32>
    %210 = arith.mulf %205, %207 : vector<2x32xf32>
    %211 = arith.addf %209, %210 : vector<2x32xf32>
    %212 = math.tanh %211 : vector<2x32xf32>
    %213 = arith.mulf %208, %212 : vector<2x32xf32>
    %214 = arith.truncf %198 : vector<2x32xf32> to vector<2x32xbf16>
    %cst_30 = arith.constant dense<0.000000e+00> : vector<2x128xf32>
    %215 = tpu.matmul %214, %29, %cst_30 {dimension_numbers = #tpu.dot_dimension_numbers<[1], [0], [0], [1], [0, 0, 1, 1], [], []>} : vector<2x32xbf16>, vector<32x128xbf16>, vector<2x128xf32> -> vector<2x128xf32>
    %216 = arith.truncf %213 : vector<2x32xf32> to vector<2x32xbf16>
    %cst_31 = arith.constant dense<0.000000e+00> : vector<2x128xf32>
    %217 = tpu.matmul %216, %30, %cst_31 {dimension_numbers = #tpu.dot_dimension_numbers<[1], [0], [0], [1], [0, 0, 1, 1], [], []>} : vector<2x32xbf16>, vector<32x128xbf16>, vector<2x128xf32> -> vector<2x128xf32>
    %218 = arith.addf %215, %217 : vector<2x128xf32>
    %219 = arith.addf %218, %33 : vector<2x128xf32>
    %220 = math.tanh %219 : vector<2x128xf32>
    %221 = arith.mulf %220, %8 : vector<2x128xf32>
    %222 = arith.addf %221, %11 : vector<2x128xf32>
    %223 = vector.extract_strided_slice %222 {offsets = [0, 0], sizes = [2, 32], strides = [1, 1]} : vector<2x128xf32> to vector<2x32xf32>
    %224 = vector.extract_strided_slice %222 {offsets = [0, 32], sizes = [2, 32], strides = [1, 1]} : vector<2x128xf32> to vector<2x32xf32>
    %225 = vector.extract_strided_slice %222 {offsets = [0, 64], sizes = [2, 32], strides = [1, 1]} : vector<2x128xf32> to vector<2x32xf32>
    %226 = vector.extract_strided_slice %222 {offsets = [0, 96], sizes = [2, 32], strides = [1, 1]} : vector<2x128xf32> to vector<2x32xf32>
    %227 = arith.mulf %224, %196 : vector<2x32xf32>
    %228 = arith.mulf %223, %225 : vector<2x32xf32>
    %229 = arith.addf %227, %228 : vector<2x32xf32>
    %230 = math.tanh %229 : vector<2x32xf32>
    %231 = arith.mulf %226, %230 : vector<2x32xf32>
    %232 = arith.truncf %213 : vector<2x32xf32> to vector<2x32xbf16>
    %cst_32 = arith.constant dense<0.000000e+00> : vector<2x128xf32>
    %233 = tpu.matmul %232, %28, %cst_32 {dimension_numbers = #tpu.dot_dimension_numbers<[1], [0], [0], [1], [0, 0, 1, 1], [], []>} : vector<2x32xbf16>, vector<32x128xbf16>, vector<2x128xf32> -> vector<2x128xf32>
    %234 = arith.addf %233, %26 : vector<2x128xf32>
    %235 = math.tanh %234 : vector<2x128xf32>
    %236 = arith.mulf %235, %8 : vector<2x128xf32>
    %237 = arith.addf %236, %11 : vector<2x128xf32>
    %238 = vector.extract_strided_slice %237 {offsets = [0, 0], sizes = [2, 32], strides = [1, 1]} : vector<2x128xf32> to vector<2x32xf32>
    %239 = vector.extract_strided_slice %237 {offsets = [0, 32], sizes = [2, 32], strides = [1, 1]} : vector<2x128xf32> to vector<2x32xf32>
    %240 = vector.extract_strided_slice %237 {offsets = [0, 64], sizes = [2, 32], strides = [1, 1]} : vector<2x128xf32> to vector<2x32xf32>
    %241 = vector.extract_strided_slice %237 {offsets = [0, 96], sizes = [2, 32], strides = [1, 1]} : vector<2x128xf32> to vector<2x32xf32>
    %242 = arith.mulf %239, %211 : vector<2x32xf32>
    %243 = arith.mulf %238, %240 : vector<2x32xf32>
    %244 = arith.addf %242, %243 : vector<2x32xf32>
    %245 = math.tanh %244 : vector<2x32xf32>
    %246 = arith.mulf %241, %245 : vector<2x32xf32>
    %247 = arith.truncf %231 : vector<2x32xf32> to vector<2x32xbf16>
    %cst_33 = arith.constant dense<0.000000e+00> : vector<2x128xf32>
    %248 = tpu.matmul %247, %29, %cst_33 {dimension_numbers = #tpu.dot_dimension_numbers<[1], [0], [0], [1], [0, 0, 1, 1], [], []>} : vector<2x32xbf16>, vector<32x128xbf16>, vector<2x128xf32> -> vector<2x128xf32>
    %249 = arith.truncf %246 : vector<2x32xf32> to vector<2x32xbf16>
    %cst_34 = arith.constant dense<0.000000e+00> : vector<2x128xf32>
    %250 = tpu.matmul %249, %30, %cst_34 {dimension_numbers = #tpu.dot_dimension_numbers<[1], [0], [0], [1], [0, 0, 1, 1], [], []>} : vector<2x32xbf16>, vector<32x128xbf16>, vector<2x128xf32> -> vector<2x128xf32>
    %251 = arith.addf %248, %250 : vector<2x128xf32>
    %252 = arith.addf %251, %33 : vector<2x128xf32>
    %253 = math.tanh %252 : vector<2x128xf32>
    %254 = arith.mulf %253, %8 : vector<2x128xf32>
    %255 = arith.addf %254, %11 : vector<2x128xf32>
    %256 = vector.extract_strided_slice %255 {offsets = [0, 0], sizes = [2, 32], strides = [1, 1]} : vector<2x128xf32> to vector<2x32xf32>
    %257 = vector.extract_strided_slice %255 {offsets = [0, 32], sizes = [2, 32], strides = [1, 1]} : vector<2x128xf32> to vector<2x32xf32>
    %258 = vector.extract_strided_slice %255 {offsets = [0, 64], sizes = [2, 32], strides = [1, 1]} : vector<2x128xf32> to vector<2x32xf32>
    %259 = vector.extract_strided_slice %255 {offsets = [0, 96], sizes = [2, 32], strides = [1, 1]} : vector<2x128xf32> to vector<2x32xf32>
    %260 = arith.mulf %257, %229 : vector<2x32xf32>
    %261 = arith.mulf %256, %258 : vector<2x32xf32>
    %262 = arith.addf %260, %261 : vector<2x32xf32>
    %263 = math.tanh %262 : vector<2x32xf32>
    %264 = arith.mulf %259, %263 : vector<2x32xf32>
    %265 = arith.truncf %246 : vector<2x32xf32> to vector<2x32xbf16>
    %cst_35 = arith.constant dense<0.000000e+00> : vector<2x128xf32>
    %266 = tpu.matmul %265, %28, %cst_35 {dimension_numbers = #tpu.dot_dimension_numbers<[1], [0], [0], [1], [0, 0, 1, 1], [], []>} : vector<2x32xbf16>, vector<32x128xbf16>, vector<2x128xf32> -> vector<2x128xf32>
    %267 = arith.addf %266, %27 : vector<2x128xf32>
    %268 = math.tanh %267 : vector<2x128xf32>
    %269 = arith.mulf %268, %8 : vector<2x128xf32>
    %270 = arith.addf %269, %11 : vector<2x128xf32>
    %271 = vector.extract_strided_slice %270 {offsets = [0, 0], sizes = [2, 32], strides = [1, 1]} : vector<2x128xf32> to vector<2x32xf32>
    %272 = vector.extract_strided_slice %270 {offsets = [0, 32], sizes = [2, 32], strides = [1, 1]} : vector<2x128xf32> to vector<2x32xf32>
    %273 = vector.extract_strided_slice %270 {offsets = [0, 64], sizes = [2, 32], strides = [1, 1]} : vector<2x128xf32> to vector<2x32xf32>
    %274 = vector.extract_strided_slice %270 {offsets = [0, 96], sizes = [2, 32], strides = [1, 1]} : vector<2x128xf32> to vector<2x32xf32>
    %275 = arith.mulf %272, %244 : vector<2x32xf32>
    %276 = arith.mulf %271, %273 : vector<2x32xf32>
    %277 = arith.addf %275, %276 : vector<2x32xf32>
    %278 = math.tanh %277 : vector<2x32xf32>
    %279 = arith.mulf %274, %278 : vector<2x32xf32>
    %280 = arith.truncf %264 : vector<2x32xf32> to vector<2x32xbf16>
    %cst_36 = arith.constant dense<0.000000e+00> : vector<2x128xf32>
    %281 = tpu.matmul %280, %29, %cst_36 {dimension_numbers = #tpu.dot_dimension_numbers<[1], [0], [0], [1], [0, 0, 1, 1], [], []>} : vector<2x32xbf16>, vector<32x128xbf16>, vector<2x128xf32> -> vector<2x128xf32>
    %282 = arith.truncf %279 : vector<2x32xf32> to vector<2x32xbf16>
    %cst_37 = arith.constant dense<0.000000e+00> : vector<2x128xf32>
    %283 = tpu.matmul %282, %30, %cst_37 {dimension_numbers = #tpu.dot_dimension_numbers<[1], [0], [0], [1], [0, 0, 1, 1], [], []>} : vector<2x32xbf16>, vector<32x128xbf16>, vector<2x128xf32> -> vector<2x128xf32>
    %284 = arith.addf %281, %283 : vector<2x128xf32>
    %285 = arith.addf %284, %33 : vector<2x128xf32>
    %286 = math.tanh %285 : vector<2x128xf32>
    %287 = arith.mulf %286, %8 : vector<2x128xf32>
    %288 = arith.addf %287, %11 : vector<2x128xf32>
    %289 = vector.extract_strided_slice %288 {offsets = [0, 0], sizes = [2, 32], strides = [1, 1]} : vector<2x128xf32> to vector<2x32xf32>
    %290 = vector.extract_strided_slice %288 {offsets = [0, 32], sizes = [2, 32], strides = [1, 1]} : vector<2x128xf32> to vector<2x32xf32>
    %291 = vector.extract_strided_slice %288 {offsets = [0, 64], sizes = [2, 32], strides = [1, 1]} : vector<2x128xf32> to vector<2x32xf32>
    %292 = vector.extract_strided_slice %288 {offsets = [0, 96], sizes = [2, 32], strides = [1, 1]} : vector<2x128xf32> to vector<2x32xf32>
    %293 = arith.mulf %290, %262 : vector<2x32xf32>
    %294 = arith.mulf %289, %291 : vector<2x32xf32>
    %295 = arith.addf %293, %294 : vector<2x32xf32>
    %296 = math.tanh %295 : vector<2x32xf32>
    %297 = arith.mulf %292, %296 : vector<2x32xf32>
    %c32 = arith.constant 32 : index
    %c0_38 = arith.constant 0 : index
    %298 = vector.load %arg2[%c32, %c0_38] : memref<136x128xf32, #tpu.memory_space<vmem>>, vector<32x16xf32>
    %cst_39 = arith.constant dense<0.000000e+00> : vector<2x16xf32>
    %299 = tpu.matmul %297, %298, %cst_39 {dimension_numbers = #tpu.dot_dimension_numbers<[1], [0], [0], [1], [0, 0, 1, 1], [], []>} : vector<2x32xf32>, vector<32x16xf32>, vector<2x16xf32> -> vector<2x16xf32>
    %c64 = arith.constant 64 : index
    %c0_40 = arith.constant 0 : index
    %300 = vector.load %arg2[%c64, %c0_40] : memref<136x128xf32, #tpu.memory_space<vmem>>, vector<1x16xf32>
    %301 = vector.broadcast %300 : vector<1x16xf32> to vector<2x16xf32>
    %302 = arith.addf %299, %301 : vector<2x16xf32>
    %c72 = arith.constant 72 : index
    %c0_41 = arith.constant 0 : index
    %303 = vector.load %arg2[%c72, %c0_41] : memref<136x128xf32, #tpu.memory_space<vmem>>, vector<16x32xf32>
    %cst_42 = arith.constant dense<0.000000e+00> : vector<2x32xf32>
    %304 = tpu.matmul %302, %303, %cst_42 {dimension_numbers = #tpu.dot_dimension_numbers<[1], [0], [0], [1], [0, 0, 1, 1], [], []>} : vector<2x16xf32>, vector<16x32xf32>, vector<2x32xf32> -> vector<2x32xf32>
    %c88 = arith.constant 88 : index
    %c0_43 = arith.constant 0 : index
    %305 = vector.load %arg2[%c88, %c0_43] : memref<136x128xf32, #tpu.memory_space<vmem>>, vector<1x32xf32>
    %306 = vector.broadcast %305 : vector<1x32xf32> to vector<2x32xf32>
    %307 = arith.addf %304, %306 : vector<2x32xf32>
    %c112 = arith.constant 112 : index
    %c0_44 = arith.constant 0 : index
    %308 = vector.load %arg1[%c112, %c0_44] : memref<208x128xbf16, #tpu.memory_space<vmem>>, vector<32x128xbf16>
    %c176 = arith.constant 176 : index
    %c0_45 = arith.constant 0 : index
    %309 = vector.load %arg1[%c176, %c0_45] : memref<208x128xbf16, #tpu.memory_space<vmem>>, vector<32x128xbf16>
    %c144 = arith.constant 144 : index
    %c0_46 = arith.constant 0 : index
    %310 = vector.load %arg1[%c144, %c0_46] : memref<208x128xbf16, #tpu.memory_space<vmem>>, vector<32x128xbf16>
    %c16_47 = arith.constant 16 : index
    %c0_48 = arith.constant 0 : index
    %311 = vector.load %arg2[%c16_47, %c0_48] : memref<136x128xf32, #tpu.memory_space<vmem>>, vector<1x128xf32>
    %312 = vector.shape_cast %311 : vector<1x128xf32> to vector<1x128xf32>
    %313 = vector.broadcast %312 : vector<1x128xf32> to vector<2x128xf32>
    %c24 = arith.constant 24 : index
    %c0_49 = arith.constant 0 : index
    %314 = vector.load %arg2[%c24, %c0_49] : memref<136x128xf32, #tpu.memory_space<vmem>>, vector<1x128xf32>
    %315 = vector.shape_cast %314 : vector<1x128xf32> to vector<1x128xf32>
    %316 = vector.broadcast %315 : vector<1x128xf32> to vector<2x128xf32>
    %317 = arith.truncf %307 : vector<2x32xf32> to vector<2x32xbf16>
    %cst_50 = arith.constant dense<0.000000e+00> : vector<2x128xf32>
    %318 = tpu.matmul %317, %308, %cst_50 {dimension_numbers = #tpu.dot_dimension_numbers<[1], [0], [0], [1], [0, 0, 1, 1], [], []>} : vector<2x32xbf16>, vector<32x128xbf16>, vector<2x128xf32> -> vector<2x128xf32>
    %319 = arith.addf %318, %313 : vector<2x128xf32>
    %320 = math.tanh %319 : vector<2x128xf32>
    %321 = arith.mulf %320, %8 : vector<2x128xf32>
    %322 = arith.addf %321, %11 : vector<2x128xf32>
    %323 = vector.extract_strided_slice %322 {offsets = [0, 0], sizes = [2, 32], strides = [1, 1]} : vector<2x128xf32> to vector<2x32xf32>
    %324 = vector.extract_strided_slice %322 {offsets = [0, 32], sizes = [2, 32], strides = [1, 1]} : vector<2x128xf32> to vector<2x32xf32>
    %325 = vector.extract_strided_slice %322 {offsets = [0, 64], sizes = [2, 32], strides = [1, 1]} : vector<2x128xf32> to vector<2x32xf32>
    %326 = vector.extract_strided_slice %322 {offsets = [0, 96], sizes = [2, 32], strides = [1, 1]} : vector<2x128xf32> to vector<2x32xf32>
    %327 = arith.mulf %324, %12 : vector<2x32xf32>
    %328 = arith.mulf %323, %325 : vector<2x32xf32>
    %329 = arith.addf %327, %328 : vector<2x32xf32>
    %330 = math.tanh %329 : vector<2x32xf32>
    %331 = arith.mulf %326, %330 : vector<2x32xf32>
    %332 = arith.truncf %307 : vector<2x32xf32> to vector<2x32xbf16>
    %cst_51 = arith.constant dense<0.000000e+00> : vector<2x128xf32>
    %333 = tpu.matmul %332, %309, %cst_51 {dimension_numbers = #tpu.dot_dimension_numbers<[1], [0], [0], [1], [0, 0, 1, 1], [], []>} : vector<2x32xbf16>, vector<32x128xbf16>, vector<2x128xf32> -> vector<2x128xf32>
    %334 = arith.addf %333, %316 : vector<2x128xf32>
    %335 = arith.truncf %331 : vector<2x32xf32> to vector<2x32xbf16>
    %cst_52 = arith.constant dense<0.000000e+00> : vector<2x128xf32>
    %336 = tpu.matmul %335, %310, %cst_52 {dimension_numbers = #tpu.dot_dimension_numbers<[1], [0], [0], [1], [0, 0, 1, 1], [], []>} : vector<2x32xbf16>, vector<32x128xbf16>, vector<2x128xf32> -> vector<2x128xf32>
    %337 = arith.addf %334, %336 : vector<2x128xf32>
    %338 = math.tanh %337 : vector<2x128xf32>
    %339 = arith.mulf %338, %8 : vector<2x128xf32>
    %340 = arith.addf %339, %11 : vector<2x128xf32>
    %341 = vector.extract_strided_slice %340 {offsets = [0, 0], sizes = [2, 32], strides = [1, 1]} : vector<2x128xf32> to vector<2x32xf32>
    %342 = vector.extract_strided_slice %340 {offsets = [0, 32], sizes = [2, 32], strides = [1, 1]} : vector<2x128xf32> to vector<2x32xf32>
    %343 = vector.extract_strided_slice %340 {offsets = [0, 64], sizes = [2, 32], strides = [1, 1]} : vector<2x128xf32> to vector<2x32xf32>
    %344 = vector.extract_strided_slice %340 {offsets = [0, 96], sizes = [2, 32], strides = [1, 1]} : vector<2x128xf32> to vector<2x32xf32>
    %345 = arith.mulf %342, %12 : vector<2x32xf32>
    %346 = arith.mulf %341, %343 : vector<2x32xf32>
    %347 = arith.addf %345, %346 : vector<2x32xf32>
    %348 = math.tanh %347 : vector<2x32xf32>
    %349 = arith.mulf %344, %348 : vector<2x32xf32>
    %350 = arith.truncf %331 : vector<2x32xf32> to vector<2x32xbf16>
    %cst_53 = arith.constant dense<0.000000e+00> : vector<2x128xf32>
    %351 = tpu.matmul %350, %308, %cst_53 {dimension_numbers = #tpu.dot_dimension_numbers<[1], [0], [0], [1], [0, 0, 1, 1], [], []>} : vector<2x32xbf16>, vector<32x128xbf16>, vector<2x128xf32> -> vector<2x128xf32>
    %352 = arith.addf %351, %313 : vector<2x128xf32>
    %353 = math.tanh %352 : vector<2x128xf32>
    %354 = arith.mulf %353, %8 : vector<2x128xf32>
    %355 = arith.addf %354, %11 : vector<2x128xf32>
    %356 = vector.extract_strided_slice %355 {offsets = [0, 0], sizes = [2, 32], strides = [1, 1]} : vector<2x128xf32> to vector<2x32xf32>
    %357 = vector.extract_strided_slice %355 {offsets = [0, 32], sizes = [2, 32], strides = [1, 1]} : vector<2x128xf32> to vector<2x32xf32>
    %358 = vector.extract_strided_slice %355 {offsets = [0, 64], sizes = [2, 32], strides = [1, 1]} : vector<2x128xf32> to vector<2x32xf32>
    %359 = vector.extract_strided_slice %355 {offsets = [0, 96], sizes = [2, 32], strides = [1, 1]} : vector<2x128xf32> to vector<2x32xf32>
    %360 = arith.mulf %357, %329 : vector<2x32xf32>
    %361 = arith.mulf %356, %358 : vector<2x32xf32>
    %362 = arith.addf %360, %361 : vector<2x32xf32>
    %363 = math.tanh %362 : vector<2x32xf32>
    %364 = arith.mulf %359, %363 : vector<2x32xf32>
    %365 = arith.truncf %349 : vector<2x32xf32> to vector<2x32xbf16>
    %cst_54 = arith.constant dense<0.000000e+00> : vector<2x128xf32>
    %366 = tpu.matmul %365, %309, %cst_54 {dimension_numbers = #tpu.dot_dimension_numbers<[1], [0], [0], [1], [0, 0, 1, 1], [], []>} : vector<2x32xbf16>, vector<32x128xbf16>, vector<2x128xf32> -> vector<2x128xf32>
    %367 = arith.addf %366, %316 : vector<2x128xf32>
    %368 = arith.truncf %364 : vector<2x32xf32> to vector<2x32xbf16>
    %cst_55 = arith.constant dense<0.000000e+00> : vector<2x128xf32>
    %369 = tpu.matmul %368, %310, %cst_55 {dimension_numbers = #tpu.dot_dimension_numbers<[1], [0], [0], [1], [0, 0, 1, 1], [], []>} : vector<2x32xbf16>, vector<32x128xbf16>, vector<2x128xf32> -> vector<2x128xf32>
    %370 = arith.addf %367, %369 : vector<2x128xf32>
    %371 = math.tanh %370 : vector<2x128xf32>
    %372 = arith.mulf %371, %8 : vector<2x128xf32>
    %373 = arith.addf %372, %11 : vector<2x128xf32>
    %374 = vector.extract_strided_slice %373 {offsets = [0, 0], sizes = [2, 32], strides = [1, 1]} : vector<2x128xf32> to vector<2x32xf32>
    %375 = vector.extract_strided_slice %373 {offsets = [0, 32], sizes = [2, 32], strides = [1, 1]} : vector<2x128xf32> to vector<2x32xf32>
    %376 = vector.extract_strided_slice %373 {offsets = [0, 64], sizes = [2, 32], strides = [1, 1]} : vector<2x128xf32> to vector<2x32xf32>
    %377 = vector.extract_strided_slice %373 {offsets = [0, 96], sizes = [2, 32], strides = [1, 1]} : vector<2x128xf32> to vector<2x32xf32>
    %378 = arith.mulf %375, %347 : vector<2x32xf32>
    %379 = arith.mulf %374, %376 : vector<2x32xf32>
    %380 = arith.addf %378, %379 : vector<2x32xf32>
    %381 = math.tanh %380 : vector<2x32xf32>
    %382 = arith.mulf %377, %381 : vector<2x32xf32>
    %383 = arith.truncf %364 : vector<2x32xf32> to vector<2x32xbf16>
    %cst_56 = arith.constant dense<0.000000e+00> : vector<2x128xf32>
    %384 = tpu.matmul %383, %308, %cst_56 {dimension_numbers = #tpu.dot_dimension_numbers<[1], [0], [0], [1], [0, 0, 1, 1], [], []>} : vector<2x32xbf16>, vector<32x128xbf16>, vector<2x128xf32> -> vector<2x128xf32>
    %385 = arith.addf %384, %313 : vector<2x128xf32>
    %386 = math.tanh %385 : vector<2x128xf32>
    %387 = arith.mulf %386, %8 : vector<2x128xf32>
    %388 = arith.addf %387, %11 : vector<2x128xf32>
    %389 = vector.extract_strided_slice %388 {offsets = [0, 0], sizes = [2, 32], strides = [1, 1]} : vector<2x128xf32> to vector<2x32xf32>
    %390 = vector.extract_strided_slice %388 {offsets = [0, 32], sizes = [2, 32], strides = [1, 1]} : vector<2x128xf32> to vector<2x32xf32>
    %391 = vector.extract_strided_slice %388 {offsets = [0, 64], sizes = [2, 32], strides = [1, 1]} : vector<2x128xf32> to vector<2x32xf32>
    %392 = vector.extract_strided_slice %388 {offsets = [0, 96], sizes = [2, 32], strides = [1, 1]} : vector<2x128xf32> to vector<2x32xf32>
    %393 = arith.mulf %390, %362 : vector<2x32xf32>
    %394 = arith.mulf %389, %391 : vector<2x32xf32>
    %395 = arith.addf %393, %394 : vector<2x32xf32>
    %396 = math.tanh %395 : vector<2x32xf32>
    %397 = arith.mulf %392, %396 : vector<2x32xf32>
    %398 = arith.truncf %382 : vector<2x32xf32> to vector<2x32xbf16>
    %cst_57 = arith.constant dense<0.000000e+00> : vector<2x128xf32>
    %399 = tpu.matmul %398, %309, %cst_57 {dimension_numbers = #tpu.dot_dimension_numbers<[1], [0], [0], [1], [0, 0, 1, 1], [], []>} : vector<2x32xbf16>, vector<32x128xbf16>, vector<2x128xf32> -> vector<2x128xf32>
    %400 = arith.addf %399, %316 : vector<2x128xf32>
    %401 = arith.truncf %397 : vector<2x32xf32> to vector<2x32xbf16>
    %cst_58 = arith.constant dense<0.000000e+00> : vector<2x128xf32>
    %402 = tpu.matmul %401, %310, %cst_58 {dimension_numbers = #tpu.dot_dimension_numbers<[1], [0], [0], [1], [0, 0, 1, 1], [], []>} : vector<2x32xbf16>, vector<32x128xbf16>, vector<2x128xf32> -> vector<2x128xf32>
    %403 = arith.addf %400, %402 : vector<2x128xf32>
    %404 = math.tanh %403 : vector<2x128xf32>
    %405 = arith.mulf %404, %8 : vector<2x128xf32>
    %406 = arith.addf %405, %11 : vector<2x128xf32>
    %407 = vector.extract_strided_slice %406 {offsets = [0, 0], sizes = [2, 32], strides = [1, 1]} : vector<2x128xf32> to vector<2x32xf32>
    %408 = vector.extract_strided_slice %406 {offsets = [0, 32], sizes = [2, 32], strides = [1, 1]} : vector<2x128xf32> to vector<2x32xf32>
    %409 = vector.extract_strided_slice %406 {offsets = [0, 64], sizes = [2, 32], strides = [1, 1]} : vector<2x128xf32> to vector<2x32xf32>
    %410 = vector.extract_strided_slice %406 {offsets = [0, 96], sizes = [2, 32], strides = [1, 1]} : vector<2x128xf32> to vector<2x32xf32>
    %411 = arith.mulf %408, %380 : vector<2x32xf32>
    %412 = arith.mulf %407, %409 : vector<2x32xf32>
    %413 = arith.addf %411, %412 : vector<2x32xf32>
    %414 = math.tanh %413 : vector<2x32xf32>
    %415 = arith.mulf %410, %414 : vector<2x32xf32>
    %416 = arith.truncf %397 : vector<2x32xf32> to vector<2x32xbf16>
    %cst_59 = arith.constant dense<0.000000e+00> : vector<2x128xf32>
    %417 = tpu.matmul %416, %308, %cst_59 {dimension_numbers = #tpu.dot_dimension_numbers<[1], [0], [0], [1], [0, 0, 1, 1], [], []>} : vector<2x32xbf16>, vector<32x128xbf16>, vector<2x128xf32> -> vector<2x128xf32>
    %418 = arith.addf %417, %313 : vector<2x128xf32>
    %419 = math.tanh %418 : vector<2x128xf32>
    %420 = arith.mulf %419, %8 : vector<2x128xf32>
    %421 = arith.addf %420, %11 : vector<2x128xf32>
    %422 = vector.extract_strided_slice %421 {offsets = [0, 0], sizes = [2, 32], strides = [1, 1]} : vector<2x128xf32> to vector<2x32xf32>
    %423 = vector.extract_strided_slice %421 {offsets = [0, 32], sizes = [2, 32], strides = [1, 1]} : vector<2x128xf32> to vector<2x32xf32>
    %424 = vector.extract_strided_slice %421 {offsets = [0, 64], sizes = [2, 32], strides = [1, 1]} : vector<2x128xf32> to vector<2x32xf32>
    %425 = vector.extract_strided_slice %421 {offsets = [0, 96], sizes = [2, 32], strides = [1, 1]} : vector<2x128xf32> to vector<2x32xf32>
    %426 = arith.mulf %423, %395 : vector<2x32xf32>
    %427 = arith.mulf %422, %424 : vector<2x32xf32>
    %428 = arith.addf %426, %427 : vector<2x32xf32>
    %429 = math.tanh %428 : vector<2x32xf32>
    %430 = arith.mulf %425, %429 : vector<2x32xf32>
    %431 = arith.truncf %415 : vector<2x32xf32> to vector<2x32xbf16>
    %cst_60 = arith.constant dense<0.000000e+00> : vector<2x128xf32>
    %432 = tpu.matmul %431, %309, %cst_60 {dimension_numbers = #tpu.dot_dimension_numbers<[1], [0], [0], [1], [0, 0, 1, 1], [], []>} : vector<2x32xbf16>, vector<32x128xbf16>, vector<2x128xf32> -> vector<2x128xf32>
    %433 = arith.addf %432, %316 : vector<2x128xf32>
    %434 = arith.truncf %430 : vector<2x32xf32> to vector<2x32xbf16>
    %cst_61 = arith.constant dense<0.000000e+00> : vector<2x128xf32>
    %435 = tpu.matmul %434, %310, %cst_61 {dimension_numbers = #tpu.dot_dimension_numbers<[1], [0], [0], [1], [0, 0, 1, 1], [], []>} : vector<2x32xbf16>, vector<32x128xbf16>, vector<2x128xf32> -> vector<2x128xf32>
    %436 = arith.addf %433, %435 : vector<2x128xf32>
    %437 = math.tanh %436 : vector<2x128xf32>
    %438 = arith.mulf %437, %8 : vector<2x128xf32>
    %439 = arith.addf %438, %11 : vector<2x128xf32>
    %440 = vector.extract_strided_slice %439 {offsets = [0, 0], sizes = [2, 32], strides = [1, 1]} : vector<2x128xf32> to vector<2x32xf32>
    %441 = vector.extract_strided_slice %439 {offsets = [0, 32], sizes = [2, 32], strides = [1, 1]} : vector<2x128xf32> to vector<2x32xf32>
    %442 = vector.extract_strided_slice %439 {offsets = [0, 64], sizes = [2, 32], strides = [1, 1]} : vector<2x128xf32> to vector<2x32xf32>
    %443 = vector.extract_strided_slice %439 {offsets = [0, 96], sizes = [2, 32], strides = [1, 1]} : vector<2x128xf32> to vector<2x32xf32>
    %444 = arith.mulf %441, %413 : vector<2x32xf32>
    %445 = arith.mulf %440, %442 : vector<2x32xf32>
    %446 = arith.addf %444, %445 : vector<2x32xf32>
    %447 = math.tanh %446 : vector<2x32xf32>
    %448 = arith.mulf %443, %447 : vector<2x32xf32>
    %449 = arith.truncf %430 : vector<2x32xf32> to vector<2x32xbf16>
    %cst_62 = arith.constant dense<0.000000e+00> : vector<2x128xf32>
    %450 = tpu.matmul %449, %308, %cst_62 {dimension_numbers = #tpu.dot_dimension_numbers<[1], [0], [0], [1], [0, 0, 1, 1], [], []>} : vector<2x32xbf16>, vector<32x128xbf16>, vector<2x128xf32> -> vector<2x128xf32>
    %451 = arith.addf %450, %313 : vector<2x128xf32>
    %452 = math.tanh %451 : vector<2x128xf32>
    %453 = arith.mulf %452, %8 : vector<2x128xf32>
    %454 = arith.addf %453, %11 : vector<2x128xf32>
    %455 = vector.extract_strided_slice %454 {offsets = [0, 0], sizes = [2, 32], strides = [1, 1]} : vector<2x128xf32> to vector<2x32xf32>
    %456 = vector.extract_strided_slice %454 {offsets = [0, 32], sizes = [2, 32], strides = [1, 1]} : vector<2x128xf32> to vector<2x32xf32>
    %457 = vector.extract_strided_slice %454 {offsets = [0, 64], sizes = [2, 32], strides = [1, 1]} : vector<2x128xf32> to vector<2x32xf32>
    %458 = vector.extract_strided_slice %454 {offsets = [0, 96], sizes = [2, 32], strides = [1, 1]} : vector<2x128xf32> to vector<2x32xf32>
    %459 = arith.mulf %456, %428 : vector<2x32xf32>
    %460 = arith.mulf %455, %457 : vector<2x32xf32>
    %461 = arith.addf %459, %460 : vector<2x32xf32>
    %462 = math.tanh %461 : vector<2x32xf32>
    %463 = arith.mulf %458, %462 : vector<2x32xf32>
    %464 = arith.truncf %448 : vector<2x32xf32> to vector<2x32xbf16>
    %cst_63 = arith.constant dense<0.000000e+00> : vector<2x128xf32>
    %465 = tpu.matmul %464, %309, %cst_63 {dimension_numbers = #tpu.dot_dimension_numbers<[1], [0], [0], [1], [0, 0, 1, 1], [], []>} : vector<2x32xbf16>, vector<32x128xbf16>, vector<2x128xf32> -> vector<2x128xf32>
    %466 = arith.addf %465, %316 : vector<2x128xf32>
    %467 = arith.truncf %463 : vector<2x32xf32> to vector<2x32xbf16>
    %cst_64 = arith.constant dense<0.000000e+00> : vector<2x128xf32>
    %468 = tpu.matmul %467, %310, %cst_64 {dimension_numbers = #tpu.dot_dimension_numbers<[1], [0], [0], [1], [0, 0, 1, 1], [], []>} : vector<2x32xbf16>, vector<32x128xbf16>, vector<2x128xf32> -> vector<2x128xf32>
    %469 = arith.addf %466, %468 : vector<2x128xf32>
    %470 = math.tanh %469 : vector<2x128xf32>
    %471 = arith.mulf %470, %8 : vector<2x128xf32>
    %472 = arith.addf %471, %11 : vector<2x128xf32>
    %473 = vector.extract_strided_slice %472 {offsets = [0, 0], sizes = [2, 32], strides = [1, 1]} : vector<2x128xf32> to vector<2x32xf32>
    %474 = vector.extract_strided_slice %472 {offsets = [0, 32], sizes = [2, 32], strides = [1, 1]} : vector<2x128xf32> to vector<2x32xf32>
    %475 = vector.extract_strided_slice %472 {offsets = [0, 64], sizes = [2, 32], strides = [1, 1]} : vector<2x128xf32> to vector<2x32xf32>
    %476 = vector.extract_strided_slice %472 {offsets = [0, 96], sizes = [2, 32], strides = [1, 1]} : vector<2x128xf32> to vector<2x32xf32>
    %477 = arith.mulf %474, %446 : vector<2x32xf32>
    %478 = arith.mulf %473, %475 : vector<2x32xf32>
    %479 = arith.addf %477, %478 : vector<2x32xf32>
    %480 = math.tanh %479 : vector<2x32xf32>
    %481 = arith.mulf %476, %480 : vector<2x32xf32>
    %482 = arith.truncf %463 : vector<2x32xf32> to vector<2x32xbf16>
    %cst_65 = arith.constant dense<0.000000e+00> : vector<2x128xf32>
    %483 = tpu.matmul %482, %308, %cst_65 {dimension_numbers = #tpu.dot_dimension_numbers<[1], [0], [0], [1], [0, 0, 1, 1], [], []>} : vector<2x32xbf16>, vector<32x128xbf16>, vector<2x128xf32> -> vector<2x128xf32>
    %484 = arith.addf %483, %313 : vector<2x128xf32>
    %485 = math.tanh %484 : vector<2x128xf32>
    %486 = arith.mulf %485, %8 : vector<2x128xf32>
    %487 = arith.addf %486, %11 : vector<2x128xf32>
    %488 = vector.extract_strided_slice %487 {offsets = [0, 0], sizes = [2, 32], strides = [1, 1]} : vector<2x128xf32> to vector<2x32xf32>
    %489 = vector.extract_strided_slice %487 {offsets = [0, 32], sizes = [2, 32], strides = [1, 1]} : vector<2x128xf32> to vector<2x32xf32>
    %490 = vector.extract_strided_slice %487 {offsets = [0, 64], sizes = [2, 32], strides = [1, 1]} : vector<2x128xf32> to vector<2x32xf32>
    %491 = vector.extract_strided_slice %487 {offsets = [0, 96], sizes = [2, 32], strides = [1, 1]} : vector<2x128xf32> to vector<2x32xf32>
    %492 = arith.mulf %489, %461 : vector<2x32xf32>
    %493 = arith.mulf %488, %490 : vector<2x32xf32>
    %494 = arith.addf %492, %493 : vector<2x32xf32>
    %495 = math.tanh %494 : vector<2x32xf32>
    %496 = arith.mulf %491, %495 : vector<2x32xf32>
    %497 = arith.truncf %481 : vector<2x32xf32> to vector<2x32xbf16>
    %cst_66 = arith.constant dense<0.000000e+00> : vector<2x128xf32>
    %498 = tpu.matmul %497, %309, %cst_66 {dimension_numbers = #tpu.dot_dimension_numbers<[1], [0], [0], [1], [0, 0, 1, 1], [], []>} : vector<2x32xbf16>, vector<32x128xbf16>, vector<2x128xf32> -> vector<2x128xf32>
    %499 = arith.addf %498, %316 : vector<2x128xf32>
    %500 = arith.truncf %496 : vector<2x32xf32> to vector<2x32xbf16>
    %cst_67 = arith.constant dense<0.000000e+00> : vector<2x128xf32>
    %501 = tpu.matmul %500, %310, %cst_67 {dimension_numbers = #tpu.dot_dimension_numbers<[1], [0], [0], [1], [0, 0, 1, 1], [], []>} : vector<2x32xbf16>, vector<32x128xbf16>, vector<2x128xf32> -> vector<2x128xf32>
    %502 = arith.addf %499, %501 : vector<2x128xf32>
    %503 = math.tanh %502 : vector<2x128xf32>
    %504 = arith.mulf %503, %8 : vector<2x128xf32>
    %505 = arith.addf %504, %11 : vector<2x128xf32>
    %506 = vector.extract_strided_slice %505 {offsets = [0, 0], sizes = [2, 32], strides = [1, 1]} : vector<2x128xf32> to vector<2x32xf32>
    %507 = vector.extract_strided_slice %505 {offsets = [0, 32], sizes = [2, 32], strides = [1, 1]} : vector<2x128xf32> to vector<2x32xf32>
    %508 = vector.extract_strided_slice %505 {offsets = [0, 64], sizes = [2, 32], strides = [1, 1]} : vector<2x128xf32> to vector<2x32xf32>
    %509 = vector.extract_strided_slice %505 {offsets = [0, 96], sizes = [2, 32], strides = [1, 1]} : vector<2x128xf32> to vector<2x32xf32>
    %510 = arith.mulf %507, %479 : vector<2x32xf32>
    %511 = arith.mulf %506, %508 : vector<2x32xf32>
    %512 = arith.addf %510, %511 : vector<2x32xf32>
    %513 = math.tanh %512 : vector<2x32xf32>
    %514 = arith.mulf %509, %513 : vector<2x32xf32>
    %515 = arith.truncf %496 : vector<2x32xf32> to vector<2x32xbf16>
    %cst_68 = arith.constant dense<0.000000e+00> : vector<2x128xf32>
    %516 = tpu.matmul %515, %308, %cst_68 {dimension_numbers = #tpu.dot_dimension_numbers<[1], [0], [0], [1], [0, 0, 1, 1], [], []>} : vector<2x32xbf16>, vector<32x128xbf16>, vector<2x128xf32> -> vector<2x128xf32>
    %517 = arith.addf %516, %313 : vector<2x128xf32>
    %518 = math.tanh %517 : vector<2x128xf32>
    %519 = arith.mulf %518, %8 : vector<2x128xf32>
    %520 = arith.addf %519, %11 : vector<2x128xf32>
    %521 = vector.extract_strided_slice %520 {offsets = [0, 0], sizes = [2, 32], strides = [1, 1]} : vector<2x128xf32> to vector<2x32xf32>
    %522 = vector.extract_strided_slice %520 {offsets = [0, 32], sizes = [2, 32], strides = [1, 1]} : vector<2x128xf32> to vector<2x32xf32>
    %523 = vector.extract_strided_slice %520 {offsets = [0, 64], sizes = [2, 32], strides = [1, 1]} : vector<2x128xf32> to vector<2x32xf32>
    %524 = vector.extract_strided_slice %520 {offsets = [0, 96], sizes = [2, 32], strides = [1, 1]} : vector<2x128xf32> to vector<2x32xf32>
    %525 = arith.mulf %522, %494 : vector<2x32xf32>
    %526 = arith.mulf %521, %523 : vector<2x32xf32>
    %527 = arith.addf %525, %526 : vector<2x32xf32>
    %528 = math.tanh %527 : vector<2x32xf32>
    %529 = arith.mulf %524, %528 : vector<2x32xf32>
    %530 = arith.truncf %514 : vector<2x32xf32> to vector<2x32xbf16>
    %cst_69 = arith.constant dense<0.000000e+00> : vector<2x128xf32>
    %531 = tpu.matmul %530, %309, %cst_69 {dimension_numbers = #tpu.dot_dimension_numbers<[1], [0], [0], [1], [0, 0, 1, 1], [], []>} : vector<2x32xbf16>, vector<32x128xbf16>, vector<2x128xf32> -> vector<2x128xf32>
    %532 = arith.addf %531, %316 : vector<2x128xf32>
    %533 = arith.truncf %529 : vector<2x32xf32> to vector<2x32xbf16>
    %cst_70 = arith.constant dense<0.000000e+00> : vector<2x128xf32>
    %534 = tpu.matmul %533, %310, %cst_70 {dimension_numbers = #tpu.dot_dimension_numbers<[1], [0], [0], [1], [0, 0, 1, 1], [], []>} : vector<2x32xbf16>, vector<32x128xbf16>, vector<2x128xf32> -> vector<2x128xf32>
    %535 = arith.addf %532, %534 : vector<2x128xf32>
    %536 = math.tanh %535 : vector<2x128xf32>
    %537 = arith.mulf %536, %8 : vector<2x128xf32>
    %538 = arith.addf %537, %11 : vector<2x128xf32>
    %539 = vector.extract_strided_slice %538 {offsets = [0, 0], sizes = [2, 32], strides = [1, 1]} : vector<2x128xf32> to vector<2x32xf32>
    %540 = vector.extract_strided_slice %538 {offsets = [0, 32], sizes = [2, 32], strides = [1, 1]} : vector<2x128xf32> to vector<2x32xf32>
    %541 = vector.extract_strided_slice %538 {offsets = [0, 64], sizes = [2, 32], strides = [1, 1]} : vector<2x128xf32> to vector<2x32xf32>
    %542 = vector.extract_strided_slice %538 {offsets = [0, 96], sizes = [2, 32], strides = [1, 1]} : vector<2x128xf32> to vector<2x32xf32>
    %543 = arith.mulf %540, %512 : vector<2x32xf32>
    %544 = arith.mulf %539, %541 : vector<2x32xf32>
    %545 = arith.addf %543, %544 : vector<2x32xf32>
    %546 = math.tanh %545 : vector<2x32xf32>
    %547 = arith.mulf %542, %546 : vector<2x32xf32>
    %548 = arith.truncf %529 : vector<2x32xf32> to vector<2x32xbf16>
    %cst_71 = arith.constant dense<0.000000e+00> : vector<2x128xf32>
    %549 = tpu.matmul %548, %308, %cst_71 {dimension_numbers = #tpu.dot_dimension_numbers<[1], [0], [0], [1], [0, 0, 1, 1], [], []>} : vector<2x32xbf16>, vector<32x128xbf16>, vector<2x128xf32> -> vector<2x128xf32>
    %550 = arith.addf %549, %313 : vector<2x128xf32>
    %551 = math.tanh %550 : vector<2x128xf32>
    %552 = arith.mulf %551, %8 : vector<2x128xf32>
    %553 = arith.addf %552, %11 : vector<2x128xf32>
    %554 = vector.extract_strided_slice %553 {offsets = [0, 0], sizes = [2, 32], strides = [1, 1]} : vector<2x128xf32> to vector<2x32xf32>
    %555 = vector.extract_strided_slice %553 {offsets = [0, 32], sizes = [2, 32], strides = [1, 1]} : vector<2x128xf32> to vector<2x32xf32>
    %556 = vector.extract_strided_slice %553 {offsets = [0, 64], sizes = [2, 32], strides = [1, 1]} : vector<2x128xf32> to vector<2x32xf32>
    %557 = vector.extract_strided_slice %553 {offsets = [0, 96], sizes = [2, 32], strides = [1, 1]} : vector<2x128xf32> to vector<2x32xf32>
    %558 = arith.mulf %555, %527 : vector<2x32xf32>
    %559 = arith.mulf %554, %556 : vector<2x32xf32>
    %560 = arith.addf %558, %559 : vector<2x32xf32>
    %561 = math.tanh %560 : vector<2x32xf32>
    %562 = arith.mulf %557, %561 : vector<2x32xf32>
    %563 = arith.truncf %547 : vector<2x32xf32> to vector<2x32xbf16>
    %cst_72 = arith.constant dense<0.000000e+00> : vector<2x128xf32>
    %564 = tpu.matmul %563, %309, %cst_72 {dimension_numbers = #tpu.dot_dimension_numbers<[1], [0], [0], [1], [0, 0, 1, 1], [], []>} : vector<2x32xbf16>, vector<32x128xbf16>, vector<2x128xf32> -> vector<2x128xf32>
    %565 = arith.addf %564, %316 : vector<2x128xf32>
    %566 = arith.truncf %562 : vector<2x32xf32> to vector<2x32xbf16>
    %cst_73 = arith.constant dense<0.000000e+00> : vector<2x128xf32>
    %567 = tpu.matmul %566, %310, %cst_73 {dimension_numbers = #tpu.dot_dimension_numbers<[1], [0], [0], [1], [0, 0, 1, 1], [], []>} : vector<2x32xbf16>, vector<32x128xbf16>, vector<2x128xf32> -> vector<2x128xf32>
    %568 = arith.addf %565, %567 : vector<2x128xf32>
    %569 = math.tanh %568 : vector<2x128xf32>
    %570 = arith.mulf %569, %8 : vector<2x128xf32>
    %571 = arith.addf %570, %11 : vector<2x128xf32>
    %572 = vector.extract_strided_slice %571 {offsets = [0, 0], sizes = [2, 32], strides = [1, 1]} : vector<2x128xf32> to vector<2x32xf32>
    %573 = vector.extract_strided_slice %571 {offsets = [0, 32], sizes = [2, 32], strides = [1, 1]} : vector<2x128xf32> to vector<2x32xf32>
    %574 = vector.extract_strided_slice %571 {offsets = [0, 64], sizes = [2, 32], strides = [1, 1]} : vector<2x128xf32> to vector<2x32xf32>
    %575 = vector.extract_strided_slice %571 {offsets = [0, 96], sizes = [2, 32], strides = [1, 1]} : vector<2x128xf32> to vector<2x32xf32>
    %576 = arith.mulf %573, %545 : vector<2x32xf32>
    %577 = arith.mulf %572, %574 : vector<2x32xf32>
    %578 = arith.addf %576, %577 : vector<2x32xf32>
    %579 = math.tanh %578 : vector<2x32xf32>
    %580 = arith.mulf %575, %579 : vector<2x32xf32>
    %581 = tpu.concatenate %349, %382, %415, %448, %481, %514, %547, %580 in 0 : vector<2x32xf32>, vector<2x32xf32>, vector<2x32xf32>, vector<2x32xf32>, vector<2x32xf32>, vector<2x32xf32>, vector<2x32xf32>, vector<2x32xf32> -> vector<16x32xf32>
    %c96 = arith.constant 96 : index
    %c0_74 = arith.constant 0 : index
    %582 = vector.load %arg2[%c96, %c0_74] : memref<136x128xf32, #tpu.memory_space<vmem>>, vector<32x4xf32>
    %cst_75 = arith.constant dense<0.000000e+00> : vector<16x4xf32>
    %583 = tpu.matmul %581, %582, %cst_75 {dimension_numbers = #tpu.dot_dimension_numbers<[1], [0], [0], [1], [0, 0, 1, 1], [], []>} : vector<16x32xf32>, vector<32x4xf32>, vector<16x4xf32> -> vector<16x4xf32>
    %c128 = arith.constant 128 : index
    %c0_76 = arith.constant 0 : index
    %584 = vector.load %arg2[%c128, %c0_76] : memref<136x128xf32, #tpu.memory_space<vmem>>, vector<1x4xf32>
    %585 = vector.broadcast %584 : vector<1x4xf32> to vector<16x4xf32>
    %586 = arith.addf %583, %585 : vector<16x4xf32>
    %c0_77 = arith.constant 0 : index
    %c0_78 = arith.constant 0 : index
    %587 = vector.load %arg3[%c0_77, %c0_78] : memref<16x4xf32, #tpu.memory_space<vmem>>, vector<16x4xf32>
    tpu.vector_store %arg3[%c0_77, %c0_78], %586 {strides = array<i32>} : memref<16x4xf32, #tpu.memory_space<vmem>>, vector<16x4xf32>,
    return
  }
}

</mosaic_0001>

<bundles_post_ra>
// kernel: lstm_autoencoder_forward.1
= control target key start
LH: loop header
LB: loop body
LE: loop exit
PB: predicated region body
PF: predicated region fallthrough
CT: control target
= control target key end

     0   :  { %8 = vsyncpa [#allocation3], 0  ;;  %s5027_s0 = inlined_call_operand.vmem [shape: f32[16,4], index: 0, kind: input, shape index: {}]   ;;  %s5028_s1 = inlined_call_operand.hbm [shape: bf16[208,128], index: 1, kind: input, shape index: {}]   ;;  %s5029_s2 = inlined_call_operand.hbm [shape: f32[136,128], index: 2, kind: input, shape index: {}]   ;;  %s5030_s3 = inlined_call_operand.vmem [shape: f32[16,4], index: 3, kind: output, shape index: {}]  }
   0x1   :  { %9 = vsyncpa [#allocation5], 0  ;;  %s4228_s12 = smov [#allocation2]   ;;  %s4180_s16 = scalar_lea.hbm %s5028_s1, 1664 }
   0x2   :  { %s17_s13 = sshll.u32 %s4228_s12, 4  ;;  %p4181_p0 = scmp.ne.s32.totalorder %s5028_s1, %s4180_s16  ;;  %s18_s13 = int_to_ptr.vmem [resolvable:$true] %s17_s13 }
   0x3   :  { %p4184_p1 = scmp.lt.u32.totalorder %s4180_s16, %s5028_s1 }
   0x5   :  { %p4186_p2 = pnand %p4184_p1, %p4181_p0 }
   0x7   :  { %4189 = shalt.err (!%p4186_p2)
}
   0x8   :  { %s4190_s21 = scalar_lea.vmem %s18_s13, 1664  ;;  %p4195_p4 = scmp.lt.s32.totalorder %s18_s13, %s18_s13 }
   0x9   :  { %p4191_p3 = scmp.ne.s32.totalorder %s18_s13, %s4190_s21  ;;  %p4196_p5 = scmp.lt.s32.totalorder %s4190_s21, %s4190_s21 }
   0xb   :  { %p4197_p6 = por %p4196_p5, %p4195_p4 }
   0xd   :  { %p4198_p7 = pnand %p4197_p6, %p4191_p3 }
   0xf   :  { %4201 = shalt.err (!%p4198_p7)
}
  0x10   :  { %s4229_s22 = smov 64   ;;  %s4230_s23 = smov 4  }
  0x11   :  { %23 = dma.hbm_to_vmem [thread:$0]  %s5028_s1, 1664, %s18_s13, [#allocation3], %s4229_s22, %s4229_s22, %s4230_s23  }
  0x12   :  { %s4231_s26 = smov [#allocation4]   ;;  %s4202_s30 = scalar_lea.hbm %s5029_s2, 2176 }
  0x13   :  { %s29_s27 = sshll.u32 %s4231_s26, 4  ;;  %p4203_p8 = scmp.ne.s32.totalorder %s5029_s2, %s4202_s30  ;;  %s30_s27 = int_to_ptr.vmem [resolvable:$true] %s29_s27 }
  0x14   :  { %p4206_p9 = scmp.lt.u32.totalorder %s4202_s30, %s5029_s2 }
  0x16   :  { %p4208_p10 = pnand %p4206_p9, %p4203_p8 }
  0x18   :  { %4211 = shalt.err (!%p4208_p10)
}
  0x19   :  { %s4212_s8 = scalar_lea.vmem %s30_s27, 2176  ;;  %p4217_p12 = scmp.lt.s32.totalorder %s30_s27, %s30_s27 }
  0x1a   :  { %p4213_p11 = scmp.ne.s32.totalorder %s30_s27, %s4212_s8  ;;  %p4218_p13 = scmp.lt.s32.totalorder %s4212_s8, %s4212_s8 }
  0x1c   :  { %p4219_p0 = por %p4218_p13, %p4217_p12 }
  0x1e   :  { %p4220_p1 = pnand %p4219_p0, %p4213_p11 }
  0x20   :  { %4223 = shalt.err (!%p4220_p1)
}
  0x21   :  { %s4232_s1 = smov 128   ;;  %s4233_s9 = smov 8  }
  0x22   :  { %35 = dma.hbm_to_vmem [thread:$0]  %s5029_s2, 2176, %s30_s27, [#allocation5], %s4232_s1, %s4232_s1, %s4233_s9  }
  0x23   :  { %4224 = dma.done.wait [#allocation3], 1664  }
  0x24   :  { %4225 = vsyncadd [#allocation3], 4294965632 }
  0x25   :  { %4226 = dma.done.wait [#allocation5], 2176  }
  0x26   :  { %4227 = vsyncadd [#allocation5], 4294965120  ;;  %v4234_v0 = vmov 0.0   ;;  %vm4235_vm0 = vmmov 0   ;;  %vm63_vm1 = vcmask 1041408   ;;  %v4293_v3 = vld [vmem:[#allocation2 + $0x8] sm:$0xff]   ;;  %v43_v14 = vlaneseq }
  0x27   :  { %3550 = vmatprep.subr.bf16.mxu0 %v4234_v0  ;;  %3556 = vmatprep.subr.bf16.mxu1 %v4234_v0  ;;  %v52_v1 = vld [vmem:[#allocation2] sm:$0x3]  ;;  %v51_v5 = vld [vmem:[%s5027_s0 + $0x8] sm:$0xff]  ;;  %vm59_vm2 = vcmask 31744   ;;  %v4302_v7 = vld [vmem:[#allocation2 + $0x10] sm:$0xff]   ;;  %v4236_v8 = vmov 0  }
  0x28   :  { %3552 = vmatprep.mubr.msk.bf16.mxu0 %vm4235_vm0, %v4234_v0  ;;  %3560 = vmatprep.mubr.msk.bf16.mxu1 %vm4235_vm0, %v4234_v0  ;;  %v65_v2 = vsel %vm63_vm1, %v52_v1, 0  ;;  %v50_v4 = vld [vmem:[%s5027_s0] sm:$0xff]  ;;  %v3320_v9 = vld [vmem:[#allocation4] ss:$0 sm:$0xff]  ;;  %v44_v20 = vand.u32 127, %v43_v14  ;;  %v4237_v23 = vmov 0.5  }
  0x29   :  { %3551 = vmatpush3.bf16.msra.mxu0 %v65_v2  ;;  %v53_v6 = vpack.c.bf16 %v51_v5, %v50_v4  ;;  %3557 = vmatpush3.bf16.msra.mxu1 %v4293_v3  ;;  %s4238_s0 = smov 32   ;;  %v4329_v34 = vld [vmem:[#allocation2 + $0x18] sm:$0xff]   ;;  %v4331_v35 = vld [vmem:[#allocation2 + $0x28] sm:$0xff]   ;;  %v4335_v36 = vld [vmem:[#allocation2 + $0x20] sm:$0xff]   ;;  %vm137_vm6 = vcmask 261120   ;;  %vm1663_vm7 = vcmask 130048  }
  0x2a   :  { %3564 = vmatprep.subr.bf16.mxu0 %v4234_v0  ;;  %3558 = vmatprep.subr.bf16.mxu1 %v4234_v0  ;;  %vm45_vm3 = vcmp.ge.s32.totalorder %v44_v20, 64  ;;  %vm46_vm4 = vcmp.lt.s32.totalorder %v44_v20, 96  ;;  %v4337_v37 = vld [vmem:[#allocation2 + $0x30] sm:$0xff]   ;;  %vm3211_vm8 = vcmask 1043456   ;;  %vm3213_vm9 = vcmask 1045504  }
  0x2b   :  { %vm47_vm5 = vmand %vm45_vm3, %vm46_vm4  ;;  %v4367_v48 = vld [vmem:[#allocation4 + $0x8] ss:$0 sm:$0xff] }
  0x2c   :  { %3553 = vmatmul.mubr.msk.bf16.vlgmr.msra.gmra.mrb[0].mxu0 %vm59_vm2, %v53_v6  ;;  %v4318_v24 = vsel %vm47_vm5, 1.0, %v4237_v23  ;;  %v4320_v26 = vsel %vm47_vm5, 0.0, %v4237_v23 }
  0x2d   :  { %3568 = vmatprep.mubr.msk.bf16.mxu0 %vm4235_vm0, %v4234_v0  ;;  %3559 = vmatpush3.bf16.msra.mxu1 %v4302_v7 }
  0x2e   :  { %3572 = vmatprep.subr.bf16.mxu1 %v4234_v0  ;;  %3565 = vmatpush3.bf16.msra.mxu0 %v4329_v34 }
  0x2f   :  { %3566 = vmatprep.subr.bf16.mxu0 %v4234_v0 }
  0x30   :  { %3561 = vmatmul.mubr.bf16.vlgmr.msra.gmra.mrb[0].mxu1 %v4236_v8 }
  0x31   :  { %3576 = vmatprep.mubr.msk.bf16.mxu1 %vm4235_vm0, %v4234_v0  ;;  %3573 = vmatpush3.bf16.msra.mxu1 %v4331_v35 }
  0x32   :  { %3574 = vmatprep.subr.bf16.mxu1 %v4234_v0  ;;  %3567 = vmatpush3.bf16.msra.mxu0 %v4335_v36 }
  0x33   :  { %3580 = vmatprep.subr.bf16.mxu0 %v4234_v0 }
  0x35   :  { %3575 = vmatpush3.bf16.msra.mxu1 %v4337_v37 }
  0x36   :  { %3588 = vmatprep.subr.bf16.mxu1 %v4234_v0 }
  0x38   :  { %3577 = vmatmul.mubr.bf16.vlgmr.msra.gmra.mrb[4].mxu1 %v4236_v8 }
  0x39   :  { %3589 = vmatpush3.bf16.msra.mxu1 %v4329_v34  ;;  %3592 = vmatprep.mubr.msk.bf16.mxu1 %vm4235_vm0, %v4234_v0 }
  0x3a   :  { %3590 = vmatprep.subr.bf16.mxu1 %v4234_v0 }
  0x3d   :  { %3591 = vmatpush3.bf16.msra.mxu1 %v4335_v36 }
  0x3e   :  { %3604 = vmatprep.subr.bf16.mxu1 %v4234_v0 }
  0xff   :  { %v101_v10 = vpop.f32.mrb[0].mxu0 }
 0x100   :  { %v3554_v11 = vpop.f32.mrb[1].mxu0  ;;  %v4313_v12 = vadd.f32 %v3320_v9, %v101_v10 }
 0x101   :  { %v104_v13 = vpop.f32.mrb[2].mxu0 }
 0x102   :  { %v4315_v15 = vadd.f32 %v3320_v9, %v104_v13  ;;  %v3555_v16 = vpop.f32.mrb[3].mxu0  ;;  %v334_v54 = vrot.slane %v4313_v12, 2 }
 0x103   :  { %v175_v17 = vpop.f32.mrb[0].mxu1 }
 0x104   :  { %v176_v18 = vadd.f32 %v175_v17, %v4313_v12  ;;  %v3562_v19 = vpop.f32.mrb[1].mxu1 }
 0x105   :  { %v178_v21 = vpop.f32.mrb[2].mxu1 }
 0x106   :  { %4050 = vtanh.f32 %v176_v18  ;;  %v3563_v22 = vpop.f32.mrb[3].mxu1 }
 0x10b   :  { %v306_v43 = vpop.f32.mrb[4].mxu1 }
 0x10c   :  { %v3578_v44 = vpop.f32.mrb[5].mxu1 }
 0x10d   :  { %v309_v45 = vpop.f32.mrb[6].mxu1 }
 0x10e   :  { %v3579_v46 = vpop.f32.mrb[7].mxu1 }
 0x110   :  { %v4051_v25 = vpop.eup %4050 }
 0x111   :  { %v182_v27 = vmul.f32 %v4051_v25, %v4318_v24 }
 0x113   :  { %v183_v28 = vadd.f32 %v182_v27, %v4320_v26 }
 0x115   :  { %186 = vrot.lane.b32.xlu0 %v183_v28, %s4229_s22  ;;  %v184_v31 = vmul.f32 0.0, %v183_v28 }
 0x187   :  { %v187_v29 = vpop.permute.xlu0 %186 }
 0x188   :  { %v189_v30 = vmul.f32 %v187_v29, %v183_v28 }
 0x18a   :  { %191 = vrot.lane.b32.xlu0 %v189_v30, %s4238_s0 }
 0x1fc   :  { %v192_v32 = vpop.permute.xlu0 %191 }
 0x1fd   :  { %v4326_v33 = vadd.f32 %v192_v32, %v184_v31 }
 0x1ff   :  { %4052 = vtanh.f32 %v4326_v33 }
 0x209   :  { %v4053_v38 = vpop.eup %4052 }
 0x20a   :  { %197 = vrot.lane.b32.xlu1 %v4053_v38, %s4229_s22 }
 0x27c   :  { %v198_v39 = vpop.permute.xlu1 %197 }
 0x27d   :  { %v200_v40 = vmul.f32 %v198_v39, %v183_v28 }
 0x27f   :  { %v201_v41 = vpack.c.bf16 %v200_v40, %v200_v40 }
 0x281   :  { %203 = vrot.lane.b32.xlu1 %v201_v41, %s4238_s0 }
 0x2f3   :  { %v204_v42 = vpop.permute.xlu1 %203 }
 0x2f4   :  { %3569 = vmatmul.mubr.msk.bf16.vlgmr.msra.gmra.mrb[4].mxu0 %vm137_vm6, %v204_v42 }
 0x2f5   :  { %3581 = vmatpush3.bf16.msra.mxu0 %v4293_v3  ;;  %3584 = vmatprep.mubr.msk.bf16.mxu0 %vm4235_vm0, %v4234_v0 }
 0x2f6   :  { %3582 = vmatprep.subr.bf16.mxu0 %v4234_v0 }
 0x2f9   :  { %3583 = vmatpush3.bf16.msra.mxu0 %v4302_v7 }
 0x2fa   :  { %3596 = vmatprep.subr.bf16.mxu0 %v4234_v0 }
 0x2fc   :  { %3585 = vmatmul.mubr.msk.bf16.vlgmr.msra.gmra.mrb[8].mxu0 %vm137_vm6, %v204_v42 }
 0x2fd   :  { %3597 = vmatpush3.bf16.msra.mxu0 %v4331_v35  ;;  %3600 = vmatprep.mubr.msk.bf16.mxu0 %vm4235_vm0, %v4234_v0 }
 0x2fe   :  { %3598 = vmatprep.subr.bf16.mxu0 %v4234_v0 }
 0x301   :  { %3599 = vmatpush3.bf16.msra.mxu0 %v4337_v37 }
 0x302   :  { %3612 = vmatprep.subr.bf16.mxu0 %v4234_v0 }
 0x3c7   :  { %v254_v47 = vpop.f32.mrb[4].mxu0 }
 0x3c8   :  { %v307_v49 = vadd.f32 %v306_v43, %v254_v47  ;;  %v3570_v50 = vpop.f32.mrb[5].mxu0  ;;  %v511_v43 = vrot.slane %v4313_v12, 4 }
 0x3c9   :  { %v257_v51 = vpop.f32.mrb[6].mxu0 }
 0x3ca   :  { %v312_v52 = vadd.f32 %v4367_v48, %v307_v49  ;;  %v3571_v53 = vpop.f32.mrb[7].mxu0 }
 0x3cc   :  { %4054 = vtanh.f32 %v312_v52 }
 0x3cf   :  { %v370_v55 = vpop.f32.mrb[8].mxu0 }
 0x3d0   :  { %v371_v56 = vadd.f32 %v370_v55, %v334_v54  ;;  %v3586_v57 = vpop.f32.mrb[9].mxu0 }
 0x3d1   :  { %v373_v58 = vpop.f32.mrb[10].mxu0 }
 0x3d2   :  { %4056 = vtanh.f32 %v371_v56  ;;  %v3587_v59 = vpop.f32.mrb[11].mxu0 }
 0x3d6   :  { %v4055_v60 = vpop.eup %4054 }
 0x3d7   :  { %v314_v61 = vmul.f32 %v4055_v60, %v4318_v24 }
 0x3d9   :  { %v315_v62 = vadd.f32 %v314_v61, %v4320_v26 }
 0x3db   :  { %318 = vrot.lane.b32.xlu1 %v315_v62, %s4229_s22  ;;  %v316_v9 = vmul.f32 0.0, %v315_v62 }
 0x3dc   :  { %v4057_v63 = vpop.eup %4056 }
 0x3dd   :  { %v377_v1 = vmul.f32 %v4057_v63, %v4318_v24 }
 0x3df   :  { %v378_v2 = vadd.f32 %v377_v1, %v4320_v26 }
 0x3e1   :  { %381 = vrot.lane.b32.xlu0 %v378_v2, %s4229_s22  ;;  %v379_v13 = vmul.f32 %v378_v2, %v4326_v33 }
 0x44d   :  { %v319_v4 = vpop.permute.xlu1 %318 }
 0x44e   :  { %v321_v5 = vmul.f32 %v319_v4, %v315_v62 }
 0x450   :  { %323 = vrot.lane.b32.xlu1 %v321_v5, %s4238_s0 }
 0x453   :  { %v382_v6 = vpop.permute.xlu0 %381 }
 0x454   :  { %v384_v8 = vmul.f32 %v382_v6, %v378_v2 }
 0x456   :  { %386 = vrot.lane.b32.xlu0 %v384_v8, %s4238_s0 }
 0x4c2   :  { %v324_v10 = vpop.permute.xlu1 %323 }
 0x4c3   :  { %v4379_v11 = vadd.f32 %v324_v10, %v316_v9 }
 0x4c5   :  { %4058 = vtanh.f32 %v4379_v11 }
 0x4c8   :  { %v387_v14 = vpop.permute.xlu0 %386 }
 0x4c9   :  { %v4383_v16 = vadd.f32 %v387_v14, %v379_v13 }
 0x4cb   :  { %4060 = vtanh.f32 %v4383_v16 }
 0x4cf   :  { %v4059_v17 = vpop.eup %4058 }
 0x4d0   :  { %329 = vrot.lane.b32.xlu1 %v4059_v17, %s4229_s22 }
 0x4d5   :  { %v4061_v18 = vpop.eup %4060 }
 0x4d6   :  { %392 = vrot.lane.b32.xlu0 %v4061_v18, %s4229_s22 }
 0x542   :  { %v330_v19 = vpop.permute.xlu1 %329 }
 0x543   :  { %v332_v20 = vmul.f32 %v330_v19, %v315_v62 }
 0x545   :  { %v396_v21 = vpack.c.bf16 %v332_v20, %v332_v20 }
 0x547   :  { %445 = vrot.lane.b32.xlu1 %v396_v21, %s4238_s0 }
 0x548   :  { %v393_v22 = vpop.permute.xlu0 %392 }
 0x549   :  { %v395_v23 = vmul.f32 %v393_v22, %v378_v2 }
 0x54b   :  { %v397_v25 = vpack.c.bf16 %v395_v23, %v395_v23 }
 0x54d   :  { %399 = vrot.lane.b32.xlu0 %v397_v25, %s4238_s0 }
 0x5b9   :  { %v446_v27 = vpop.permute.xlu1 %445 }
 0x5ba   :  { %3601 = vmatmul.mubr.msk.bf16.vlgmr.msra.gmra.mrb[12].mxu0 %vm137_vm6, %v446_v27 }
 0x5bb   :  { %3613 = vmatpush3.bf16.msra.mxu0 %v4329_v34  ;;  %3616 = vmatprep.mubr.msk.bf16.mxu0 %vm4235_vm0, %v4234_v0 }
 0x5bc   :  { %3614 = vmatprep.subr.bf16.mxu0 %v4234_v0 }
 0x5bf   :  { %v400_v28 = vpop.permute.xlu0 %399  ;;  %3615 = vmatpush3.bf16.msra.mxu0 %v4335_v36 }
 0x5c0   :  { %3593 = vmatmul.mubr.msk.bf16.vlgmr.msra.gmra.mrb[8].mxu1 %vm137_vm6, %v400_v28  ;;  %3628 = vmatprep.subr.bf16.mxu0 %v4234_v0 }
 0x5c1   :  { %3605 = vmatpush3.bf16.msra.mxu1 %v4293_v3  ;;  %3608 = vmatprep.mubr.msk.bf16.mxu1 %vm4235_vm0, %v4234_v0 }
 0x5c2   :  { %3606 = vmatprep.subr.bf16.mxu1 %v4234_v0 }
 0x5c5   :  { %3607 = vmatpush3.bf16.msra.mxu1 %v4302_v7 }
 0x5c6   :  { %3620 = vmatprep.subr.bf16.mxu1 %v4234_v0 }
 0x5c8   :  { %3609 = vmatmul.mubr.msk.bf16.vlgmr.msra.gmra.mrb[12].mxu1 %vm137_vm6, %v400_v28 }
 0x5c9   :  { %3621 = vmatpush3.bf16.msra.mxu1 %v4331_v35  ;;  %3624 = vmatprep.mubr.msk.bf16.mxu1 %vm4235_vm0, %v4234_v0 }
 0x5ca   :  { %3622 = vmatprep.subr.bf16.mxu1 %v4234_v0 }
 0x5cd   :  { %3623 = vmatpush3.bf16.msra.mxu1 %v4337_v37 }
 0x5ce   :  { %3636 = vmatprep.subr.bf16.mxu1 %v4234_v0 }
 0x68d   :  { %v484_v29 = vpop.f32.mrb[12].mxu0 }
 0x68e   :  { %v3602_v30 = vpop.f32.mrb[13].mxu0 }
 0x68f   :  { %v487_v31 = vpop.f32.mrb[14].mxu0 }
 0x690   :  { %v3603_v32 = vpop.f32.mrb[15].mxu0 }
 0x693   :  { %v438_v33 = vpop.f32.mrb[8].mxu1 }
 0x694   :  { %v485_v38 = vadd.f32 %v484_v29, %v438_v33  ;;  %v3594_v39 = vpop.f32.mrb[9].mxu1  ;;  %v688_v29 = vrot.slane %v4313_v12, 6 }
 0x695   :  { %v441_v40 = vpop.f32.mrb[10].mxu1 }
 0x696   :  { %v490_v41 = vadd.f32 %v4367_v48, %v485_v38  ;;  %v3595_v42 = vpop.f32.mrb[11].mxu1 }
 0x698   :  { %4062 = vtanh.f32 %v490_v41 }
 0x69b   :  { %v547_v44 = vpop.f32.mrb[12].mxu1 }
 0x69c   :  { %v548_v45 = vadd.f32 %v547_v44, %v511_v43  ;;  %v3610_v46 = vpop.f32.mrb[13].mxu1 }
 0x69d   :  { %v550_v47 = vpop.f32.mrb[14].mxu1 }
 0x69e   :  { %4064 = vtanh.f32 %v548_v45  ;;  %v3611_v49 = vpop.f32.mrb[15].mxu1 }
 0x6a2   :  { %v4063_v50 = vpop.eup %4062 }
 0x6a3   :  { %v492_v51 = vmul.f32 %v4063_v50, %v4318_v24 }
 0x6a5   :  { %v493_v52 = vadd.f32 %v492_v51, %v4320_v26 }
 0x6a7   :  { %496 = vrot.lane.b32.xlu1 %v493_v52, %s4229_s22  ;;  %v494_v60 = vmul.f32 %v493_v52, %v4379_v11 }
 0x6a8   :  { %v4065_v53 = vpop.eup %4064 }
 0x6a9   :  { %v554_v54 = vmul.f32 %v4065_v53, %v4318_v24 }
 0x6ab   :  { %v555_v55 = vadd.f32 %v554_v54, %v4320_v26 }
 0x6ad   :  { %558 = vrot.lane.b32.xlu0 %v555_v55, %s4229_s22  ;;  %v556_v63 = vmul.f32 %v555_v55, %v4383_v16 }
 0x719   :  { %v497_v56 = vpop.permute.xlu1 %496 }
 0x71a   :  { %v499_v57 = vmul.f32 %v497_v56, %v493_v52 }
 0x71c   :  { %501 = vrot.lane.b32.xlu1 %v499_v57, %s4238_s0 }
 0x71f   :  { %v559_v58 = vpop.permute.xlu0 %558 }
 0x720   :  { %v561_v59 = vmul.f32 %v559_v58, %v555_v55 }
 0x722   :  { %563 = vrot.lane.b32.xlu0 %v561_v59, %s4238_s0 }
 0x78e   :  { %v502_v61 = vpop.permute.xlu1 %501 }
 0x78f   :  { %v4422_v62 = vadd.f32 %v502_v61, %v494_v60 }
 0x791   :  { %4066 = vtanh.f32 %v4422_v62 }
 0x794   :  { %v564_v1 = vpop.permute.xlu0 %563 }
 0x795   :  { %v4426_v2 = vadd.f32 %v564_v1, %v556_v63 }
 0x797   :  { %4068 = vtanh.f32 %v4426_v2 }
 0x79b   :  { %v4067_v4 = vpop.eup %4066 }
 0x79c   :  { %507 = vrot.lane.b32.xlu1 %v4067_v4, %s4229_s22 }
 0x7a1   :  { %v4069_v5 = vpop.eup %4068 }
 0x7a2   :  { %569 = vrot.lane.b32.xlu0 %v4069_v5, %s4229_s22 }
 0x80e   :  { %v508_v6 = vpop.permute.xlu1 %507 }
 0x80f   :  { %v510_v8 = vmul.f32 %v508_v6, %v493_v52 }
 0x811   :  { %v573_v9 = vpack.c.bf16 %v510_v8, %v510_v8 }
 0x813   :  { %622 = vrot.lane.b32.xlu1 %v573_v9, %s4238_s0 }
 0x814   :  { %v570_v10 = vpop.permute.xlu0 %569 }
 0x815   :  { %v572_v11 = vmul.f32 %v570_v10, %v555_v55 }
 0x817   :  { %v574_v13 = vpack.c.bf16 %v572_v11, %v572_v11 }
 0x819   :  { %576 = vrot.lane.b32.xlu0 %v574_v13, %s4238_s0 }
 0x885   :  { %v623_v14 = vpop.permute.xlu1 %622 }
 0x886   :  { %3625 = vmatmul.mubr.msk.bf16.vlgmr.msra.gmra.mrb[16].mxu1 %vm137_vm6, %v623_v14 }
 0x887   :  { %3637 = vmatpush3.bf16.msra.mxu1 %v4329_v34  ;;  %3640 = vmatprep.mubr.msk.bf16.mxu1 %vm4235_vm0, %v4234_v0 }
 0x888   :  { %3638 = vmatprep.subr.bf16.mxu1 %v4234_v0 }
 0x88b   :  { %v577_v16 = vpop.permute.xlu0 %576  ;;  %3639 = vmatpush3.bf16.msra.mxu1 %v4335_v36 }
 0x88c   :  { %3617 = vmatmul.mubr.msk.bf16.vlgmr.msra.gmra.mrb[16].mxu0 %vm137_vm6, %v577_v16  ;;  %3652 = vmatprep.subr.bf16.mxu1 %v4234_v0 }
 0x88d   :  { %3629 = vmatpush3.bf16.msra.mxu0 %v4293_v3  ;;  %3632 = vmatprep.mubr.msk.bf16.mxu0 %vm4235_vm0, %v4234_v0 }
 0x88e   :  { %3630 = vmatprep.subr.bf16.mxu0 %v4234_v0 }
 0x891   :  { %3631 = vmatpush3.bf16.msra.mxu0 %v4302_v7 }
 0x892   :  { %3644 = vmatprep.subr.bf16.mxu0 %v4234_v0 }
 0x894   :  { %3633 = vmatmul.mubr.msk.bf16.vlgmr.msra.gmra.mrb[20].mxu0 %vm137_vm6, %v577_v16 }
 0x895   :  { %3645 = vmatpush3.bf16.msra.mxu0 %v4331_v35  ;;  %3648 = vmatprep.mubr.msk.bf16.mxu0 %vm4235_vm0, %v4234_v0 }
 0x896   :  { %3646 = vmatprep.subr.bf16.mxu0 %v4234_v0 }
 0x899   :  { %3647 = vmatpush3.bf16.msra.mxu0 %v4337_v37 }
 0x89a   :  { %3660 = vmatprep.subr.bf16.mxu0 %v4234_v0 }
 0x959   :  { %v661_v17 = vpop.f32.mrb[16].mxu1 }
 0x95a   :  { %v3626_v18 = vpop.f32.mrb[17].mxu1 }
 0x95b   :  { %v664_v19 = vpop.f32.mrb[18].mxu1 }
 0x95c   :  { %v3627_v20 = vpop.f32.mrb[19].mxu1 }
 0x95f   :  { %v615_v21 = vpop.f32.mrb[16].mxu0 }
 0x960   :  { %v662_v22 = vadd.f32 %v661_v17, %v615_v21  ;;  %v3618_v23 = vpop.f32.mrb[17].mxu0 }
 0x961   :  { %v618_v25 = vpop.f32.mrb[18].mxu0 }
 0x962   :  { %v667_v27 = vadd.f32 %v4367_v48, %v662_v22  ;;  %v3619_v28 = vpop.f32.mrb[19].mxu0 }
 0x964   :  { %4070 = vtanh.f32 %v667_v27 }
 0x967   :  { %v724_v30 = vpop.f32.mrb[20].mxu0 }
 0x968   :  { %v725_v31 = vadd.f32 %v724_v30, %v688_v29  ;;  %v3634_v32 = vpop.f32.mrb[21].mxu0 }
 0x969   :  { %v727_v33 = vpop.f32.mrb[22].mxu0 }
 0x96a   :  { %4072 = vtanh.f32 %v725_v31  ;;  %v3635_v38 = vpop.f32.mrb[23].mxu0 }
 0x96e   :  { %v4071_v39 = vpop.eup %4070 }
 0x96f   :  { %v669_v40 = vmul.f32 %v4071_v39, %v4318_v24 }
 0x971   :  { %v670_v41 = vadd.f32 %v669_v40, %v4320_v26 }
 0x973   :  { %673 = vrot.lane.b32.xlu1 %v670_v41, %s4229_s22  ;;  %v671_v49 = vmul.f32 %v670_v41, %v4422_v62 }
 0x974   :  { %v4073_v42 = vpop.eup %4072 }
 0x975   :  { %v731_v43 = vmul.f32 %v4073_v42, %v4318_v24 }
 0x977   :  { %v732_v44 = vadd.f32 %v731_v43, %v4320_v26 }
 0x979   :  { %735 = vrot.lane.b32.xlu0 %v732_v44, %s4229_s22  ;;  %v733_v52 = vmul.f32 %v732_v44, %v4426_v2 }
 0x9e5   :  { %v674_v12 = vpop.permute.xlu1 %673 }
 0x9e6   :  { %v676_v45 = vmul.f32 %v674_v12, %v670_v41 }
 0x9e8   :  { %678 = vrot.lane.b32.xlu1 %v676_v45, %s4238_s0 }
 0x9eb   :  { %v736_v46 = vpop.permute.xlu0 %735 }
 0x9ec   :  { %v738_v47 = vmul.f32 %v736_v46, %v732_v44 }
 0x9ee   :  { %740 = vrot.lane.b32.xlu0 %v738_v47, %s4238_s0 }
 0xa5a   :  { %v679_v50 = vpop.permute.xlu1 %678 }
 0xa5b   :  { %v4465_v51 = vadd.f32 %v679_v50, %v671_v49 }
 0xa5d   :  { %4074 = vtanh.f32 %v4465_v51 }
 0xa60   :  { %v741_v53 = vpop.permute.xlu0 %740 }
 0xa61   :  { %v4469_v54 = vadd.f32 %v741_v53, %v733_v52 }
 0xa63   :  { %4076 = vtanh.f32 %v4469_v54 }
 0xa67   :  { %v4075_v55 = vpop.eup %4074 }
 0xa68   :  { %684 = vrot.lane.b32.xlu1 %v4075_v55, %s4229_s22 }
 0xa6d   :  { %v4077_v56 = vpop.eup %4076 }
 0xa6e   :  { %746 = vrot.lane.b32.xlu0 %v4077_v56, %s4229_s22 }
 0xada   :  { %v685_v57 = vpop.permute.xlu1 %684 }
 0xadb   :  { %v687_v58 = vmul.f32 %v685_v57, %v670_v41 }
 0xadd   :  { %v750_v59 = vpack.c.bf16 %v687_v58, %v687_v58 }
 0xadf   :  { %799 = vrot.lane.b32.xlu1 %v750_v59, %s4238_s0 }
 0xae0   :  { %v747_v60 = vpop.permute.xlu0 %746 }
 0xae1   :  { %v749_v61 = vmul.f32 %v747_v60, %v732_v44 }
 0xae3   :  { %v751_v62 = vpack.c.bf16 %v749_v61, %v749_v61 }
 0xae5   :  { %753 = vrot.lane.b32.xlu0 %v751_v62, %s4238_s0 }
 0xb51   :  { %v800_v63 = vpop.permute.xlu1 %799 }
 0xb52   :  { %3649 = vmatmul.mubr.msk.bf16.vlgmr.msra.gmra.mrb[24].mxu0 %vm137_vm6, %v800_v63  ;;  %v1041_v63 = vrot.slane %v4315_v15, 2 }
 0xb53   :  { %3661 = vmatpush3.bf16.msra.mxu0 %v4329_v34  ;;  %3664 = vmatprep.mubr.msk.bf16.mxu0 %vm4235_vm0, %v4234_v0 }
 0xb54   :  { %3662 = vmatprep.subr.bf16.mxu0 %v4234_v0 }
 0xb57   :  { %v754_v1 = vpop.permute.xlu0 %753  ;;  %3663 = vmatpush3.bf16.msra.mxu0 %v4335_v36 }
 0xb58   :  { %3641 = vmatmul.mubr.msk.bf16.vlgmr.msra.gmra.mrb[20].mxu1 %vm137_vm6, %v754_v1  ;;  %3676 = vmatprep.subr.bf16.mxu0 %v4234_v0 }
 0xb59   :  { %3653 = vmatpush3.bf16.msra.mxu1 %v4293_v3  ;;  %3656 = vmatprep.mubr.msk.bf16.mxu1 %vm4235_vm0, %v4234_v0 }
 0xb5a   :  { %3654 = vmatprep.subr.bf16.mxu1 %v4234_v0 }
 0xb5d   :  { %3655 = vmatpush3.bf16.msra.mxu1 %v4302_v7 }
 0xb5e   :  { %3668 = vmatprep.subr.bf16.mxu1 %v4234_v0 }
 0xb60   :  { %3657 = vmatmul.mubr.msk.bf16.vlgmr.msra.gmra.mrb[24].mxu1 %vm137_vm6, %v754_v1 }
 0xb61   :  { %3669 = vmatpush3.bf16.msra.mxu1 %v4331_v35  ;;  %3672 = vmatprep.mubr.msk.bf16.mxu1 %vm4235_vm0, %v4234_v0 }
 0xb62   :  { %3670 = vmatprep.subr.bf16.mxu1 %v4234_v0 }
 0xb65   :  { %3671 = vmatpush3.bf16.msra.mxu1 %v4337_v37 }
 0xb66   :  { %3684 = vmatprep.subr.bf16.mxu1 %v4234_v0 }
 0xc25   :  { %v838_v2 = vpop.f32.mrb[24].mxu0 }
 0xc26   :  { %v3650_v4 = vpop.f32.mrb[25].mxu0 }
 0xc27   :  { %v841_v5 = vpop.f32.mrb[26].mxu0 }
 0xc28   :  { %v3651_v6 = vpop.f32.mrb[27].mxu0 }
 0xc2b   :  { %v792_v8 = vpop.f32.mrb[20].mxu1 }
 0xc2c   :  { %v839_v9 = vadd.f32 %v838_v2, %v792_v8  ;;  %v3642_v10 = vpop.f32.mrb[21].mxu1 }
 0xc2d   :  { %v795_v11 = vpop.f32.mrb[22].mxu1 }
 0xc2e   :  { %v844_v13 = vadd.f32 %v4367_v48, %v839_v9  ;;  %v3643_v14 = vpop.f32.mrb[23].mxu1 }
 0xc30   :  { %4078 = vtanh.f32 %v844_v13 }
 0xc33   :  { %v899_v16 = vpop.f32.mrb[24].mxu1 }
 0xc34   :  { %v900_v17 = vadd.f32 %v899_v16, %v4315_v15  ;;  %v3658_v18 = vpop.f32.mrb[25].mxu1 }
 0xc35   :  { %v902_v19 = vpop.f32.mrb[26].mxu1 }
 0xc36   :  { %4080 = vtanh.f32 %v900_v17  ;;  %v3659_v20 = vpop.f32.mrb[27].mxu1 }
 0xc3a   :  { %v4079_v21 = vpop.eup %4078 }
 0xc3b   :  { %v846_v22 = vmul.f32 %v4079_v21, %v4318_v24 }
 0xc3d   :  { %v847_v23 = vadd.f32 %v846_v22, %v4320_v26 }
 0xc3f   :  { %850 = vrot.lane.b32.xlu1 %v847_v23, %s4229_s22  ;;  %v848_v33 = vmul.f32 %v847_v23, %v4465_v51 }
 0xc40   :  { %v4081_v25 = vpop.eup %4080 }
 0xc41   :  { %v906_v27 = vmul.f32 %v4081_v25, %v4318_v24 }
 0xc43   :  { %v907_v28 = vadd.f32 %v906_v27, %v4320_v26 }
 0xc45   :  { %910 = vrot.lane.b32.xlu0 %v907_v28, %s4229_s22  ;;  %v908_v40 = vmul.f32 %v907_v28, %v4469_v54 }
 0xcb1   :  { %v851_v29 = vpop.permute.xlu1 %850 }
 0xcb2   :  { %v853_v30 = vmul.f32 %v851_v29, %v847_v23 }
 0xcb4   :  { %855 = vrot.lane.b32.xlu1 %v853_v30, %s4238_s0 }
 0xcb7   :  { %v911_v31 = vpop.permute.xlu0 %910 }
 0xcb8   :  { %v913_v32 = vmul.f32 %v911_v31, %v907_v28 }
 0xcba   :  { %915 = vrot.lane.b32.xlu0 %v913_v32, %s4238_s0 }
 0xd26   :  { %v856_v38 = vpop.permute.xlu1 %855 }
 0xd27   :  { %v4508_v39 = vadd.f32 %v856_v38, %v848_v33 }
 0xd29   :  { %4082 = vtanh.f32 %v4508_v39 }
 0xd2c   :  { %v916_v41 = vpop.permute.xlu0 %915 }
 0xd2d   :  { %v4512_v42 = vadd.f32 %v916_v41, %v908_v40 }
 0xd2f   :  { %4084 = vtanh.f32 %v4512_v42 }
 0xd33   :  { %v4083_v43 = vpop.eup %4082 }
 0xd34   :  { %861 = vrot.lane.b32.xlu1 %v4083_v43, %s4229_s22 }
 0xd39   :  { %v4085_v44 = vpop.eup %4084 }
 0xd3a   :  { %921 = vrot.lane.b32.xlu0 %v4085_v44, %s4229_s22 }
 0xda6   :  { %v862_v12 = vpop.permute.xlu1 %861 }
 0xda7   :  { %v864_v45 = vmul.f32 %v862_v12, %v847_v23 }
 0xda9   :  { %v925_v46 = vpack.c.bf16 %v864_v45, %v864_v45 }
 0xdab   :  { %974 = vrot.lane.b32.xlu1 %v925_v46, %s4238_s0 }
 0xdac   :  { %v922_v47 = vpop.permute.xlu0 %921 }
 0xdad   :  { %v924_v49 = vmul.f32 %v922_v47, %v907_v28 }
 0xdaf   :  { %v926_v50 = vpack.c.bf16 %v924_v49, %v924_v49 }
 0xdb1   :  { %928 = vrot.lane.b32.xlu0 %v926_v50, %s4238_s0  ;;  %v1218_v50 = vrot.slane %v4315_v15, 4 }
 0xe1d   :  { %v975_v51 = vpop.permute.xlu1 %974 }
 0xe1e   :  { %3673 = vmatmul.mubr.msk.bf16.vlgmr.msra.gmra.mrb[28].mxu1 %vm137_vm6, %v975_v51 }
 0xe1f   :  { %3685 = vmatpush3.bf16.msra.mxu1 %v4329_v34  ;;  %3688 = vmatprep.mubr.msk.bf16.mxu1 %vm4235_vm0, %v4234_v0 }
 0xe20   :  { %3686 = vmatprep.subr.bf16.mxu1 %v4234_v0 }
 0xe23   :  { %v929_v52 = vpop.permute.xlu0 %928  ;;  %3687 = vmatpush3.bf16.msra.mxu1 %v4335_v36 }
 0xe24   :  { %3665 = vmatmul.mubr.msk.bf16.vlgmr.msra.gmra.mrb[28].mxu0 %vm137_vm6, %v929_v52  ;;  %3700 = vmatprep.subr.bf16.mxu1 %v4234_v0 }
 0xe25   :  { %3677 = vmatpush3.bf16.msra.mxu0 %v4293_v3  ;;  %3680 = vmatprep.mubr.msk.bf16.mxu0 %vm4235_vm0, %v4234_v0 }
 0xe26   :  { %3678 = vmatprep.subr.bf16.mxu0 %v4234_v0 }
 0xe29   :  { %3679 = vmatpush3.bf16.msra.mxu0 %v4302_v7 }
 0xe2a   :  { %3692 = vmatprep.subr.bf16.mxu0 %v4234_v0 }
 0xe2c   :  { %3681 = vmatmul.mubr.msk.bf16.vlgmr.msra.gmra.mrb[32].mxu0 %vm137_vm6, %v929_v52 }
 0xe2d   :  { %3693 = vmatpush3.bf16.msra.mxu0 %v4331_v35  ;;  %3696 = vmatprep.mubr.msk.bf16.mxu0 %vm4235_vm0, %v4234_v0 }
 0xe2e   :  { %3694 = vmatprep.subr.bf16.mxu0 %v4234_v0 }
 0xe31   :  { %3695 = vmatpush3.bf16.msra.mxu0 %v4337_v37 }
 0xe32   :  { %3708 = vmatprep.subr.bf16.mxu0 %v4234_v0 }
 0xef1   :  { %v1013_v53 = vpop.f32.mrb[28].mxu1 }
 0xef2   :  { %v3674_v54 = vpop.f32.mrb[29].mxu1 }
 0xef3   :  { %v1016_v55 = vpop.f32.mrb[30].mxu1 }
 0xef4   :  { %v3675_v56 = vpop.f32.mrb[31].mxu1 }
 0xef7   :  { %v967_v57 = vpop.f32.mrb[28].mxu0 }
 0xef8   :  { %v1014_v58 = vadd.f32 %v1013_v53, %v967_v57  ;;  %v3666_v59 = vpop.f32.mrb[29].mxu0 }
 0xef9   :  { %v970_v60 = vpop.f32.mrb[30].mxu0 }
 0xefa   :  { %v1019_v61 = vadd.f32 %v4367_v48, %v1014_v58  ;;  %v3667_v62 = vpop.f32.mrb[31].mxu0 }
 0xefc   :  { %4086 = vtanh.f32 %v1019_v61 }
 0xeff   :  { %v1077_v1 = vpop.f32.mrb[32].mxu0 }
 0xf00   :  { %v1078_v2 = vadd.f32 %v1077_v1, %v1041_v63  ;;  %v3682_v4 = vpop.f32.mrb[33].mxu0 }
 0xf01   :  { %v1080_v5 = vpop.f32.mrb[34].mxu0 }
 0xf02   :  { %4088 = vtanh.f32 %v1078_v2  ;;  %v3683_v6 = vpop.f32.mrb[35].mxu0 }
 0xf06   :  { %v4087_v8 = vpop.eup %4086 }
 0xf07   :  { %v1021_v9 = vmul.f32 %v4087_v8, %v4318_v24 }
 0xf09   :  { %v1022_v10 = vadd.f32 %v1021_v9, %v4320_v26 }
 0xf0b   :  { %1025 = vrot.lane.b32.xlu1 %v1022_v10, %s4229_s22  ;;  %v1023_v20 = vmul.f32 %v1022_v10, %v4508_v39 }
 0xf0c   :  { %v4089_v11 = vpop.eup %4088 }
 0xf0d   :  { %v1084_v13 = vmul.f32 %v4089_v11, %v4318_v24 }
 0xf0f   :  { %v1085_v14 = vadd.f32 %v1084_v13, %v4320_v26 }
 0xf11   :  { %1088 = vrot.lane.b32.xlu0 %v1085_v14, %s4229_s22  ;;  %v1086_v23 = vmul.f32 %v1085_v14, %v4512_v42 }
 0xf7d   :  { %v1026_v16 = vpop.permute.xlu1 %1025 }
 0xf7e   :  { %v1028_v17 = vmul.f32 %v1026_v16, %v1022_v10 }
 0xf80   :  { %1030 = vrot.lane.b32.xlu1 %v1028_v17, %s4238_s0 }
 0xf83   :  { %v1089_v18 = vpop.permute.xlu0 %1088 }
 0xf84   :  { %v1091_v19 = vmul.f32 %v1089_v18, %v1085_v14 }
 0xf86   :  { %1093 = vrot.lane.b32.xlu0 %v1091_v19, %s4238_s0 }
 0xff2   :  { %v1031_v21 = vpop.permute.xlu1 %1030 }
 0xff3   :  { %v4551_v22 = vadd.f32 %v1031_v21, %v1023_v20 }
 0xff5   :  { %4090 = vtanh.f32 %v4551_v22 }
 0xff8   :  { %v1094_v25 = vpop.permute.xlu0 %1093 }
 0xff9   :  { %v4555_v27 = vadd.f32 %v1094_v25, %v1086_v23  ;;  %v4178_v23 = vld [vmem:[#allocation2 + $0x8] sm:$0xff]  }
 0xffb   :  { %4092 = vtanh.f32 %v4555_v27 }
 0xfff   :  { %v4091_v28 = vpop.eup %4090 }
0x1000   :  { %1036 = vrot.lane.b32.xlu1 %v4091_v28, %s4229_s22 }
0x1005   :  { %v4093_v29 = vpop.eup %4092 }
0x1006   :  { %1099 = vrot.lane.b32.xlu0 %v4093_v29, %s4229_s22 }
0x1072   :  { %v1037_v30 = vpop.permute.xlu1 %1036 }
0x1073   :  { %v1039_v31 = vmul.f32 %v1037_v30, %v1022_v10 }
0x1075   :  { %v1103_v32 = vpack.c.bf16 %v1039_v31, %v1039_v31 }
0x1077   :  { %1152 = vrot.lane.b32.xlu1 %v1103_v32, %s4238_s0 }
0x1078   :  { %v1100_v33 = vpop.permute.xlu0 %1099 }
0x1079   :  { %v1102_v38 = vmul.f32 %v1100_v33, %v1085_v14 }
0x107b   :  { %v1104_v39 = vpack.c.bf16 %v1102_v38, %v1102_v38 }
0x107d   :  { %1106 = vrot.lane.b32.xlu0 %v1104_v39, %s4238_s0 }
0x10e9   :  { %v1153_v40 = vpop.permute.xlu1 %1152 }
0x10ea   :  { %3697 = vmatmul.mubr.msk.bf16.vlgmr.msra.gmra.mrb[36].mxu0 %vm137_vm6, %v1153_v40 }
0x10eb   :  { %3709 = vmatpush3.bf16.msra.mxu0 %v4329_v34  ;;  %3712 = vmatprep.mubr.msk.bf16.mxu0 %vm4235_vm0, %v4234_v0 }
0x10ec   :  { %3710 = vmatprep.subr.bf16.mxu0 %v4234_v0 }
0x10ef   :  { %v1107_v41 = vpop.permute.xlu0 %1106  ;;  %3711 = vmatpush3.bf16.msra.mxu0 %v4335_v36 }
0x10f0   :  { %3689 = vmatmul.mubr.msk.bf16.vlgmr.msra.gmra.mrb[32].mxu1 %vm137_vm6, %v1107_v41  ;;  %3724 = vmatprep.subr.bf16.mxu0 %v4234_v0 }
0x10f1   :  { %3701 = vmatpush3.bf16.msra.mxu1 %v4293_v3  ;;  %3704 = vmatprep.mubr.msk.bf16.mxu1 %vm4235_vm0, %v4234_v0 }
0x10f2   :  { %3702 = vmatprep.subr.bf16.mxu1 %v4234_v0 }
0x10f5   :  { %3703 = vmatpush3.bf16.msra.mxu1 %v4302_v7 }
0x10f6   :  { %3716 = vmatprep.subr.bf16.mxu1 %v4234_v0 }
0x10f8   :  { %3705 = vmatmul.mubr.msk.bf16.vlgmr.msra.gmra.mrb[36].mxu1 %vm137_vm6, %v1107_v41 }
0x10f9   :  { %3717 = vmatpush3.bf16.msra.mxu1 %v4331_v35  ;;  %3720 = vmatprep.mubr.msk.bf16.mxu1 %vm4235_vm0, %v4234_v0 }
0x10fa   :  { %3718 = vmatprep.subr.bf16.mxu1 %v4234_v0 }
0x10fd   :  { %3719 = vmatpush3.bf16.msra.mxu1 %v4337_v37 }
0x10fe   :  { %3732 = vmatprep.subr.bf16.mxu1 %v4234_v0 }
0x11bd   :  { %v1191_v3 = vpop.f32.mrb[36].mxu0 }
0x11be   :  { %v3698_v42 = vpop.f32.mrb[37].mxu0 }
0x11bf   :  { %v1194_v43 = vpop.f32.mrb[38].mxu0 }
0x11c0   :  { %v3699_v44 = vpop.f32.mrb[39].mxu0 }
0x11c3   :  { %v1145_v7 = vpop.f32.mrb[32].mxu1 }
0x11c4   :  { %v1192_v12 = vadd.f32 %v1191_v3, %v1145_v7  ;;  %v3690_v45 = vpop.f32.mrb[33].mxu1 }
0x11c5   :  { %v1148_v46 = vpop.f32.mrb[34].mxu1 }
0x11c6   :  { %v1197_v47 = vadd.f32 %v4367_v48, %v1192_v12  ;;  %v3691_v49 = vpop.f32.mrb[35].mxu1 }
0x11c8   :  { %4094 = vtanh.f32 %v1197_v47 }
0x11cb   :  { %v1254_v51 = vpop.f32.mrb[36].mxu1 }
0x11cc   :  { %v1255_v52 = vadd.f32 %v1254_v51, %v1218_v50  ;;  %v3706_v53 = vpop.f32.mrb[37].mxu1 }
0x11cd   :  { %v1257_v54 = vpop.f32.mrb[38].mxu1 }
0x11ce   :  { %4096 = vtanh.f32 %v1255_v52  ;;  %v3707_v55 = vpop.f32.mrb[39].mxu1 }
0x11d2   :  { %v4095_v56 = vpop.eup %4094 }
0x11d3   :  { %v1199_v57 = vmul.f32 %v4095_v56, %v4318_v24 }
0x11d5   :  { %v1200_v58 = vadd.f32 %v1199_v57, %v4320_v26 }
0x11d7   :  { %1203 = vrot.lane.b32.xlu1 %v1200_v58, %s4229_s22  ;;  %v1201_v4 = vmul.f32 %v1200_v58, %v4551_v22 }
0x11d8   :  { %v4097_v59 = vpop.eup %4096 }
0x11d9   :  { %v1261_v60 = vmul.f32 %v4097_v59, %v4318_v24 }
0x11db   :  { %v1262_v61 = vadd.f32 %v1261_v60, %v4320_v26 }
0x11dd   :  { %1265 = vrot.lane.b32.xlu0 %v1262_v61, %s4229_s22  ;;  %v1263_v8 = vmul.f32 %v1262_v61, %v4555_v27 }
0x1249   :  { %v1204_v62 = vpop.permute.xlu1 %1203 }
0x124a   :  { %v1206_v63 = vmul.f32 %v1204_v62, %v1200_v58 }
0x124c   :  { %1208 = vrot.lane.b32.xlu1 %v1206_v63, %s4238_s0 }
0x124f   :  { %v1266_v1 = vpop.permute.xlu0 %1265 }
0x1250   :  { %v1268_v2 = vmul.f32 %v1266_v1, %v1262_v61 }
0x1252   :  { %1270 = vrot.lane.b32.xlu0 %v1268_v2, %s4238_s0 }
0x12be   :  { %v1209_v5 = vpop.permute.xlu1 %1208 }
0x12bf   :  { %v4594_v6 = vadd.f32 %v1209_v5, %v1201_v4 }
0x12c1   :  { %4098 = vtanh.f32 %v4594_v6 }
0x12c4   :  { %v1271_v9 = vpop.permute.xlu0 %1270 }
0x12c5   :  { %v4598_v10 = vadd.f32 %v1271_v9, %v1263_v8 }
0x12c7   :  { %4100 = vtanh.f32 %v4598_v10 }
0x12cb   :  { %v4099_v11 = vpop.eup %4098 }
0x12cc   :  { %1214 = vrot.lane.b32.xlu1 %v4099_v11, %s4229_s22 }
0x12d1   :  { %v4101_v13 = vpop.eup %4100 }
0x12d2   :  { %1276 = vrot.lane.b32.xlu0 %v4101_v13, %s4229_s22 }
0x133e   :  { %v1215_v14 = vpop.permute.xlu1 %1214 }
0x133f   :  { %v1217_v16 = vmul.f32 %v1215_v14, %v1200_v58 }
0x1341   :  { %v1280_v17 = vpack.c.bf16 %v1217_v16, %v1217_v16 }
0x1343   :  { %1329 = vrot.lane.b32.xlu1 %v1280_v17, %s4238_s0 }
0x1344   :  { %v1277_v18 = vpop.permute.xlu0 %1276 }
0x1345   :  { %v1279_v19 = vmul.f32 %v1277_v18, %v1262_v61 }
0x1347   :  { %v1281_v20 = vpack.c.bf16 %v1279_v19, %v1279_v19 }
0x1349   :  { %1283 = vrot.lane.b32.xlu0 %v1281_v20, %s4238_s0 }
0x13b5   :  { %v1330_v21 = vpop.permute.xlu1 %1329 }
0x13b6   :  { %3721 = vmatmul.mubr.msk.bf16.vlgmr.msra.gmra.mrb[40].mxu1 %vm137_vm6, %v1330_v21 }
0x13b7   :  { %3733 = vmatpush3.bf16.msra.mxu1 %v4329_v34  ;;  %3736 = vmatprep.mubr.msk.bf16.mxu1 %vm4235_vm0, %v4234_v0  ;;  %v4179_v34 = vld [vmem:[#allocation2 + $0x10] sm:$0xff]  }
0x13b8   :  { %3734 = vmatprep.subr.bf16.mxu1 %v4234_v0 }
0x13bb   :  { %v1284_v22 = vpop.permute.xlu0 %1283  ;;  %3735 = vmatpush3.bf16.msra.mxu1 %v4335_v36 }
0x13bc   :  { %3713 = vmatmul.mubr.msk.bf16.vlgmr.msra.gmra.mrb[40].mxu0 %vm137_vm6, %v1284_v22  ;;  %3766 = vmatprep.subr.bf16.mxu1 %v4234_v0 }
0x13bd   :  { %3725 = vmatpush3.bf16.msra.mxu0 %v4178_v23  ;;  %3728 = vmatprep.mubr.msk.bf16.mxu0 %vm4235_vm0, %v4234_v0 }
0x13be   :  { %3726 = vmatprep.subr.bf16.mxu0 %v4234_v0 }
0x13c1   :  { %3727 = vmatpush3.bf16.msra.mxu0 %v4179_v34 }
0x13c2   :  { %3740 = vmatprep.subr.bf16.mxu0 %v4234_v0 }
0x13c4   :  { %3729 = vmatmul.mubr.msk.bf16.vlgmr.msra.gmra.mrb[44].mxu0 %vm137_vm6, %v1284_v22 }
0x13c5   :  { %3741 = vmatpush3.bf16.msra.mxu0 %v4331_v35  ;;  %3744 = vmatprep.mubr.msk.bf16.mxu0 %vm4235_vm0, %v4234_v0  ;;  %v1395_v35 = vrot.slane %v4315_v15, 6 }
0x13c6   :  { %3742 = vmatprep.subr.bf16.mxu0 %v4234_v0 }
0x13c9   :  { %3743 = vmatpush3.bf16.msra.mxu0 %v4337_v37 }
0x1489   :  { %v1368_v36 = vpop.f32.mrb[40].mxu1 }
0x148a   :  { %v3722_v25 = vpop.f32.mrb[41].mxu1 }
0x148b   :  { %v1371_v27 = vpop.f32.mrb[42].mxu1  ;;  %v1573_v25 = vld [vmem:[#allocation4 + $0x28] sm:$0xff] }
0x148c   :  { %v3723_v28 = vpop.f32.mrb[43].mxu1  ;;  %v4239_v27 = vmov 0.0|0.0  }
0x148d   :  { %3969 = vmatprep.subr.bf16.mxu0 %v4239_v27 }
0x148f   :  { %v1322_v29 = vpop.f32.mrb[40].mxu0 }
0x1490   :  { %v1369_v30 = vadd.f32 %v1368_v36, %v1322_v29  ;;  %v3714_v31 = vpop.f32.mrb[41].mxu0  ;;  %v1572_v36 = vld [vmem:[#allocation4 + $0x20] sm:$0xff]  ;;  %v1575_v29 = vld [vmem:[#allocation4 + $0x38] sm:$0xff] }
0x1491   :  { %v1325_v32 = vpop.f32.mrb[42].mxu0  ;;  %v3970_v28 = vpack.c.bf16 %v1573_v25, %v1572_v36 }
0x1492   :  { %v1374_v33 = vadd.f32 %v4367_v48, %v1369_v30  ;;  %v3715_v38 = vpop.f32.mrb[43].mxu0 }
0x1493   :  { %v1656_v38 = vld [vmem:[#allocation4 + $0x48] sm:$0xff] }
0x1494   :  { %4102 = vtanh.f32 %v1374_v33 }
0x1497   :  { %v1431_v39 = vpop.f32.mrb[44].mxu0 }
0x1498   :  { %v1432_v40 = vadd.f32 %v1431_v39, %v1395_v35  ;;  %v3730_v41 = vpop.f32.mrb[45].mxu0  ;;  %v1657_v35 = vld [vmem:[#allocation4 + $0x50] sm:$0xff] }
0x1499   :  { %v1434_v3 = vpop.f32.mrb[46].mxu0  ;;  %v3976_v39 = vpack.c.bf16 %v1657_v35, %v1656_v38  ;;  %v4656_v41 = vld [vmem:[#allocation2 + $0x38] sm:$0xff]  }
0x149a   :  { %4104 = vtanh.f32 %v1432_v40  ;;  %v3731_v37 = vpop.f32.mrb[47].mxu0  ;;  %v3351_v3 = vld [vmem:[#allocation4 + $0x40] ss:$0 sm:$0xff] }
0x149e   :  { %v4103_v42 = vpop.eup %4102 }
0x149f   :  { %v1376_v43 = vmul.f32 %v4103_v42, %v4318_v24  ;;  %v4660_v42 = vld [vmem:[#allocation2 + $0x58] sm:$0xff]  }
0x14a1   :  { %v1377_v44 = vadd.f32 %v1376_v43, %v4320_v26 }
0x14a3   :  { %1380 = vrot.lane.b32.xlu0 %v1377_v44, %s4229_s22  ;;  %v1378_v50 = vmul.f32 %v1377_v44, %v4594_v6 }
0x14a4   :  { %v4105_v7 = vpop.eup %4104 }
0x14a5   :  { %v1438_v12 = vmul.f32 %v4105_v7, %v4318_v24  ;;  %v4666_v7 = vld [vmem:[#allocation2 + $0x40] sm:$0xff]  }
0x14a7   :  { %v1439_v45 = vadd.f32 %v1438_v12, %v4320_v26  ;;  %v4668_v12 = vld [vmem:[#allocation2 + $0x60] sm:$0xff]  }
0x14a9   :  { %1442 = vrot.lane.b32.xlu1 %v1439_v45, %s4229_s22  ;;  %v1440_v53 = vmul.f32 %v1439_v45, %v4598_v10 }
0x1515   :  { %v1381_v15 = vpop.permute.xlu0 %1380 }
0x1516   :  { %v1383_v46 = vmul.f32 %v1381_v15, %v1377_v44 }
0x1518   :  { %1385 = vrot.lane.b32.xlu0 %v1383_v46, %s4238_s0 }
0x151b   :  { %v1443_v47 = vpop.permute.xlu1 %1442 }
0x151c   :  { %v1445_v49 = vmul.f32 %v1443_v47, %v1439_v45 }
0x151e   :  { %1447 = vrot.lane.b32.xlu1 %v1445_v49, %s4238_s0 }
0x158a   :  { %v1386_v51 = vpop.permute.xlu0 %1385 }
0x158b   :  { %v1388_v52 = vadd.f32 %v1386_v51, %v1378_v50  ;;  %v4684_v50 = vld [vmem:[#allocation4 + $0x10] ss:$0 sm:$0xff] }
0x158d   :  { %4106 = vtanh.f32 %v1388_v52 }
0x1590   :  { %v1448_v54 = vpop.permute.xlu1 %1447 }
0x1591   :  { %v1450_v55 = vadd.f32 %v1448_v54, %v1440_v53 }
0x1593   :  { %4108 = vtanh.f32 %v1450_v55 }
0x1597   :  { %v4107_v56 = vpop.eup %4106 }
0x1598   :  { %1391 = vrot.lane.b32.xlu0 %v4107_v56, %s4229_s22 }
0x159d   :  { %v4109_v57 = vpop.eup %4108 }
0x159e   :  { %1453 = vrot.lane.b32.xlu1 %v4109_v57, %s4229_s22 }
0x160a   :  { %v1392_v58 = vpop.permute.xlu0 %1391 }
0x160b   :  { %v1394_v59 = vmul.f32 %v1392_v58, %v1377_v44 }
0x160d   :  { %v1457_v60 = vpack.c.bf16 %v1394_v59, %v1394_v59 }
0x160f   :  { %1506 = vrot.lane.b32.xlu1 %v1457_v60, %s4238_s0 }
0x1610   :  { %v1454_v61 = vpop.permute.xlu1 %1453 }
0x1611   :  { %v1456_v62 = vmul.f32 %v1454_v61, %v1439_v45  ;;  %v3353_v45 = vld [vmem:[#allocation4 + $0x58] ss:$0 sm:$0xff] }
0x1613   :  { %v1458_v63 = vpack.c.bf16 %v1456_v62, %v1456_v62 }
0x1615   :  { %1460 = vrot.lane.b32.xlu0 %v1458_v63, %s4238_s0 }
0x1681   :  { %v1507_v1 = vpop.permute.xlu1 %1506 }
0x1682   :  { %3745 = vmatmul.mubr.msk.bf16.vlgmr.msra.gmra.mrb[48].mxu0 %vm137_vm6, %v1507_v1  ;;  %v4691_v1 = vld [vmem:[#allocation2 + $0x48] sm:$0xff]  }
0x1683   :  { %3756 = vmatprep.mubr.msk.f32.mxu0 %vm4235_vm0, %v4234_v0  ;;  %3971 = vmatpush3.bf16.msra.mxu0 %v3970_v28 }
0x1684   :  { %3972 = vmatprep.subr.bf16.mxu0 %v4239_v27 }
0x1687   :  { %v1461_v2 = vpop.permute.xlu0 %1460 }
0x1688   :  { %3737 = vmatmul.mubr.msk.bf16.vlgmr.msra.gmra.mrb[44].mxu1 %vm137_vm6, %v1461_v2  ;;  %v4694_v2 = vld [vmem:[#allocation2 + $0x50] sm:$0xff]  }
0x1689   :  { %3770 = vmatprep.mubr.msk.bf16.mxu1 %vm4235_vm0, %v4234_v0  ;;  %3767 = vmatpush3.bf16.msra.mxu1 %v4656_v41 }
0x168a   :  { %3768 = vmatprep.subr.bf16.mxu1 %v4234_v0 }
0x168d   :  { %3769 = vmatpush3.bf16.msra.mxu1 %v4666_v7 }
0x168e   :  { %3790 = vmatprep.subr.bf16.mxu1 %v4234_v0 }
0x1755   :  { %v1545_v4 = vpop.f32.mrb[48].mxu0 }
0x1756   :  { %v3746_v5 = vpop.f32.mrb[49].mxu0 }
0x1757   :  { %v1548_v6 = vpop.f32.mrb[50].mxu0 }
0x1758   :  { %v3747_v8 = vpop.f32.mrb[51].mxu0 }
0x175b   :  { %v1499_v9 = vpop.f32.mrb[44].mxu1 }
0x175c   :  { %v1546_v10 = vadd.f32 %v1545_v4, %v1499_v9  ;;  %v3738_v11 = vpop.f32.mrb[45].mxu1 }
0x175d   :  { %v1502_v13 = vpop.f32.mrb[46].mxu1 }
0x175e   :  { %v1551_v14 = vadd.f32 %v4367_v48, %v1546_v10  ;;  %v3739_v16 = vpop.f32.mrb[47].mxu1  ;;  %v1574_v48 = vld [vmem:[#allocation4 + $0x30] sm:$0xff]  ;;  %v4715_v10 = vld [vmem:[#allocation4 + $0x18] ss:$0 sm:$0xff] }
0x175f   :  { %v3973_v30 = vpack.c.bf16 %v1575_v29, %v1574_v48 }
0x1760   :  { %4110 = vtanh.f32 %v1551_v14 }
0x1761   :  { %3974 = vmatpush3.bf16.msra.mxu0 %v3973_v30 }
0x1762   :  { %3975 = vmatprep.subr.bf16.mxu0 %v4239_v27 }
0x176a   :  { %v4111_v17 = vpop.eup %4110 }
0x176b   :  { %v1553_v18 = vmul.f32 %v4111_v17, %v4318_v24 }
0x176d   :  { %v1554_v19 = vadd.f32 %v1553_v18, %v4320_v26 }
0x176f   :  { %1557 = vrot.lane.b32.xlu0 %v1554_v19, %s4229_s22  ;;  %v1555_v22 = vmul.f32 %v1554_v19, %v1388_v52 }
0x17e1   :  { %v1558_v20 = vpop.permute.xlu0 %1557 }
0x17e2   :  { %v1560_v21 = vmul.f32 %v1558_v20, %v1554_v19 }
0x17e4   :  { %1562 = vrot.lane.b32.xlu1 %v1560_v21, %s4238_s0 }
0x1856   :  { %v1563_v23 = vpop.permute.xlu1 %1562 }
0x1857   :  { %v1565_v34 = vadd.f32 %v1563_v23, %v1555_v22 }
0x1859   :  { %4112 = vtanh.f32 %v1565_v34 }
0x1863   :  { %v4113_v31 = vpop.eup %4112 }
0x1864   :  { %1568 = vrot.lane.b32.xlu0 %v4113_v31, %s4229_s22 }
0x18d6   :  { %v1569_v32 = vpop.permute.xlu0 %1568 }
0x18d7   :  { %v1571_v33 = vmul.f32 %v1569_v32, %v1554_v19 }
0x18d9   :  { %1582 = vrot.lane.b32.xlu1 %v1571_v33, %s4238_s0 }
0x194b   :  { %v1583_v40 = vpop.permute.xlu1 %1582 }
0x194c   :  { %3757 = vmatmul.mubr.msk.f32.vlgmr.msra.gmra.mrb[52].mxu0 %vm137_vm6, %v1583_v40 }
0x194d   :  { %3977 = vmatpush3.bf16.msra.mxu0 %v3976_v39  ;;  %3763 = vmatprep.mubr.msk.f32.mxu0 %vm4235_vm0, %v4234_v0 }
0x194e   :  { %3774 = vmatprep.subr.bf16.mxu0 %v4234_v0 }
0x1a1f   :  { %v1652_v37 = vpop.f32.mrb[52].mxu0 }
0x1a20   :  { %v1653_v43 = vadd.f32 %v3351_v3, %v1652_v37  ;;  %v3758_v44 = vpop.f32.mrb[53].mxu0 }
0x1a22   :  { %3764 = vmatmul.mubr.msk.f32.vlgmr.msra.gmra.mrb[54].mxu0 %vm1663_vm7, %v1653_v43 }
0x1a23   :  { %3775 = vmatpush3.bf16.msra.mxu0 %v4660_v42  ;;  %3778 = vmatprep.mubr.msk.bf16.mxu0 %vm4235_vm0, %v4234_v0 }
0x1a24   :  { %3776 = vmatprep.subr.bf16.mxu0 %v4234_v0 }
0x1a27   :  { %3777 = vmatpush3.bf16.msra.mxu0 %v4668_v12 }
0x1a28   :  { %3782 = vmatprep.subr.bf16.mxu0 %v4234_v0 }
0x1af5   :  { %v1733_v15 = vpop.f32.mrb[54].mxu0 }
0x1af6   :  { %v1734_v46 = vadd.f32 %v3353_v45, %v1733_v15  ;;  %v3765_v47 = vpop.f32.mrb[55].mxu0 }
0x1af8   :  { %v1759_v49 = vpack.c.bf16 %v1734_v46, %v1734_v46 }
0x1afa   :  { %3771 = vmatmul.mubr.msk.bf16.vlgmr.msra.gmra.mrb[48].mxu1 %vm137_vm6, %v1759_v49  ;;  %3779 = vmatmul.mubr.msk.bf16.vlgmr.msra.gmra.mrb[56].mxu0 %vm137_vm6, %v1759_v49 }
0x1afb   :  { %3791 = vmatpush3.bf16.msra.mxu1 %v4656_v41  ;;  %3786 = vmatprep.mubr.msk.bf16.mxu0 %vm4235_vm0, %v4234_v0 }
0x1afc   :  { %3792 = vmatprep.subr.bf16.mxu1 %v4234_v0  ;;  %3794 = vmatprep.mubr.msk.bf16.mxu1 %vm4235_vm0, %v4234_v0 }
0x1afd   :  { %3783 = vmatpush3.bf16.msra.mxu0 %v4691_v1 }
0x1afe   :  { %3784 = vmatprep.subr.bf16.mxu0 %v4234_v0 }
0x1aff   :  { %3793 = vmatpush3.bf16.msra.mxu1 %v4666_v7 }
0x1b00   :  { %3798 = vmatprep.subr.bf16.mxu1 %v4234_v0 }
0x1b01   :  { %3785 = vmatpush3.bf16.msra.mxu0 %v4694_v2 }
0x1b02   :  { %3814 = vmatprep.subr.bf16.mxu0 %v4234_v0 }
0x1bcd   :  { %v1809_v51 = vpop.f32.mrb[48].mxu1 }
0x1bce   :  { %v1810_v52 = vadd.f32 %v4684_v50, %v1809_v51  ;;  %v3772_v53 = vpop.f32.mrb[49].mxu1 }
0x1bcf   :  { %v1812_v54 = vpop.f32.mrb[50].mxu1 }
0x1bd0   :  { %4114 = vtanh.f32 %v1810_v52  ;;  %v3773_v55 = vpop.f32.mrb[51].mxu1 }
0x1bda   :  { %v4115_v56 = vpop.eup %4114 }
0x1bdb   :  { %v1816_v57 = vmul.f32 %v4115_v56, %v4318_v24 }
0x1bdd   :  { %v1817_v58 = vadd.f32 %v1816_v57, %v4320_v26 }
0x1bdf   :  { %1820 = vrot.lane.b32.xlu0 %v1817_v58, %s4229_s22  ;;  %v1818_v61 = vmul.f32 0.0, %v1817_v58 }
0x1c51   :  { %v1821_v59 = vpop.permute.xlu0 %1820 }
0x1c52   :  { %v1823_v60 = vmul.f32 %v1821_v59, %v1817_v58 }
0x1c54   :  { %1825 = vrot.lane.b32.xlu1 %v1823_v60, %s4238_s0 }
0x1cc6   :  { %v1826_v62 = vpop.permute.xlu1 %1825 }
0x1cc7   :  { %v1828_v63 = vadd.f32 %v1826_v62, %v1818_v61 }
0x1cc9   :  { %4116 = vtanh.f32 %v1828_v63 }
0x1cd3   :  { %v4117_v4 = vpop.eup %4116 }
0x1cd4   :  { %1831 = vrot.lane.b32.xlu0 %v4117_v4, %s4229_s22 }
0x1d46   :  { %v1832_v5 = vpop.permute.xlu0 %1831 }
0x1d47   :  { %v1834_v6 = vmul.f32 %v1832_v5, %v1817_v58 }
0x1d49   :  { %v1887_v8 = vpack.c.bf16 %v1834_v6, %v1834_v6 }
0x1d4b   :  { %1889 = vrot.lane.b32.xlu1 %v1887_v8, %s4238_s0 }
0x1dbd   :  { %v1890_v9 = vpop.permute.xlu1 %1889 }
0x1dbe   :  { %3787 = vmatmul.mubr.msk.bf16.vlgmr.msra.gmra.mrb[56].mxu0 %vm137_vm6, %v1890_v9  ;;  %3795 = vmatmul.mubr.msk.bf16.vlgmr.msra.gmra.mrb[52].mxu1 %vm137_vm6, %v1890_v9 }
0x1dbf   :  { %3799 = vmatpush3.bf16.msra.mxu1 %v4660_v42  ;;  %3815 = vmatpush3.bf16.msra.mxu0 %v4656_v41 }
0x1dc0   :  { %3800 = vmatprep.subr.bf16.mxu1 %v4234_v0  ;;  %3816 = vmatprep.subr.bf16.mxu0 %v4234_v0 }
0x1dc1   :  { %3802 = vmatprep.mubr.msk.bf16.mxu1 %vm4235_vm0, %v4234_v0  ;;  %3818 = vmatprep.mubr.msk.bf16.mxu0 %vm4235_vm0, %v4234_v0 }
0x1dc3   :  { %3801 = vmatpush3.bf16.msra.mxu1 %v4668_v12  ;;  %3817 = vmatpush3.bf16.msra.mxu0 %v4666_v7 }
0x1dc4   :  { %3806 = vmatprep.subr.bf16.mxu1 %v4234_v0  ;;  %3822 = vmatprep.subr.bf16.mxu0 %v4234_v0 }
0x1e91   :  { %v1940_v11 = vpop.f32.mrb[56].mxu0  ;;  %v2001_v13 = vpop.f32.mrb[52].mxu1 }
0x1e92   :  { %v3986_v14 = vadd.f32 %v4715_v10, %v1940_v11  ;;  %v2002_v16 = vadd.f32 %v4684_v50, %v2001_v13  ;;  %v3788_v17 = vpop.f32.mrb[57].mxu0  ;;  %v3796_v18 = vpop.f32.mrb[53].mxu1 }
0x1e93   :  { %v1943_v19 = vpop.f32.mrb[58].mxu0  ;;  %v2004_v20 = vpop.f32.mrb[54].mxu1 }
0x1e94   :  { %4118 = vtanh.f32 %v3986_v14  ;;  %v3789_v21 = vpop.f32.mrb[59].mxu0  ;;  %v3797_v22 = vpop.f32.mrb[55].mxu1 }
0x1e95   :  { %4120 = vtanh.f32 %v2002_v16 }
0x1e9e   :  { %v4119_v23 = vpop.eup %4118 }
0x1e9f   :  { %v4121_v34 = vpop.eup %4120  ;;  %v1948_v36 = vmul.f32 %v4119_v23, %v4318_v24 }
0x1ea0   :  { %v2008_v25 = vmul.f32 %v4121_v34, %v4318_v24 }
0x1ea1   :  { %v1949_v48 = vadd.f32 %v1948_v36, %v4320_v26 }
0x1ea2   :  { %v2009_v27 = vadd.f32 %v2008_v25, %v4320_v26 }
0x1ea3   :  { %1952 = vrot.lane.b32.xlu0 %v1949_v48, %s4229_s22  ;;  %v1950_v32 = vmul.f32 0.0, %v1949_v48 }
0x1ea4   :  { %2012 = vrot.lane.b32.xlu1 %v2009_v27, %s4229_s22  ;;  %v2010_v33 = vmul.f32 %v2009_v27, %v1828_v63 }
0x1f15   :  { %v1953_v28 = vpop.permute.xlu0 %1952 }
0x1f16   :  { %v2013_v29 = vpop.permute.xlu1 %2012  ;;  %v1955_v30 = vmul.f32 %v1953_v28, %v1949_v48 }
0x1f17   :  { %v2015_v31 = vmul.f32 %v2013_v29, %v2009_v27 }
0x1f18   :  { %1957 = vrot.lane.b32.xlu0 %v1955_v30, %s4238_s0 }
0x1f19   :  { %2017 = vrot.lane.b32.xlu1 %v2015_v31, %s4238_s0 }
0x1f8a   :  { %v1958_v38 = vpop.permute.xlu0 %1957 }
0x1f8b   :  { %v2018_v35 = vpop.permute.xlu1 %2017  ;;  %v4727_v39 = vadd.f32 %v1958_v38, %v1950_v32 }
0x1f8c   :  { %v2020_v40 = vadd.f32 %v2018_v35, %v2010_v33 }
0x1f8d   :  { %4122 = vtanh.f32 %v4727_v39 }
0x1f8e   :  { %4124 = vtanh.f32 %v2020_v40 }
0x1f97   :  { %v4123_v3 = vpop.eup %4122 }
0x1f98   :  { %v4125_v37 = vpop.eup %4124  ;;  %1963 = vrot.lane.b32.xlu0 %v4123_v3, %s4229_s22 }
0x1f99   :  { %2023 = vrot.lane.b32.xlu1 %v4125_v37, %s4229_s22 }
0x200a   :  { %v1964_v43 = vpop.permute.xlu0 %1963 }
0x200b   :  { %v2024_v44 = vpop.permute.xlu1 %2023  ;;  %v4732_v45 = vmul.f32 %v1964_v43, %v1949_v48 }
0x200c   :  { %v2026_v15 = vmul.f32 %v2024_v44, %v2009_v27 }
0x200d   :  { %v2027_v46 = vpack.c.bf16 %v4732_v45, %v4732_v45 }
0x200e   :  { %v2074_v47 = vpack.c.bf16 %v2026_v15, %v2026_v15 }
0x200f   :  { %2029 = vrot.lane.b32.xlu0 %v2027_v46, %s4238_s0 }
0x2010   :  { %2076 = vrot.lane.b32.xlu1 %v2074_v47, %s4238_s0 }
0x2081   :  { %v2030_v49 = vpop.permute.xlu0 %2029 }
0x2082   :  { %v2077_v51 = vpop.permute.xlu1 %2076  ;;  %3803 = vmatmul.mubr.msk.bf16.vlgmr.msra.gmra.mrb[56].mxu1 %vm137_vm6, %v2030_v49 }
0x2083   :  { %3807 = vmatpush3.bf16.msra.mxu1 %v4691_v1  ;;  %3819 = vmatmul.mubr.msk.bf16.vlgmr.msra.gmra.mrb[60].mxu0 %vm137_vm6, %v2077_v51 }
0x2084   :  { %3808 = vmatprep.subr.bf16.mxu1 %v4234_v0  ;;  %3810 = vmatprep.mubr.msk.bf16.mxu1 %vm4235_vm0, %v4234_v0 }
0x2085   :  { %3823 = vmatpush3.bf16.msra.mxu0 %v4660_v42  ;;  %3826 = vmatprep.mubr.msk.bf16.mxu0 %vm4235_vm0, %v4234_v0 }
0x2086   :  { %3824 = vmatprep.subr.bf16.mxu0 %v4234_v0 }
0x2087   :  { %3809 = vmatpush3.bf16.msra.mxu1 %v4694_v2 }
0x2088   :  { %3838 = vmatprep.subr.bf16.mxu1 %v4234_v0 }
0x2089   :  { %3825 = vmatpush3.bf16.msra.mxu0 %v4668_v12 }
0x208a   :  { %3830 = vmatprep.subr.bf16.mxu0 %v4234_v0 }
0x208e   :  { %3811 = vmatmul.mubr.msk.bf16.vlgmr.msra.gmra.mrb[56].mxu1 %vm137_vm6, %v2077_v51 }
0x208f   :  { %3839 = vmatpush3.bf16.msra.mxu1 %v4656_v41  ;;  %3842 = vmatprep.mubr.msk.bf16.mxu1 %vm4235_vm0, %v4234_v0 }
0x2090   :  { %3840 = vmatprep.subr.bf16.mxu1 %v4234_v0 }
0x2093   :  { %3841 = vmatpush3.bf16.msra.mxu1 %v4666_v7 }
0x2094   :  { %3846 = vmatprep.subr.bf16.mxu1 %v4234_v0 }
0x2156   :  { %v2176_v52 = vpop.f32.mrb[60].mxu0 }
0x2157   :  { %v2177_v53 = vadd.f32 %v4684_v50, %v2176_v52  ;;  %v3820_v54 = vpop.f32.mrb[61].mxu0 }
0x2158   :  { %v2179_v55 = vpop.f32.mrb[62].mxu0 }
0x2159   :  { %4126 = vtanh.f32 %v2177_v53  ;;  %v3821_v56 = vpop.f32.mrb[63].mxu0 }
0x2161   :  { %v2115_v57 = vpop.f32.mrb[56].mxu1 }
0x2162   :  { %v3987_v58 = vadd.f32 %v4715_v10, %v2115_v57  ;;  %v3812_v59 = vpop.f32.mrb[57].mxu1 }
0x2163   :  { %v4127_v60 = vpop.eup %4126  ;;  %v2118_v61 = vpop.f32.mrb[58].mxu1 }
0x2164   :  { %4128 = vtanh.f32 %v3987_v58  ;;  %v3813_v62 = vpop.f32.mrb[59].mxu1  ;;  %v2183_v63 = vmul.f32 %v4127_v60, %v4318_v24 }
0x2166   :  { %v2184_v4 = vadd.f32 %v2183_v63, %v4320_v26 }
0x2168   :  { %2187 = vrot.lane.b32.xlu1 %v2184_v4, %s4229_s22  ;;  %v2185_v16 = vmul.f32 %v2184_v4, %v2020_v40 }
0x216e   :  { %v4129_v5 = vpop.eup %4128 }
0x216f   :  { %v2123_v6 = vmul.f32 %v4129_v5, %v4318_v24 }
0x2171   :  { %v2124_v8 = vadd.f32 %v2123_v6, %v4320_v26 }
0x2173   :  { %2127 = vrot.lane.b32.xlu0 %v2124_v8, %s4229_s22  ;;  %v2125_v19 = vmul.f32 %v2124_v8, %v4727_v39 }
0x21da   :  { %v2188_v9 = vpop.permute.xlu1 %2187 }
0x21db   :  { %v2190_v11 = vmul.f32 %v2188_v9, %v2184_v4 }
0x21dd   :  { %2192 = vrot.lane.b32.xlu1 %v2190_v11, %s4238_s0 }
0x21e5   :  { %v2128_v13 = vpop.permute.xlu0 %2127 }
0x21e6   :  { %v2130_v14 = vmul.f32 %v2128_v13, %v2124_v8 }
0x21e8   :  { %2132 = vrot.lane.b32.xlu0 %v2130_v14, %s4238_s0 }
0x224f   :  { %v2193_v17 = vpop.permute.xlu1 %2192 }
0x2250   :  { %v4769_v18 = vadd.f32 %v2193_v17, %v2185_v16 }
0x2252   :  { %4130 = vtanh.f32 %v4769_v18 }
0x225a   :  { %v2133_v20 = vpop.permute.xlu0 %2132 }
0x225b   :  { %v4773_v21 = vadd.f32 %v2133_v20, %v2125_v19 }
0x225c   :  { %v4131_v22 = vpop.eup %4130 }
0x225d   :  { %4132 = vtanh.f32 %v4773_v21  ;;  %2198 = vrot.lane.b32.xlu1 %v4131_v22, %s4229_s22 }
0x2267   :  { %v4133_v23 = vpop.eup %4132 }
0x2268   :  { %2138 = vrot.lane.b32.xlu0 %v4133_v23, %s4229_s22 }
0x22cf   :  { %v2199_v34 = vpop.permute.xlu1 %2198 }
0x22d0   :  { %v2201_v36 = vmul.f32 %v2199_v34, %v2184_v4 }
0x22d2   :  { %v2249_v25 = vpack.c.bf16 %v2201_v36, %v2201_v36 }
0x22d4   :  { %2251 = vrot.lane.b32.xlu1 %v2249_v25, %s4238_s0 }
0x22da   :  { %v2139_v48 = vpop.permute.xlu0 %2138 }
0x22db   :  { %v4779_v27 = vmul.f32 %v2139_v48, %v2124_v8 }
0x22dd   :  { %v2202_v28 = vpack.c.bf16 %v4779_v27, %v4779_v27  ;;  %v3193_v8 = vrot.slane %v4779_v27, 6 }
0x22df   :  { %2204 = vrot.lane.b32.xlu0 %v2202_v28, %s4238_s0  ;;  %v3210_v16 = vsel %vm63_vm1, %v4732_v45, %v3193_v8 }
0x2346   :  { %v2252_v29 = vpop.permute.xlu1 %2251 }
0x2347   :  { %3843 = vmatmul.mubr.msk.bf16.vlgmr.msra.gmra.mrb[60].mxu1 %vm137_vm6, %v2252_v29 }
0x2348   :  { %3847 = vmatpush3.bf16.msra.mxu1 %v4660_v42  ;;  %3850 = vmatprep.mubr.msk.bf16.mxu1 %vm4235_vm0, %v4234_v0 }
0x2349   :  { %3848 = vmatprep.subr.bf16.mxu1 %v4234_v0 }
0x234c   :  { %3849 = vmatpush3.bf16.msra.mxu1 %v4668_v12 }
0x234d   :  { %3854 = vmatprep.subr.bf16.mxu1 %v4234_v0 }
0x2351   :  { %v2205_v30 = vpop.permute.xlu0 %2204 }
0x2352   :  { %3827 = vmatmul.mubr.msk.bf16.vlgmr.msra.gmra.mrb[64].mxu0 %vm137_vm6, %v2205_v30 }
0x2353   :  { %3831 = vmatpush3.bf16.msra.mxu0 %v4691_v1  ;;  %3834 = vmatprep.mubr.msk.bf16.mxu0 %vm4235_vm0, %v4234_v0 }
0x2354   :  { %3832 = vmatprep.subr.bf16.mxu0 %v4234_v0 }
0x2357   :  { %3833 = vmatpush3.bf16.msra.mxu0 %v4694_v2 }
0x2358   :  { %3862 = vmatprep.subr.bf16.mxu0 %v4234_v0 }
0x235e   :  { %3835 = vmatmul.mubr.msk.bf16.vlgmr.msra.gmra.mrb[64].mxu0 %vm137_vm6, %v2252_v29 }
0x235f   :  { %3863 = vmatpush3.bf16.msra.mxu0 %v4656_v41  ;;  %3866 = vmatprep.mubr.msk.bf16.mxu0 %vm4235_vm0, %v4234_v0 }
0x2360   :  { %3864 = vmatprep.subr.bf16.mxu0 %v4234_v0 }
0x2363   :  { %3865 = vmatpush3.bf16.msra.mxu0 %v4666_v7 }
0x2364   :  { %3870 = vmatprep.subr.bf16.mxu0 %v4234_v0 }
0x241a   :  { %v2351_v31 = vpop.f32.mrb[60].mxu1 }
0x241b   :  { %v2352_v32 = vadd.f32 %v4684_v50, %v2351_v31  ;;  %v3844_v33 = vpop.f32.mrb[61].mxu1 }
0x241c   :  { %v2354_v38 = vpop.f32.mrb[62].mxu1 }
0x241d   :  { %4134 = vtanh.f32 %v2352_v32  ;;  %v3845_v35 = vpop.f32.mrb[63].mxu1 }
0x2427   :  { %v4135_v39 = vpop.eup %4134 }
0x2428   :  { %v2358_v40 = vmul.f32 %v4135_v39, %v4318_v24 }
0x242a   :  { %v2359_v3 = vadd.f32 %v2358_v40, %v4320_v26 }
0x242c   :  { %2362 = vrot.lane.b32.xlu1 %v2359_v3, %s4229_s22  ;;  %v2360_v56 = vmul.f32 %v2359_v3, %v4769_v18 }
0x2431   :  { %v2290_v37 = vpop.f32.mrb[64].mxu0 }
0x2432   :  { %v3988_v43 = vadd.f32 %v4715_v10, %v2290_v37  ;;  %v3836_v44 = vpop.f32.mrb[65].mxu0 }
0x2433   :  { %v2293_v15 = vpop.f32.mrb[66].mxu0 }
0x2434   :  { %4136 = vtanh.f32 %v3988_v43  ;;  %v3837_v46 = vpop.f32.mrb[67].mxu0 }
0x243e   :  { %v4137_v47 = vpop.eup %4136 }
0x243f   :  { %v2298_v49 = vmul.f32 %v4137_v47, %v4318_v24 }
0x2441   :  { %v2299_v51 = vadd.f32 %v2298_v49, %v4320_v26 }
0x2443   :  { %2302 = vrot.lane.b32.xlu0 %v2299_v51, %s4229_s22  ;;  %v2300_v60 = vmul.f32 %v2299_v51, %v4773_v21 }
0x249e   :  { %v2363_v52 = vpop.permute.xlu1 %2362 }
0x249f   :  { %v2365_v53 = vmul.f32 %v2363_v52, %v2359_v3 }
0x24a1   :  { %2367 = vrot.lane.b32.xlu1 %v2365_v53, %s4238_s0 }
0x24b5   :  { %v2303_v54 = vpop.permute.xlu0 %2302 }
0x24b6   :  { %v2305_v55 = vmul.f32 %v2303_v54, %v2299_v51 }
0x24b8   :  { %2307 = vrot.lane.b32.xlu0 %v2305_v55, %s4238_s0 }
0x2513   :  { %v2368_v57 = vpop.permute.xlu1 %2367 }
0x2514   :  { %v4816_v58 = vadd.f32 %v2368_v57, %v2360_v56 }
0x2516   :  { %4138 = vtanh.f32 %v4816_v58 }
0x2520   :  { %v4139_v59 = vpop.eup %4138 }
0x2521   :  { %2373 = vrot.lane.b32.xlu1 %v4139_v59, %s4229_s22 }
0x252a   :  { %v2308_v61 = vpop.permute.xlu0 %2307 }
0x252b   :  { %v4821_v62 = vadd.f32 %v2308_v61, %v2300_v60 }
0x252d   :  { %4140 = vtanh.f32 %v4821_v62 }
0x2537   :  { %v4141_v63 = vpop.eup %4140 }
0x2538   :  { %2313 = vrot.lane.b32.xlu0 %v4141_v63, %s4229_s22 }
0x2593   :  { %v2374_v4 = vpop.permute.xlu1 %2373 }
0x2594   :  { %v2376_v5 = vmul.f32 %v2374_v4, %v2359_v3 }
0x2596   :  { %v2424_v6 = vpack.c.bf16 %v2376_v5, %v2376_v5 }
0x2598   :  { %2426 = vrot.lane.b32.xlu1 %v2424_v6, %s4238_s0 }
0x25aa   :  { %v2314_v9 = vpop.permute.xlu0 %2313 }
0x25ab   :  { %v2316_v11 = vmul.f32 %v2314_v9, %v2299_v51 }
0x25ad   :  { %v2377_v13 = vpack.c.bf16 %v2316_v11, %v2316_v11  ;;  %v3196_v14 = vrot.slane %v2316_v11, 4 }
0x25af   :  { %2379 = vrot.lane.b32.xlu0 %v2377_v13, %s4238_s0  ;;  %v4831_v17 = vsel %vm3211_vm8, %v3210_v16, %v3196_v14 }
0x260a   :  { %v2427_v18 = vpop.permute.xlu1 %2426 }
0x260b   :  { %3867 = vmatmul.mubr.msk.bf16.vlgmr.msra.gmra.mrb[68].mxu0 %vm137_vm6, %v2427_v18 }
0x260c   :  { %3871 = vmatpush3.bf16.msra.mxu0 %v4660_v42  ;;  %3874 = vmatprep.mubr.msk.bf16.mxu0 %vm4235_vm0, %v4234_v0 }
0x260d   :  { %3872 = vmatprep.subr.bf16.mxu0 %v4234_v0 }
0x2610   :  { %3873 = vmatpush3.bf16.msra.mxu0 %v4668_v12 }
0x2611   :  { %3878 = vmatprep.subr.bf16.mxu0 %v4234_v0 }
0x2621   :  { %v2380_v45 = vpop.permute.xlu0 %2379 }
0x2622   :  { %3851 = vmatmul.mubr.msk.bf16.vlgmr.msra.gmra.mrb[64].mxu1 %vm137_vm6, %v2380_v45 }
0x2623   :  { %3855 = vmatpush3.bf16.msra.mxu1 %v4691_v1  ;;  %3858 = vmatprep.mubr.msk.bf16.mxu1 %vm4235_vm0, %v4234_v0 }
0x2624   :  { %3856 = vmatprep.subr.bf16.mxu1 %v4234_v0 }
0x2627   :  { %3857 = vmatpush3.bf16.msra.mxu1 %v4694_v2 }
0x2628   :  { %3886 = vmatprep.subr.bf16.mxu1 %v4234_v0 }
0x262e   :  { %3859 = vmatmul.mubr.msk.bf16.vlgmr.msra.gmra.mrb[64].mxu1 %vm137_vm6, %v2427_v18 }
0x262f   :  { %3887 = vmatpush3.bf16.msra.mxu1 %v4656_v41  ;;  %3890 = vmatprep.mubr.msk.bf16.mxu1 %vm4235_vm0, %v4234_v0 }
0x2630   :  { %3888 = vmatprep.subr.bf16.mxu1 %v4234_v0 }
0x2633   :  { %3889 = vmatpush3.bf16.msra.mxu1 %v4666_v7 }
0x2634   :  { %3894 = vmatprep.subr.bf16.mxu1 %v4234_v0 }
0x26de   :  { %v2526_v19 = vpop.f32.mrb[68].mxu0 }
0x26df   :  { %v2527_v20 = vadd.f32 %v4684_v50, %v2526_v19  ;;  %v3868_v21 = vpop.f32.mrb[69].mxu0 }
0x26e0   :  { %v2529_v22 = vpop.f32.mrb[70].mxu0 }
0x26e1   :  { %4142 = vtanh.f32 %v2527_v20  ;;  %v3869_v23 = vpop.f32.mrb[71].mxu0 }
0x26eb   :  { %v4143_v34 = vpop.eup %4142 }
0x26ec   :  { %v2533_v36 = vmul.f32 %v4143_v34, %v4318_v24 }
0x26ee   :  { %v2534_v25 = vadd.f32 %v2533_v36, %v4320_v26 }
0x26f0   :  { %2537 = vrot.lane.b32.xlu1 %v2534_v25, %s4229_s22  ;;  %v2535_v3 = vmul.f32 %v2534_v25, %v4816_v58 }
0x2701   :  { %v2465_v48 = vpop.f32.mrb[64].mxu1 }
0x2702   :  { %v3989_v27 = vadd.f32 %v4715_v10, %v2465_v48  ;;  %v3860_v28 = vpop.f32.mrb[65].mxu1 }
0x2703   :  { %v2468_v29 = vpop.f32.mrb[66].mxu1 }
0x2704   :  { %4144 = vtanh.f32 %v3989_v27  ;;  %v3861_v30 = vpop.f32.mrb[67].mxu1 }
0x270e   :  { %v4145_v31 = vpop.eup %4144 }
0x270f   :  { %v2473_v32 = vmul.f32 %v4145_v31, %v4318_v24 }
0x2711   :  { %v2474_v33 = vadd.f32 %v2473_v32, %v4320_v26 }
0x2713   :  { %2477 = vrot.lane.b32.xlu0 %v2474_v33, %s4229_s22  ;;  %v2475_v15 = vmul.f32 %v2474_v33, %v4821_v62 }
0x2762   :  { %v2538_v38 = vpop.permute.xlu1 %2537 }
0x2763   :  { %v2540_v35 = vmul.f32 %v2538_v38, %v2534_v25 }
0x2765   :  { %2542 = vrot.lane.b32.xlu1 %v2540_v35, %s4238_s0 }
0x2785   :  { %v2478_v39 = vpop.permute.xlu0 %2477 }
0x2786   :  { %v2480_v40 = vmul.f32 %v2478_v39, %v2474_v33 }
0x2788   :  { %2482 = vrot.lane.b32.xlu0 %v2480_v40, %s4238_s0 }
0x27d7   :  { %v2543_v37 = vpop.permute.xlu1 %2542 }
0x27d8   :  { %v4865_v43 = vadd.f32 %v2543_v37, %v2535_v3 }
0x27da   :  { %4146 = vtanh.f32 %v4865_v43 }
0x27e4   :  { %v4147_v44 = vpop.eup %4146 }
0x27e5   :  { %2548 = vrot.lane.b32.xlu1 %v4147_v44, %s4229_s22 }
0x27fa   :  { %v2483_v46 = vpop.permute.xlu0 %2482 }
0x27fb   :  { %v4870_v47 = vadd.f32 %v2483_v46, %v2475_v15 }
0x27fd   :  { %4148 = vtanh.f32 %v4870_v47 }
0x2807   :  { %v4149_v49 = vpop.eup %4148 }
0x2808   :  { %2488 = vrot.lane.b32.xlu0 %v4149_v49, %s4229_s22 }
0x2857   :  { %v2549_v51 = vpop.permute.xlu1 %2548 }
0x2858   :  { %v2551_v52 = vmul.f32 %v2549_v51, %v2534_v25 }
0x285a   :  { %v2599_v53 = vpack.c.bf16 %v2551_v52, %v2551_v52 }
0x285c   :  { %2601 = vrot.lane.b32.xlu1 %v2599_v53, %s4238_s0 }
0x287a   :  { %v2489_v54 = vpop.permute.xlu0 %2488 }
0x287b   :  { %v2491_v55 = vmul.f32 %v2489_v54, %v2474_v33 }
0x287d   :  { %v2552_v56 = vpack.c.bf16 %v2491_v55, %v2491_v55  ;;  %v3199_v57 = vrot.slane %v2491_v55, 2 }
0x287f   :  { %2554 = vrot.lane.b32.xlu0 %v2552_v56, %s4238_s0  ;;  %v4878_v58 = vsel %vm3213_vm9, %v4831_v17, %v3199_v57 }
0x28ce   :  { %v2602_v59 = vpop.permute.xlu1 %2601 }
0x28cf   :  { %3891 = vmatmul.mubr.msk.bf16.vlgmr.msra.gmra.mrb[68].mxu1 %vm137_vm6, %v2602_v59 }
0x28d0   :  { %3895 = vmatpush3.bf16.msra.mxu1 %v4660_v42  ;;  %3898 = vmatprep.mubr.msk.bf16.mxu1 %vm4235_vm0, %v4234_v0 }
0x28d1   :  { %3896 = vmatprep.subr.bf16.mxu1 %v4234_v0 }
0x28d4   :  { %3897 = vmatpush3.bf16.msra.mxu1 %v4668_v12 }
0x28d5   :  { %3902 = vmatprep.subr.bf16.mxu1 %v4234_v0 }
0x28f1   :  { %v2555_v60 = vpop.permute.xlu0 %2554 }
0x28f2   :  { %3875 = vmatmul.mubr.msk.bf16.vlgmr.msra.gmra.mrb[72].mxu0 %vm137_vm6, %v2555_v60 }
0x28f3   :  { %3879 = vmatpush3.bf16.msra.mxu0 %v4691_v1  ;;  %3882 = vmatprep.mubr.msk.bf16.mxu0 %vm4235_vm0, %v4234_v0 }
0x28f4   :  { %3880 = vmatprep.subr.bf16.mxu0 %v4234_v0 }
0x28f7   :  { %3881 = vmatpush3.bf16.msra.mxu0 %v4694_v2 }
0x28f8   :  { %3910 = vmatprep.subr.bf16.mxu0 %v4234_v0 }
0x28fe   :  { %3883 = vmatmul.mubr.msk.bf16.vlgmr.msra.gmra.mrb[72].mxu0 %vm137_vm6, %v2602_v59 }
0x28ff   :  { %3911 = vmatpush3.bf16.msra.mxu0 %v4656_v41  ;;  %3914 = vmatprep.mubr.msk.bf16.mxu0 %vm4235_vm0, %v4234_v0 }
0x2900   :  { %3912 = vmatprep.subr.bf16.mxu0 %v4234_v0 }
0x2903   :  { %3913 = vmatpush3.bf16.msra.mxu0 %v4666_v7 }
0x2904   :  { %3918 = vmatprep.subr.bf16.mxu0 %v4234_v0 }
0x29a2   :  { %v2701_v61 = vpop.f32.mrb[68].mxu1 }
0x29a3   :  { %v2702_v62 = vadd.f32 %v4684_v50, %v2701_v61  ;;  %v3892_v63 = vpop.f32.mrb[69].mxu1 }
0x29a4   :  { %v2704_v4 = vpop.f32.mrb[70].mxu1 }
0x29a5   :  { %4150 = vtanh.f32 %v2702_v62  ;;  %v3893_v5 = vpop.f32.mrb[71].mxu1 }
0x29af   :  { %v4151_v6 = vpop.eup %4150 }
0x29b0   :  { %v2708_v8 = vmul.f32 %v4151_v6, %v4318_v24 }
0x29b2   :  { %v2709_v9 = vadd.f32 %v2708_v8, %v4320_v26 }
0x29b4   :  { %2712 = vrot.lane.b32.xlu1 %v2709_v9, %s4229_s22  ;;  %v2710_v34 = vmul.f32 %v2709_v9, %v4865_v43 }
0x29d1   :  { %v2640_v11 = vpop.f32.mrb[72].mxu0 }
0x29d2   :  { %v3990_v13 = vadd.f32 %v4715_v10, %v2640_v11  ;;  %v3884_v14 = vpop.f32.mrb[73].mxu0 }
0x29d3   :  { %v2643_v16 = vpop.f32.mrb[74].mxu0 }
0x29d4   :  { %4152 = vtanh.f32 %v3990_v13  ;;  %v3885_v17 = vpop.f32.mrb[75].mxu0 }
0x29de   :  { %v4153_v18 = vpop.eup %4152 }
0x29df   :  { %v2648_v45 = vmul.f32 %v4153_v18, %v4318_v24 }
0x29e1   :  { %v2649_v19 = vadd.f32 %v2648_v45, %v4320_v26 }
0x29e3   :  { %2652 = vrot.lane.b32.xlu0 %v2649_v19, %s4229_s22  ;;  %v2650_v27 = vmul.f32 %v2649_v19, %v4870_v47 }
0x2a26   :  { %v2713_v20 = vpop.permute.xlu1 %2712 }
0x2a27   :  { %v2715_v21 = vmul.f32 %v2713_v20, %v2709_v9 }
0x2a29   :  { %2717 = vrot.lane.b32.xlu1 %v2715_v21, %s4238_s0 }
0x2a55   :  { %v2653_v22 = vpop.permute.xlu0 %2652 }
0x2a56   :  { %v2655_v23 = vmul.f32 %v2653_v22, %v2649_v19 }
0x2a58   :  { %2657 = vrot.lane.b32.xlu0 %v2655_v23, %s4238_s0 }
0x2a9b   :  { %v2718_v36 = vpop.permute.xlu1 %2717 }
0x2a9c   :  { %v4912_v25 = vadd.f32 %v2718_v36, %v2710_v34 }
0x2a9e   :  { %4154 = vtanh.f32 %v4912_v25 }
0x2aa8   :  { %v4155_v48 = vpop.eup %4154 }
0x2aa9   :  { %2723 = vrot.lane.b32.xlu1 %v4155_v48, %s4229_s22 }
0x2aca   :  { %v2658_v28 = vpop.permute.xlu0 %2657 }
0x2acb   :  { %v4917_v29 = vadd.f32 %v2658_v28, %v2650_v27 }
0x2acd   :  { %4156 = vtanh.f32 %v4917_v29 }
0x2ad7   :  { %v4157_v30 = vpop.eup %4156 }
0x2ad8   :  { %2663 = vrot.lane.b32.xlu0 %v4157_v30, %s4229_s22 }
0x2b1b   :  { %v2724_v31 = vpop.permute.xlu1 %2723 }
0x2b1c   :  { %v2726_v32 = vmul.f32 %v2724_v31, %v2709_v9 }
0x2b1e   :  { %v2774_v33 = vpack.c.bf16 %v2726_v32, %v2726_v32 }
0x2b20   :  { %2776 = vrot.lane.b32.xlu1 %v2774_v33, %s4238_s0 }
0x2b4a   :  { %v2664_v38 = vpop.permute.xlu0 %2663 }
0x2b4b   :  { %v4922_v35 = vmul.f32 %v2664_v38, %v2649_v19 }
0x2b4d   :  { %v2727_v39 = vpack.c.bf16 %v4922_v35, %v4922_v35 }
0x2b4f   :  { %2729 = vrot.lane.b32.xlu0 %v2727_v39, %s4238_s0 }
0x2b92   :  { %v2777_v40 = vpop.permute.xlu1 %2776 }
0x2b93   :  { %3915 = vmatmul.mubr.msk.bf16.vlgmr.msra.gmra.mrb[76].mxu0 %vm137_vm6, %v2777_v40 }
0x2b94   :  { %3919 = vmatpush3.bf16.msra.mxu0 %v4660_v42  ;;  %3922 = vmatprep.mubr.msk.bf16.mxu0 %vm4235_vm0, %v4234_v0 }
0x2b95   :  { %3920 = vmatprep.subr.bf16.mxu0 %v4234_v0 }
0x2b98   :  { %3921 = vmatpush3.bf16.msra.mxu0 %v4668_v12 }
0x2b99   :  { %3926 = vmatprep.subr.bf16.mxu0 %v4234_v0 }
0x2bc1   :  { %v2730_v3 = vpop.permute.xlu0 %2729 }
0x2bc2   :  { %3899 = vmatmul.mubr.msk.bf16.vlgmr.msra.gmra.mrb[72].mxu1 %vm137_vm6, %v2730_v3 }
0x2bc3   :  { %3903 = vmatpush3.bf16.msra.mxu1 %v4691_v1  ;;  %3906 = vmatprep.mubr.msk.bf16.mxu1 %vm4235_vm0, %v4234_v0 }
0x2bc4   :  { %3904 = vmatprep.subr.bf16.mxu1 %v4234_v0 }
0x2bc7   :  { %3905 = vmatpush3.bf16.msra.mxu1 %v4694_v2 }
0x2bc8   :  { %3934 = vmatprep.subr.bf16.mxu1 %v4234_v0 }
0x2bce   :  { %3907 = vmatmul.mubr.msk.bf16.vlgmr.msra.gmra.mrb[72].mxu1 %vm137_vm6, %v2777_v40 }
0x2bcf   :  { %3935 = vmatpush3.bf16.msra.mxu1 %v4656_v41  ;;  %3938 = vmatprep.mubr.msk.bf16.mxu1 %vm4235_vm0, %v4234_v0 }
0x2bd0   :  { %3936 = vmatprep.subr.bf16.mxu1 %v4234_v0 }
0x2bd3   :  { %3937 = vmatpush3.bf16.msra.mxu1 %v4666_v7 }
0x2bd4   :  { %3942 = vmatprep.subr.bf16.mxu1 %v4234_v0 }
0x2c66   :  { %v2876_v37 = vpop.f32.mrb[76].mxu0 }
0x2c67   :  { %v2877_v43 = vadd.f32 %v4684_v50, %v2876_v37  ;;  %v3916_v44 = vpop.f32.mrb[77].mxu0 }
0x2c68   :  { %v2879_v15 = vpop.f32.mrb[78].mxu0 }
0x2c69   :  { %4158 = vtanh.f32 %v2877_v43  ;;  %v3917_v46 = vpop.f32.mrb[79].mxu0 }
0x2c73   :  { %v4159_v47 = vpop.eup %4158 }
0x2c74   :  { %v2883_v49 = vmul.f32 %v4159_v47, %v4318_v24 }
0x2c76   :  { %v2884_v41 = vadd.f32 %v2883_v49, %v4320_v26 }
0x2c78   :  { %2887 = vrot.lane.b32.xlu1 %v2884_v41, %s4229_s22  ;;  %v2885_v63 = vmul.f32 %v2884_v41, %v4912_v25 }
0x2ca1   :  { %v2815_v51 = vpop.f32.mrb[72].mxu1 }
0x2ca2   :  { %v3991_v52 = vadd.f32 %v4715_v10, %v2815_v51  ;;  %v3908_v7 = vpop.f32.mrb[73].mxu1 }
0x2ca3   :  { %v2818_v53 = vpop.f32.mrb[74].mxu1 }
0x2ca4   :  { %4160 = vtanh.f32 %v3991_v52  ;;  %v3909_v54 = vpop.f32.mrb[75].mxu1 }
0x2cae   :  { %v4161_v55 = vpop.eup %4160 }
0x2caf   :  { %v2823_v56 = vmul.f32 %v4161_v55, %v4318_v24 }
0x2cb1   :  { %v2824_v57 = vadd.f32 %v2823_v56, %v4320_v26 }
0x2cb3   :  { %2827 = vrot.lane.b32.xlu0 %v2824_v57, %s4229_s22  ;;  %v2825_v8 = vmul.f32 %v2824_v57, %v4917_v29 }
0x2cea   :  { %v2888_v59 = vpop.permute.xlu1 %2887 }
0x2ceb   :  { %v2890_v60 = vmul.f32 %v2888_v59, %v2884_v41 }
0x2ced   :  { %2892 = vrot.lane.b32.xlu1 %v2890_v60, %s4238_s0 }
0x2d25   :  { %v2828_v61 = vpop.permute.xlu0 %2827 }
0x2d26   :  { %v2830_v62 = vmul.f32 %v2828_v61, %v2824_v57 }
0x2d28   :  { %2832 = vrot.lane.b32.xlu0 %v2830_v62, %s4238_s0 }
0x2d5f   :  { %v2893_v4 = vpop.permute.xlu1 %2892 }
0x2d60   :  { %v2895_v5 = vadd.f32 %v2893_v4, %v2885_v63 }
0x2d62   :  { %4162 = vtanh.f32 %v2895_v5 }
0x2d6c   :  { %v4163_v6 = vpop.eup %4162 }
0x2d6d   :  { %2898 = vrot.lane.b32.xlu1 %v4163_v6, %s4229_s22 }
0x2d9a   :  { %v2833_v9 = vpop.permute.xlu0 %2832 }
0x2d9b   :  { %v2835_v11 = vadd.f32 %v2833_v9, %v2825_v8 }
0x2d9d   :  { %4164 = vtanh.f32 %v2835_v11 }
0x2da7   :  { %v4165_v13 = vpop.eup %4164 }
0x2da8   :  { %2838 = vrot.lane.b32.xlu0 %v4165_v13, %s4229_s22 }
0x2ddf   :  { %v2899_v14 = vpop.permute.xlu1 %2898 }
0x2de0   :  { %v2901_v16 = vmul.f32 %v2899_v14, %v2884_v41 }
0x2de2   :  { %v2949_v17 = vpack.c.bf16 %v2901_v16, %v2901_v16  ;;  %v3218_v16 = vld [vmem:[#allocation4 + $0x60] sm:$0xff] }
0x2de4   :  { %2951 = vrot.lane.b32.xlu1 %v2949_v17, %s4238_s0  ;;  %v3220_v17 = vld [vmem:[#allocation4 + $0x70] sm:$0xff] }
0x2e1a   :  { %v2839_v18 = vpop.permute.xlu0 %2838 }
0x2e1b   :  { %v4963_v45 = vmul.f32 %v2839_v18, %v2824_v57  ;;  %v3221_v18 = vld [vmem:[#allocation4 + $0x78] sm:$0xff] }
0x2e1d   :  { %v2902_v19 = vpack.c.bf16 %v4963_v45, %v4963_v45  ;;  %v3202_v53 = vrot.slane %v4963_v45, 6  ;;  %v3982_v45 = vpack.c.bf16 %v3221_v18, %v3220_v17 }
0x2e1f   :  { %2904 = vrot.lane.b32.xlu0 %v2902_v19, %s4238_s0  ;;  %v3215_v59 = vsel %vm63_vm1, %v4922_v35, %v3202_v53 }
0x2e56   :  { %v2952_v20 = vpop.permute.xlu1 %2951 }
0x2e57   :  { %3939 = vmatmul.mubr.msk.bf16.vlgmr.msra.gmra.mrb[76].mxu1 %vm137_vm6, %v2952_v20 }
0x2e58   :  { %3943 = vmatpush3.bf16.msra.mxu1 %v4660_v42  ;;  %3946 = vmatprep.mubr.msk.bf16.mxu1 %vm4235_vm0, %v4234_v0 }
0x2e59   :  { %3944 = vmatprep.subr.bf16.mxu1 %v4234_v0 }
0x2e5c   :  { %3945 = vmatpush3.bf16.msra.mxu1 %v4668_v12 }
0x2e5d   :  { %3950 = vmatprep.subr.bf16.mxu1 %v4234_v0 }
0x2e91   :  { %v2905_v21 = vpop.permute.xlu0 %2904 }
0x2e92   :  { %3923 = vmatmul.mubr.msk.bf16.vlgmr.msra.gmra.mrb[80].mxu0 %vm137_vm6, %v2905_v21 }
0x2e93   :  { %3927 = vmatpush3.bf16.msra.mxu0 %v4691_v1  ;;  %3930 = vmatprep.mubr.msk.bf16.mxu0 %vm4235_vm0, %v4234_v0 }
0x2e94   :  { %3928 = vmatprep.subr.bf16.mxu0 %v4234_v0 }
0x2e97   :  { %3929 = vmatpush3.bf16.msra.mxu0 %v4694_v2 }
0x2e9e   :  { %3931 = vmatmul.mubr.msk.bf16.vlgmr.msra.gmra.mrb[80].mxu0 %vm137_vm6, %v2952_v20 }
0x2f2a   :  { %v3051_v42 = vpop.f32.mrb[76].mxu1 }
0x2f2b   :  { %v3052_v22 = vadd.f32 %v4684_v50, %v3051_v42  ;;  %v3940_v12 = vpop.f32.mrb[77].mxu1 }
0x2f2c   :  { %v3054_v23 = vpop.f32.mrb[78].mxu1  ;;  %v3387_v12 = vld [vmem:[#allocation4 + $0x80] ss:$0 sm:$0xff] }
0x2f2d   :  { %4166 = vtanh.f32 %v3052_v22  ;;  %v3941_v34 = vpop.f32.mrb[79].mxu1 }
0x2f37   :  { %v4167_v36 = vpop.eup %4166 }
0x2f38   :  { %v3058_v25 = vmul.f32 %v4167_v36, %v4318_v24 }
0x2f3a   :  { %v3059_v48 = vadd.f32 %v3058_v25, %v4320_v26 }
0x2f3c   :  { %3062 = vrot.lane.b32.xlu1 %v3059_v48, %s4229_s22  ;;  %v3060_v37 = vmul.f32 %v3059_v48, %v2895_v5 }
0x2f71   :  { %v2990_v27 = vpop.f32.mrb[80].mxu0 }
0x2f72   :  { %v3992_v28 = vadd.f32 %v4715_v10, %v2990_v27  ;;  %v3932_v29 = vpop.f32.mrb[81].mxu0 }
0x2f73   :  { %v2993_v30 = vpop.f32.mrb[82].mxu0 }
0x2f74   :  { %4168 = vtanh.f32 %v3992_v28  ;;  %v3933_v31 = vpop.f32.mrb[83].mxu0 }
0x2f7e   :  { %v4169_v32 = vpop.eup %4168 }
0x2f7f   :  { %v2998_v50 = vmul.f32 %v4169_v32, %v4318_v24 }
0x2f81   :  { %v2999_v33 = vadd.f32 %v2998_v50, %v4320_v26 }
0x2f83   :  { %3002 = vrot.lane.b32.xlu0 %v2999_v33, %s4229_s22  ;;  %v3000_v46 = vmul.f32 %v2999_v33, %v2835_v11 }
0x2fae   :  { %v3063_v38 = vpop.permute.xlu1 %3062 }
0x2faf   :  { %v3065_v39 = vmul.f32 %v3063_v38, %v3059_v48 }
0x2fb1   :  { %3067 = vrot.lane.b32.xlu1 %v3065_v39, %s4238_s0 }
0x2ff5   :  { %v3003_v40 = vpop.permute.xlu0 %3002 }
0x2ff6   :  { %v3005_v3 = vmul.f32 %v3003_v40, %v2999_v33 }
0x2ff8   :  { %3007 = vrot.lane.b32.xlu0 %v3005_v3, %s4238_s0 }
0x3023   :  { %v3068_v43 = vpop.permute.xlu1 %3067 }
0x3024   :  { %v3070_v44 = vadd.f32 %v3068_v43, %v3060_v37 }
0x3026   :  { %4170 = vtanh.f32 %v3070_v44 }
0x3030   :  { %v4171_v15 = vpop.eup %4170 }
0x3031   :  { %3073 = vrot.lane.b32.xlu1 %v4171_v15, %s4229_s22 }
0x306a   :  { %v3008_v47 = vpop.permute.xlu0 %3007 }
0x306b   :  { %v3010_v49 = vadd.f32 %v3008_v47, %v3000_v46 }
0x306d   :  { %4172 = vtanh.f32 %v3010_v49 }
0x3077   :  { %v4173_v41 = vpop.eup %4172 }
0x3078   :  { %3013 = vrot.lane.b32.xlu0 %v4173_v41, %s4229_s22 }
0x30a3   :  { %v3074_v51 = vpop.permute.xlu1 %3073 }
0x30a4   :  { %v3076_v52 = vmul.f32 %v3074_v51, %v3059_v48 }
0x30a6   :  { %v3124_v7 = vpack.c.bf16 %v3076_v52, %v3076_v52 }
0x30a8   :  { %3126 = vrot.lane.b32.xlu1 %v3124_v7, %s4238_s0 }
0x30ea   :  { %v3014_v54 = vpop.permute.xlu0 %3013 }
0x30eb   :  { %v3016_v55 = vmul.f32 %v3014_v54, %v2999_v33 }
0x30ed   :  { %v3077_v56 = vpack.c.bf16 %v3016_v55, %v3016_v55  ;;  %v3205_v57 = vrot.slane %v3016_v55, 4 }
0x30ef   :  { %3079 = vrot.lane.b32.xlu0 %v3077_v56, %s4238_s0  ;;  %v3216_v60 = vsel %vm3211_vm8, %v3215_v59, %v3205_v57 }
0x311a   :  { %v3127_v62 = vpop.permute.xlu1 %3126 }
0x3161   :  { %v3080_v61 = vpop.permute.xlu0 %3079 }
0x3162   :  { %3947 = vmatmul.mubr.msk.bf16.vlgmr.msra.gmra.mrb[80].mxu1 %vm137_vm6, %v3080_v61 }
0x3163   :  { %3951 = vmatpush3.bf16.msra.mxu1 %v4691_v1  ;;  %3954 = vmatprep.mubr.msk.bf16.mxu1 %vm4235_vm0, %v4234_v0 }
0x3164   :  { %3952 = vmatprep.subr.bf16.mxu1 %v4234_v0 }
0x3167   :  { %3953 = vmatpush3.bf16.msra.mxu1 %v4694_v2 }
0x316e   :  { %3955 = vmatmul.mubr.msk.bf16.vlgmr.msra.gmra.mrb[80].mxu1 %vm137_vm6, %v3127_v62 }
0x3241   :  { %v3165_v35 = vpop.f32.mrb[80].mxu1 }
0x3242   :  { %v3993_v63 = vadd.f32 %v4715_v10, %v3165_v35  ;;  %v3956_v4 = vpop.f32.mrb[81].mxu1 }
0x3243   :  { %v3168_v5 = vpop.f32.mrb[82].mxu1 }
0x3244   :  { %4174 = vtanh.f32 %v3993_v63  ;;  %v3957_v6 = vpop.f32.mrb[83].mxu1 }
0x324e   :  { %v4175_v8 = vpop.eup %4174 }
0x324f   :  { %v3173_v1 = vmul.f32 %v4175_v8, %v4318_v24  ;;  %v3219_v24 = vld [vmem:[#allocation4 + $0x68] sm:$0xff] }
0x3251   :  { %v3174_v9 = vadd.f32 %v3173_v1, %v4320_v26  ;;  %v3978_v26 = vpack.c.bf16 %v3219_v24, %v3218_v16 }
0x3253   :  { %3177 = vrot.lane.b32.xlu0 %v3174_v9, %s4229_s22  ;;  %v3175_v2 = vmul.f32 %v3174_v9, %v3010_v49  ;;  %3979 = vmatprep.subr.bf16.mxu0 %v3978_v26 }
0x3254   :  { %3981 = vmatpush3.bf16.msra.mxu0 %v3978_v26 }
0x3255   :  { %3983 = vmatprep.subr.bf16.mxu0 %v3982_v45 }
0x3258   :  { %3985 = vmatpush3.bf16.msra.mxu0 %v3982_v45 }
0x32c5   :  { %v3178_v0 = vpop.permute.xlu0 %3177 }
0x32c6   :  { %v3180_v11 = vmul.f32 %v3178_v0, %v3174_v9 }
0x32c8   :  { %3182 = vrot.lane.b32.xlu1 %v3180_v11, %s4238_s0 }
0x32cc   :  { %3229 = vrot.lane.b32.xlu1 %v4878_v58, %s4238_s0 }
0x333a   :  { %v3183_v10 = vpop.permute.xlu1 %3182 }
0x333b   :  { %v3185_v13 = vadd.f32 %v3183_v10, %v3175_v2 }
0x333d   :  { %4176 = vtanh.f32 %v3185_v13 }
0x333e   :  { %v3230_v14 = vpop.permute.xlu1 %3229 }
0x333f   :  { %3966 = vmatprep.mubr.msk.f32.mxu0 %vm137_vm6, %v3230_v14 }
0x3347   :  { %v4177_v19 = vpop.eup %4176 }
0x3348   :  { %3188 = vrot.lane.b32.xlu0 %v4177_v19, %s4229_s22 }
0x33ba   :  { %v3189_v58 = vpop.permute.xlu0 %3188 }
0x33bb   :  { %v3191_v20 = vmul.f32 %v3189_v58, %v3174_v9 }
0x33bd   :  { %v3208_v21 = vrot.slane %v3191_v20, 2 }
0x33bf   :  { %v3217_v42 = vsel %vm3213_vm9, %v3216_v60, %v3208_v21 }
0x33c0   :  { %3231 = vrot.lane.b32.xlu0 %v3217_v42, %s4238_s0 }
0x3432   :  { %v3232_v22 = vpop.permute.xlu0 %3231 }
0x3433   :  { %3967 = vmatmul.mubr.msk.f32.vlgmr.msra.gmra.mrb[84].mxu0 %vm137_vm6, %v3232_v22 }
0x3506   :  { %v3968_v23 = vpop.f32.mrb[84].mxu0 }
0x3507   :  { %v3309_v34 = vadd.f32 %v3968_v23, %v3387_v12  ;;  %v3303_v36 = vpop.f32.mrb[85].mxu0 }
0x3508   :  { %v3304_v25 = vadd.f32 %v3387_v12, %v3303_v36 }
0x3509   :  { %3313 = vst.msk [vmem:[%s5030_s3 + $0x8] sm:$0xff] %vm59_vm2, %v3309_v34 }
0x350a   :  { %3312 = vst.msk [vmem:[%s5030_s3] sm:$0xff] %vm59_vm2, %v3304_v25 }
0x350b   :  { %3318 = vsyncpa [#allocation3], 1 }
0x350c   :  { %3319 = vsyncpa [#allocation5], 1 }

</bundles_post_ra>
